<compile_context>
chip_gen: v6e
topology: v6e:2x2x1
jax: 0.10.0
libtpu: 0.0.40
codegen_flags: <defaults>
</compile_context>

<pallas_src>
import functools

import jax
import jax.numpy as jnp
from jax import lax
from jax.experimental import pallas as pl
from jax.experimental.pallas import tpu as pltpu

_CHUNK = 8  # queries handled per hoisted transpose / per inner static loop


def _round_up(x, m):
    return ((x + m - 1) // m) * m


def _default_compute_dtype():
    """bf16 hinge/matmul on bf16-native chips (v6e, v7x); f32 elsewhere (incl. v5e)."""
    try:
        kind = jax.devices()[0].device_kind.lower()
    except Exception:
        return jnp.float32
    if ("v6" in kind) or ("v7" in kind) or ("7x" in kind):
        return jnp.bfloat16
    return jnp.float32


def _loss_kernel(pred_ref, y_ref, out_ref, *, tq, num_p, k_tile, compute_bce, compute_dtype):
    f32 = jnp.float32
    n_chunks = tq // _CHUNK
    precision = lax.Precision.HIGHEST if compute_dtype == jnp.float32 else None

    # Loop-invariant sublane selector (hoisted: JAX does not CSE broadcast_in_dim).
    row_ids = lax.broadcasted_iota(jnp.int32, (_CHUNK, 1), 0)

    rank0 = jnp.zeros((_CHUNK, num_p), f32)
    carry0 = (rank0, jnp.zeros((_CHUNK, num_p), f32)) if compute_bce else rank0

    def chunk_body(ci, carry):
        rank_acc = carry[0] if compute_bce else carry
        q0 = pl.multiple_of(ci * _CHUNK, _CHUNK)

        p_rows = pred_ref[pl.ds(q0, _CHUNK), :]            # (8, P)  f32
        t_rows = y_ref[pl.ds(q0, _CHUNK), :]               # (8, P)  bf16 labels
        rel_rows = (t_rows == 1.0).astype(compute_dtype)   # (8, P)  y == 1
        nonrel_rows = (t_rows != 1.0).astype(f32)          # (8, P)  y != 1
        p_rows_c = p_rows.astype(compute_dtype)
        # ONE XLU transpose per 8 queries (hoisted out of the per-query loop).
        p_cols = jnp.transpose(p_rows).astype(compute_dtype)   # (P, 8)

        for c in range(_CHUNK):                            # static -> static lane/sublane slices
            p_row = p_rows_c[c:c + 1, :]                   # (1, P)
            p_col = p_cols[:, c:c + 1]                     # (P, 1)
            rel_row = rel_rows[c:c + 1, :]                 # (1, P)
            w_parts = []
            for k0 in range(0, num_p, k_tile):             # column-tile the hinge for large P
                ksz = min(k_tile, num_p - k0)
                # hinge[j, k] = relu(pred[i, k] - pred[i, j]) for k in this lane tile
                hinge = jnp.maximum(p_row[:, k0:k0 + ksz] - p_col, 0.0)        # (P, ksz)
                # w[k] = sum_j rel[j] * hinge[j, k]  -> MXU does the cross-sublane reduction
                w_parts.append(jnp.dot(rel_row, hinge,
                                       preferred_element_type=f32,
                                       precision=precision))                   # (1, ksz) f32
            w = w_parts[0] if len(w_parts) == 1 else jnp.concatenate(w_parts, axis=1)  # (1, P)
            contrib = w * nonrel_rows[c:c + 1, :]          # (1, P) f32
            # place this query's partial into sublane c of the (8, P) accumulator
            rank_acc = rank_acc + jnp.where(row_ids == c, contrib, 0.0)

        if compute_bce:
            bce_acc = carry[1]
            t32 = t_rows.astype(f32)
            # clamp BEFORE the multiply so 0 * (-inf) never appears (PyTorch BCELoss clamp)
            log_p = jnp.maximum(jnp.log(p_rows), -100.0)
            log_1mp = jnp.maximum(jnp.log(1.0 - p_rows), -100.0)
            bce_acc = bce_acc - (t32 * log_p + (1.0 - t32) * log_1mp)
            return rank_acc, bce_acc
        return rank_acc

    carry = lax.fori_loop(0, n_chunks, chunk_body, carry0)

    if compute_bce:
        rank_acc, bce_acc = carry
        out_ref[:, :num_p] = rank_acc                      # fused lane-dense (8, 2P) tile
        out_ref[:, num_p:] = bce_acc
    else:
        out_ref[...] = carry                               # (8, P) tile


def multi_margin_ranking_loss(pred, y, bce_w, *, tq=None, compute_dtype=None):
    """Pallas implementation of MultiMarginRankingLoss.forward."""
    num_q, num_p = pred.shape
    assert y.shape == (num_q, num_p)
    bce_w = float(bce_w)
    compute_bce = bce_w != 0.0
    if compute_dtype is None:
        compute_dtype = _default_compute_dtype()

    pred = pred.astype(jnp.float32)
    # y is a {0,1} relevance indicator -> bf16 is exact for it and halves the label DMA.
    # TODO(synk): pass compute_dtype=..., y in f32 if fractional BCE targets must be supported.
    y = y.astype(jnp.bfloat16)

    if tq is None:
        # Multiple of 16 (safe sublane tiling for bf16 labels), capped at 256, and sized so
        # num_blocks >= 2 whenever there is enough work (feeds both v7x TensorCores).
        tq = max(16, min(256, _round_up(pl.cdiv(num_q, 2), 16)))
    else:
        tq = _round_up(max(int(tq), _CHUNK), 16)
    num_blocks = pl.cdiv(num_q, tq)
    q_pad = num_blocks * tq
    if q_pad != num_q:
        # Padding rows (pred=1, y=1) contribute exactly 0 to both the rank and BCE sums.
        pad = q_pad - num_q
        pred = jnp.concatenate([pred, jnp.ones((pad, num_p), jnp.float32)], axis=0)
        y = jnp.concatenate([y, jnp.ones((pad, num_p), jnp.bfloat16)], axis=0)

    # Column tile for the (P, P) hinge so large num_p does not blow past vregs/VMEM.
    if num_p > 256 and num_p % 128 == 0:
        k_tile = 256 if num_p % 256 == 0 else 128
    else:
        k_tile = num_p

    width = 2 * num_p if compute_bce else num_p
    kernel = functools.partial(_loss_kernel, tq=tq, num_p=num_p, k_tile=k_tile,
                               compute_bce=compute_bce, compute_dtype=compute_dtype)

    cost = pl.CostEstimate(
        flops=4 * q_pad * num_p * num_p,
        transcendentals=(2 * q_pad * num_p) if compute_bce else 0,
        bytes_accessed=4 * q_pad * num_p + 2 * q_pad * num_p + 4 * num_blocks * _CHUNK * width)

    part = pl.pallas_call(
        kernel,
        out_shape=jax.ShapeDtypeStruct((num_blocks * _CHUNK, width), jnp.float32),
        grid=(num_blocks,),
        in_specs=[pl.BlockSpec((tq, num_p), lambda b: (b, 0)),
                  pl.BlockSpec((tq, num_p), lambda b: (b, 0))],
        out_specs=pl.BlockSpec((_CHUNK, width), lambda b: (b, 0)),
        compiler_params=pltpu.CompilerParams(dimension_semantics=("parallel",)),
        cost_estimate=cost,
    )(pred, y)

    # Tiny final combine in plain JAX (keeps the grid axis "parallel" for v7x's 2 TCs).
    rank_loss = jnp.sum(part[:, :num_p]) / num_q
    if not compute_bce:
        return rank_loss
    bce_loss = jnp.sum(part[:, num_p:]) / (num_q * num_p)
    return (1.0 - bce_w) * rank_loss + bce_w * bce_loss


def _reference_loss(pred, y, bce_w):
    """Pure-JAX reference mirroring the PyTorch semantics (vectorized)."""
    rel = (y == 1.0).astype(jnp.float32)
    nonrel = 1.0 - rel
    # diff[i, j, k] = pred[i, k] - pred[i, j]
    diff = pred[:, None, :] - pred[:, :, None]
    pair = jnp.maximum(diff, 0.0) * rel[:, :, None] * nonrel[:, None, :]
    rank = jnp.sum(pair) / pred.shape[0]
    if bce_w == 0.0:
        return rank
    log_p = jnp.maximum(jnp.log(pred), -100.0)
    log_1mp = jnp.maximum(jnp.log(1.0 - pred), -100.0)
    bce = jnp.mean(-(y * log_p + (1.0 - y) * log_1mp))
    return (1.0 - bce_w) * rank + bce_w * bce


if __name__ == "__main__":
    # config equivalent: {'training': {'bce': 0.3}} -> bce_w = 0.3 (truthy -> BCE branch on)
    config = {"training": {"bce": 0.3}}
    bce_w = config["training"]["bce"]

    num_q, num_p = 8, 128
    key = jax.random.PRNGKey(0)
    k_pred, k_y = jax.random.split(key)
    pred = jax.nn.sigmoid(jax.random.normal(k_pred, (num_q, num_p), jnp.float32))
    y = (jax.random.uniform(k_y, (num_q, num_p)) < 0.15).astype(jnp.float32)

    # Tolerance matches the per-chip compute dtype (bf16 hinge on v6e/v7x, f32 elsewhere).
    tol = 1e-4 if _default_compute_dtype() == jnp.float32 else 1e-2

    # BCE-mixed path
    out = jax.block_until_ready(multi_margin_ranking_loss(pred, y, bce_w))
    ref = _reference_loss(pred, y, bce_w)
    assert jnp.allclose(out, ref, rtol=tol, atol=tol), (out, ref)

    # Rank-only path (bce_w == 0 -> BCE math and output half skipped entirely)
    out0 = jax.block_until_ready(multi_margin_ranking_loss(pred, y, 0.0))
    ref0 = _reference_loss(pred, y, 0.0)
    assert jnp.allclose(out0, ref0, rtol=tol, atol=tol), (out0, ref0)

    print("KERNEL_OK")
</pallas_src>

<mosaic_0001>
module attributes {stable_mosaic.version = 11 : i64} {
  func.func @_loss_kernel(%arg0: i32, %arg1: memref<16x128xf32, #tpu.memory_space<vmem>>, %arg2: memref<16x128xbf16, #tpu.memory_space<vmem>>, %arg3: memref<8x256xf32, #tpu.memory_space<vmem>>) attributes {dimension_semantics = [#tpu.dimension_semantics<parallel>], iteration_bounds = array<i64: 1>, scalar_prefetch = 0 : i64, scratch_operands = 0 : i64, tpu.core_type = #tpu.core_type<tc>, window_params = [{transform_indices = @transform_0, window_bounds = array<i64: 16, 128>}, {transform_indices = @transform_1, window_bounds = array<i64: 16, 128>}, {transform_indices = @transform_2, window_bounds = array<i64: 8, 256>}]} {
    %0 = tpu.iota {dimensions = array<i32: 0>} : vector<8x1xi32>
    %cst = arith.constant 0.000000e+00 : f32
    %1 = vector.broadcast %cst : f32 to vector<8x128xf32>
    %cst_0 = arith.constant 0.000000e+00 : f32
    %2 = vector.broadcast %cst_0 : f32 to vector<8x128xf32>
    %c0_i32 = arith.constant 0 : i32
    %c2_i32 = arith.constant 2 : i32
    %3 = arith.addi %c0_i32, %c2_i32 : i32
    %c1_i32 = arith.constant 1 : i32
    %4:2 = scf.for %arg4 = %c0_i32 to %3 step %c1_i32 iter_args(%arg5 = %1, %arg6 = %2) -> (vector<8x128xf32>, vector<8x128xf32>)  : i32 {
      %c8_i32 = arith.constant 8 : i32
      %7 = arith.muli %arg4, %c8_i32 : i32
      %8 = tpu.assume_multiple %7, 8 : i32
      %9 = arith.index_cast %8 : i32 to index
      %c0_4 = arith.constant 0 : index
      %10 = vector.load %arg1[%9, %c0_4] : memref<16x128xf32, #tpu.memory_space<vmem>>, vector<8x128xf32>
      %11 = arith.index_cast %8 : i32 to index
      %c0_5 = arith.constant 0 : index
      %12 = vector.load %arg2[%11, %c0_5] : memref<16x128xbf16, #tpu.memory_space<vmem>>, vector<8x128xbf16>
      %cst_6 = arith.constant 1.000000e+00 : bf16
      %13 = vector.broadcast %cst_6 : bf16 to vector<8x128xbf16>
      %14 = arith.cmpf oeq, %12, %13 : vector<8x128xbf16>
      %15 = arith.extui %14 : vector<8x128xi1> to vector<8x128xi32>
      %16 = arith.sitofp %15 : vector<8x128xi32> to vector<8x128xf32>
      %cst_7 = arith.constant 1.000000e+00 : bf16
      %17 = vector.broadcast %cst_7 : bf16 to vector<8x128xbf16>
      %18 = arith.cmpf one, %12, %17 : vector<8x128xbf16>
      %19 = arith.extui %18 : vector<8x128xi1> to vector<8x128xi32>
      %20 = arith.sitofp %19 : vector<8x128xi32> to vector<8x128xf32>
      %21 = tpu.transpose %10, [1, 0] : vector<8x128xf32> -> vector<128x8xf32>
      %22 = vector.extract_strided_slice %10 {offsets = [0, 0], sizes = [1, 128], strides = [1, 1]} : vector<8x128xf32> to vector<1x128xf32>
      %23 = vector.extract_strided_slice %21 {offsets = [0, 0], sizes = [128, 1], strides = [1, 1]} : vector<128x8xf32> to vector<128x1xf32>
      %24 = vector.extract_strided_slice %16 {offsets = [0, 0], sizes = [1, 128], strides = [1, 1]} : vector<8x128xf32> to vector<1x128xf32>
      %25 = vector.broadcast %22 : vector<1x128xf32> to vector<128x128xf32>
      %26 = vector.broadcast %23 : vector<128x1xf32> to vector<128x128xf32>
      %27 = arith.subf %25, %26 : vector<128x128xf32>
      %cst_8 = arith.constant 0.000000e+00 : f32
      %28 = vector.broadcast %cst_8 : f32 to vector<128x128xf32>
      %29 = arith.maximumf %27, %28 : vector<128x128xf32>
      %cst_9 = arith.constant dense<0.000000e+00> : vector<1x128xf32>
      %30 = tpu.matmul %24, %29, %cst_9 {dimension_numbers = #tpu.dot_dimension_numbers<[1], [0], [0], [1], [0, 0, 1, 1], [], []>, precision = #tpu.contract_precision<fp32>} : vector<1x128xf32>, vector<128x128xf32>, vector<1x128xf32> -> vector<1x128xf32>
      %31 = vector.extract_strided_slice %20 {offsets = [0, 0], sizes = [1, 128], strides = [1, 1]} : vector<8x128xf32> to vector<1x128xf32>
      %32 = arith.mulf %30, %31 : vector<1x128xf32>
      %c0_i32_10 = arith.constant 0 : i32
      %33 = vector.broadcast %c0_i32_10 : i32 to vector<8x1xi32>
      %34 = arith.cmpi eq, %0, %33 : vector<8x1xi32>
      %cst_11 = arith.constant 0.000000e+00 : f32
      %35 = vector.shape_cast %34 : vector<8x1xi1> to vector<8x1xi1>
      %36 = vector.broadcast %35 : vector<8x1xi1> to vector<8x128xi1>
      %37 = vector.shape_cast %32 : vector<1x128xf32> to vector<1x128xf32>
      %38 = vector.broadcast %37 : vector<1x128xf32> to vector<8x128xf32>
      %39 = vector.broadcast %cst_11 : f32 to vector<8x128xf32>
      %40 = arith.select %36, %38, %39 : vector<8x128xi1>, vector<8x128xf32>
      %41 = arith.addf %arg5, %40 : vector<8x128xf32>
      %42 = vector.extract_strided_slice %10 {offsets = [1, 0], sizes = [1, 128], strides = [1, 1]} : vector<8x128xf32> to vector<1x128xf32>
      %43 = vector.extract_strided_slice %21 {offsets = [0, 1], sizes = [128, 1], strides = [1, 1]} : vector<128x8xf32> to vector<128x1xf32>
      %44 = vector.extract_strided_slice %16 {offsets = [1, 0], sizes = [1, 128], strides = [1, 1]} : vector<8x128xf32> to vector<1x128xf32>
      %45 = vector.broadcast %42 : vector<1x128xf32> to vector<128x128xf32>
      %46 = vector.broadcast %43 : vector<128x1xf32> to vector<128x128xf32>
      %47 = arith.subf %45, %46 : vector<128x128xf32>
      %cst_12 = arith.constant 0.000000e+00 : f32
      %48 = vector.broadcast %cst_12 : f32 to vector<128x128xf32>
      %49 = arith.maximumf %47, %48 : vector<128x128xf32>
      %cst_13 = arith.constant dense<0.000000e+00> : vector<1x128xf32>
      %50 = tpu.matmul %44, %49, %cst_13 {dimension_numbers = #tpu.dot_dimension_numbers<[1], [0], [0], [1], [0, 0, 1, 1], [], []>, precision = #tpu.contract_precision<fp32>} : vector<1x128xf32>, vector<128x128xf32>, vector<1x128xf32> -> vector<1x128xf32>
      %51 = vector.extract_strided_slice %20 {offsets = [1, 0], sizes = [1, 128], strides = [1, 1]} : vector<8x128xf32> to vector<1x128xf32>
      %52 = arith.mulf %50, %51 : vector<1x128xf32>
      %c1_i32_14 = arith.constant 1 : i32
      %53 = vector.broadcast %c1_i32_14 : i32 to vector<8x1xi32>
      %54 = arith.cmpi eq, %0, %53 : vector<8x1xi32>
      %cst_15 = arith.constant 0.000000e+00 : f32
      %55 = vector.shape_cast %54 : vector<8x1xi1> to vector<8x1xi1>
      %56 = vector.broadcast %55 : vector<8x1xi1> to vector<8x128xi1>
      %57 = vector.shape_cast %52 : vector<1x128xf32> to vector<1x128xf32>
      %58 = vector.broadcast %57 : vector<1x128xf32> to vector<8x128xf32>
      %59 = vector.broadcast %cst_15 : f32 to vector<8x128xf32>
      %60 = arith.select %56, %58, %59 : vector<8x128xi1>, vector<8x128xf32>
      %61 = arith.addf %41, %60 : vector<8x128xf32>
      %62 = vector.extract_strided_slice %10 {offsets = [2, 0], sizes = [1, 128], strides = [1, 1]} : vector<8x128xf32> to vector<1x128xf32>
      %63 = vector.extract_strided_slice %21 {offsets = [0, 2], sizes = [128, 1], strides = [1, 1]} : vector<128x8xf32> to vector<128x1xf32>
      %64 = vector.extract_strided_slice %16 {offsets = [2, 0], sizes = [1, 128], strides = [1, 1]} : vector<8x128xf32> to vector<1x128xf32>
      %65 = vector.broadcast %62 : vector<1x128xf32> to vector<128x128xf32>
      %66 = vector.broadcast %63 : vector<128x1xf32> to vector<128x128xf32>
      %67 = arith.subf %65, %66 : vector<128x128xf32>
      %cst_16 = arith.constant 0.000000e+00 : f32
      %68 = vector.broadcast %cst_16 : f32 to vector<128x128xf32>
      %69 = arith.maximumf %67, %68 : vector<128x128xf32>
      %cst_17 = arith.constant dense<0.000000e+00> : vector<1x128xf32>
      %70 = tpu.matmul %64, %69, %cst_17 {dimension_numbers = #tpu.dot_dimension_numbers<[1], [0], [0], [1], [0, 0, 1, 1], [], []>, precision = #tpu.contract_precision<fp32>} : vector<1x128xf32>, vector<128x128xf32>, vector<1x128xf32> -> vector<1x128xf32>
      %71 = vector.extract_strided_slice %20 {offsets = [2, 0], sizes = [1, 128], strides = [1, 1]} : vector<8x128xf32> to vector<1x128xf32>
      %72 = arith.mulf %70, %71 : vector<1x128xf32>
      %c2_i32_18 = arith.constant 2 : i32
      %73 = vector.broadcast %c2_i32_18 : i32 to vector<8x1xi32>
      %74 = arith.cmpi eq, %0, %73 : vector<8x1xi32>
      %cst_19 = arith.constant 0.000000e+00 : f32
      %75 = vector.shape_cast %74 : vector<8x1xi1> to vector<8x1xi1>
      %76 = vector.broadcast %75 : vector<8x1xi1> to vector<8x128xi1>
      %77 = vector.shape_cast %72 : vector<1x128xf32> to vector<1x128xf32>
      %78 = vector.broadcast %77 : vector<1x128xf32> to vector<8x128xf32>
      %79 = vector.broadcast %cst_19 : f32 to vector<8x128xf32>
      %80 = arith.select %76, %78, %79 : vector<8x128xi1>, vector<8x128xf32>
      %81 = arith.addf %61, %80 : vector<8x128xf32>
      %82 = vector.extract_strided_slice %10 {offsets = [3, 0], sizes = [1, 128], strides = [1, 1]} : vector<8x128xf32> to vector<1x128xf32>
      %83 = vector.extract_strided_slice %21 {offsets = [0, 3], sizes = [128, 1], strides = [1, 1]} : vector<128x8xf32> to vector<128x1xf32>
      %84 = vector.extract_strided_slice %16 {offsets = [3, 0], sizes = [1, 128], strides = [1, 1]} : vector<8x128xf32> to vector<1x128xf32>
      %85 = vector.broadcast %82 : vector<1x128xf32> to vector<128x128xf32>
      %86 = vector.broadcast %83 : vector<128x1xf32> to vector<128x128xf32>
      %87 = arith.subf %85, %86 : vector<128x128xf32>
      %cst_20 = arith.constant 0.000000e+00 : f32
      %88 = vector.broadcast %cst_20 : f32 to vector<128x128xf32>
      %89 = arith.maximumf %87, %88 : vector<128x128xf32>
      %cst_21 = arith.constant dense<0.000000e+00> : vector<1x128xf32>
      %90 = tpu.matmul %84, %89, %cst_21 {dimension_numbers = #tpu.dot_dimension_numbers<[1], [0], [0], [1], [0, 0, 1, 1], [], []>, precision = #tpu.contract_precision<fp32>} : vector<1x128xf32>, vector<128x128xf32>, vector<1x128xf32> -> vector<1x128xf32>
      %91 = vector.extract_strided_slice %20 {offsets = [3, 0], sizes = [1, 128], strides = [1, 1]} : vector<8x128xf32> to vector<1x128xf32>
      %92 = arith.mulf %90, %91 : vector<1x128xf32>
      %c3_i32 = arith.constant 3 : i32
      %93 = vector.broadcast %c3_i32 : i32 to vector<8x1xi32>
      %94 = arith.cmpi eq, %0, %93 : vector<8x1xi32>
      %cst_22 = arith.constant 0.000000e+00 : f32
      %95 = vector.shape_cast %94 : vector<8x1xi1> to vector<8x1xi1>
      %96 = vector.broadcast %95 : vector<8x1xi1> to vector<8x128xi1>
      %97 = vector.shape_cast %92 : vector<1x128xf32> to vector<1x128xf32>
      %98 = vector.broadcast %97 : vector<1x128xf32> to vector<8x128xf32>
      %99 = vector.broadcast %cst_22 : f32 to vector<8x128xf32>
      %100 = arith.select %96, %98, %99 : vector<8x128xi1>, vector<8x128xf32>
      %101 = arith.addf %81, %100 : vector<8x128xf32>
      %102 = vector.extract_strided_slice %10 {offsets = [4, 0], sizes = [1, 128], strides = [1, 1]} : vector<8x128xf32> to vector<1x128xf32>
      %103 = vector.extract_strided_slice %21 {offsets = [0, 4], sizes = [128, 1], strides = [1, 1]} : vector<128x8xf32> to vector<128x1xf32>
      %104 = vector.extract_strided_slice %16 {offsets = [4, 0], sizes = [1, 128], strides = [1, 1]} : vector<8x128xf32> to vector<1x128xf32>
      %105 = vector.broadcast %102 : vector<1x128xf32> to vector<128x128xf32>
      %106 = vector.broadcast %103 : vector<128x1xf32> to vector<128x128xf32>
      %107 = arith.subf %105, %106 : vector<128x128xf32>
      %cst_23 = arith.constant 0.000000e+00 : f32
      %108 = vector.broadcast %cst_23 : f32 to vector<128x128xf32>
      %109 = arith.maximumf %107, %108 : vector<128x128xf32>
      %cst_24 = arith.constant dense<0.000000e+00> : vector<1x128xf32>
      %110 = tpu.matmul %104, %109, %cst_24 {dimension_numbers = #tpu.dot_dimension_numbers<[1], [0], [0], [1], [0, 0, 1, 1], [], []>, precision = #tpu.contract_precision<fp32>} : vector<1x128xf32>, vector<128x128xf32>, vector<1x128xf32> -> vector<1x128xf32>
      %111 = vector.extract_strided_slice %20 {offsets = [4, 0], sizes = [1, 128], strides = [1, 1]} : vector<8x128xf32> to vector<1x128xf32>
      %112 = arith.mulf %110, %111 : vector<1x128xf32>
      %c4_i32 = arith.constant 4 : i32
      %113 = vector.broadcast %c4_i32 : i32 to vector<8x1xi32>
      %114 = arith.cmpi eq, %0, %113 : vector<8x1xi32>
      %cst_25 = arith.constant 0.000000e+00 : f32
      %115 = vector.shape_cast %114 : vector<8x1xi1> to vector<8x1xi1>
      %116 = vector.broadcast %115 : vector<8x1xi1> to vector<8x128xi1>
      %117 = vector.shape_cast %112 : vector<1x128xf32> to vector<1x128xf32>
      %118 = vector.broadcast %117 : vector<1x128xf32> to vector<8x128xf32>
      %119 = vector.broadcast %cst_25 : f32 to vector<8x128xf32>
      %120 = arith.select %116, %118, %119 : vector<8x128xi1>, vector<8x128xf32>
      %121 = arith.addf %101, %120 : vector<8x128xf32>
      %122 = vector.extract_strided_slice %10 {offsets = [5, 0], sizes = [1, 128], strides = [1, 1]} : vector<8x128xf32> to vector<1x128xf32>
      %123 = vector.extract_strided_slice %21 {offsets = [0, 5], sizes = [128, 1], strides = [1, 1]} : vector<128x8xf32> to vector<128x1xf32>
      %124 = vector.extract_strided_slice %16 {offsets = [5, 0], sizes = [1, 128], strides = [1, 1]} : vector<8x128xf32> to vector<1x128xf32>
      %125 = vector.broadcast %122 : vector<1x128xf32> to vector<128x128xf32>
      %126 = vector.broadcast %123 : vector<128x1xf32> to vector<128x128xf32>
      %127 = arith.subf %125, %126 : vector<128x128xf32>
      %cst_26 = arith.constant 0.000000e+00 : f32
      %128 = vector.broadcast %cst_26 : f32 to vector<128x128xf32>
      %129 = arith.maximumf %127, %128 : vector<128x128xf32>
      %cst_27 = arith.constant dense<0.000000e+00> : vector<1x128xf32>
      %130 = tpu.matmul %124, %129, %cst_27 {dimension_numbers = #tpu.dot_dimension_numbers<[1], [0], [0], [1], [0, 0, 1, 1], [], []>, precision = #tpu.contract_precision<fp32>} : vector<1x128xf32>, vector<128x128xf32>, vector<1x128xf32> -> vector<1x128xf32>
      %131 = vector.extract_strided_slice %20 {offsets = [5, 0], sizes = [1, 128], strides = [1, 1]} : vector<8x128xf32> to vector<1x128xf32>
      %132 = arith.mulf %130, %131 : vector<1x128xf32>
      %c5_i32 = arith.constant 5 : i32
      %133 = vector.broadcast %c5_i32 : i32 to vector<8x1xi32>
      %134 = arith.cmpi eq, %0, %133 : vector<8x1xi32>
      %cst_28 = arith.constant 0.000000e+00 : f32
      %135 = vector.shape_cast %134 : vector<8x1xi1> to vector<8x1xi1>
      %136 = vector.broadcast %135 : vector<8x1xi1> to vector<8x128xi1>
      %137 = vector.shape_cast %132 : vector<1x128xf32> to vector<1x128xf32>
      %138 = vector.broadcast %137 : vector<1x128xf32> to vector<8x128xf32>
      %139 = vector.broadcast %cst_28 : f32 to vector<8x128xf32>
      %140 = arith.select %136, %138, %139 : vector<8x128xi1>, vector<8x128xf32>
      %141 = arith.addf %121, %140 : vector<8x128xf32>
      %142 = vector.extract_strided_slice %10 {offsets = [6, 0], sizes = [1, 128], strides = [1, 1]} : vector<8x128xf32> to vector<1x128xf32>
      %143 = vector.extract_strided_slice %21 {offsets = [0, 6], sizes = [128, 1], strides = [1, 1]} : vector<128x8xf32> to vector<128x1xf32>
      %144 = vector.extract_strided_slice %16 {offsets = [6, 0], sizes = [1, 128], strides = [1, 1]} : vector<8x128xf32> to vector<1x128xf32>
      %145 = vector.broadcast %142 : vector<1x128xf32> to vector<128x128xf32>
      %146 = vector.broadcast %143 : vector<128x1xf32> to vector<128x128xf32>
      %147 = arith.subf %145, %146 : vector<128x128xf32>
      %cst_29 = arith.constant 0.000000e+00 : f32
      %148 = vector.broadcast %cst_29 : f32 to vector<128x128xf32>
      %149 = arith.maximumf %147, %148 : vector<128x128xf32>
      %cst_30 = arith.constant dense<0.000000e+00> : vector<1x128xf32>
      %150 = tpu.matmul %144, %149, %cst_30 {dimension_numbers = #tpu.dot_dimension_numbers<[1], [0], [0], [1], [0, 0, 1, 1], [], []>, precision = #tpu.contract_precision<fp32>} : vector<1x128xf32>, vector<128x128xf32>, vector<1x128xf32> -> vector<1x128xf32>
      %151 = vector.extract_strided_slice %20 {offsets = [6, 0], sizes = [1, 128], strides = [1, 1]} : vector<8x128xf32> to vector<1x128xf32>
      %152 = arith.mulf %150, %151 : vector<1x128xf32>
      %c6_i32 = arith.constant 6 : i32
      %153 = vector.broadcast %c6_i32 : i32 to vector<8x1xi32>
      %154 = arith.cmpi eq, %0, %153 : vector<8x1xi32>
      %cst_31 = arith.constant 0.000000e+00 : f32
      %155 = vector.shape_cast %154 : vector<8x1xi1> to vector<8x1xi1>
      %156 = vector.broadcast %155 : vector<8x1xi1> to vector<8x128xi1>
      %157 = vector.shape_cast %152 : vector<1x128xf32> to vector<1x128xf32>
      %158 = vector.broadcast %157 : vector<1x128xf32> to vector<8x128xf32>
      %159 = vector.broadcast %cst_31 : f32 to vector<8x128xf32>
      %160 = arith.select %156, %158, %159 : vector<8x128xi1>, vector<8x128xf32>
      %161 = arith.addf %141, %160 : vector<8x128xf32>
      %162 = vector.extract_strided_slice %10 {offsets = [7, 0], sizes = [1, 128], strides = [1, 1]} : vector<8x128xf32> to vector<1x128xf32>
      %163 = vector.extract_strided_slice %21 {offsets = [0, 7], sizes = [128, 1], strides = [1, 1]} : vector<128x8xf32> to vector<128x1xf32>
      %164 = vector.extract_strided_slice %16 {offsets = [7, 0], sizes = [1, 128], strides = [1, 1]} : vector<8x128xf32> to vector<1x128xf32>
      %165 = vector.broadcast %162 : vector<1x128xf32> to vector<128x128xf32>
      %166 = vector.broadcast %163 : vector<128x1xf32> to vector<128x128xf32>
      %167 = arith.subf %165, %166 : vector<128x128xf32>
      %cst_32 = arith.constant 0.000000e+00 : f32
      %168 = vector.broadcast %cst_32 : f32 to vector<128x128xf32>
      %169 = arith.maximumf %167, %168 : vector<128x128xf32>
      %cst_33 = arith.constant dense<0.000000e+00> : vector<1x128xf32>
      %170 = tpu.matmul %164, %169, %cst_33 {dimension_numbers = #tpu.dot_dimension_numbers<[1], [0], [0], [1], [0, 0, 1, 1], [], []>, precision = #tpu.contract_precision<fp32>} : vector<1x128xf32>, vector<128x128xf32>, vector<1x128xf32> -> vector<1x128xf32>
      %171 = vector.extract_strided_slice %20 {offsets = [7, 0], sizes = [1, 128], strides = [1, 1]} : vector<8x128xf32> to vector<1x128xf32>
      %172 = arith.mulf %170, %171 : vector<1x128xf32>
      %c7_i32 = arith.constant 7 : i32
      %173 = vector.broadcast %c7_i32 : i32 to vector<8x1xi32>
      %174 = arith.cmpi eq, %0, %173 : vector<8x1xi32>
      %cst_34 = arith.constant 0.000000e+00 : f32
      %175 = vector.shape_cast %174 : vector<8x1xi1> to vector<8x1xi1>
      %176 = vector.broadcast %175 : vector<8x1xi1> to vector<8x128xi1>
      %177 = vector.shape_cast %172 : vector<1x128xf32> to vector<1x128xf32>
      %178 = vector.broadcast %177 : vector<1x128xf32> to vector<8x128xf32>
      %179 = vector.broadcast %cst_34 : f32 to vector<8x128xf32>
      %180 = arith.select %176, %178, %179 : vector<8x128xi1>, vector<8x128xf32>
      %181 = arith.addf %161, %180 : vector<8x128xf32>
      %182 = arith.extf %12 : vector<8x128xbf16> to vector<8x128xf32>
      %183 = math.log %10 : vector<8x128xf32>
      %cst_35 = arith.constant -1.000000e+02 : f32
      %184 = vector.broadcast %cst_35 : f32 to vector<8x128xf32>
      %185 = arith.maximumf %183, %184 : vector<8x128xf32>
      %cst_36 = arith.constant 1.000000e+00 : f32
      %186 = vector.broadcast %cst_36 : f32 to vector<8x128xf32>
      %187 = arith.subf %186, %10 : vector<8x128xf32>
      %188 = math.log %187 : vector<8x128xf32>
      %cst_37 = arith.constant -1.000000e+02 : f32
      %189 = vector.broadcast %cst_37 : f32 to vector<8x128xf32>
      %190 = arith.maximumf %188, %189 : vector<8x128xf32>
      %191 = arith.mulf %182, %185 : vector<8x128xf32>
      %cst_38 = arith.constant 1.000000e+00 : f32
      %192 = vector.broadcast %cst_38 : f32 to vector<8x128xf32>
      %193 = arith.subf %192, %182 : vector<8x128xf32>
      %194 = arith.mulf %193, %190 : vector<8x128xf32>
      %195 = arith.addf %191, %194 : vector<8x128xf32>
      %196 = arith.subf %arg6, %195 : vector<8x128xf32>
      scf.yield %181, %196 : vector<8x128xf32>, vector<8x128xf32>
    }
    %c2_i32_1 = arith.constant 2 : i32
    %c0 = arith.constant 0 : index
    %c0_2 = arith.constant 0 : index
    %5 = vector.load %arg3[%c0, %c0_2] : memref<8x256xf32, #tpu.memory_space<vmem>>, vector<8x128xf32>
    tpu.vector_store %arg3[%c0, %c0_2], %4#0 {strides = array<i32>} : memref<8x256xf32, #tpu.memory_space<vmem>>, vector<8x128xf32>,
    %c0_3 = arith.constant 0 : index
    %c128 = arith.constant 128 : index
    %6 = vector.load %arg3[%c0_3, %c128] : memref<8x256xf32, #tpu.memory_space<vmem>>, vector<8x128xf32>
    tpu.vector_store %arg3[%c0_3, %c128], %4#1 {strides = array<i32>} : memref<8x256xf32, #tpu.memory_space<vmem>>, vector<8x128xf32>,
    return
  }
  func.func @transform_0(%arg0: i32) -> (i32, i32) {
    %c0_i32 = arith.constant 0 : i32
    %c0_i32_0 = arith.constant 0 : i32
    return %arg0, %c0_i32 : i32, i32
  }
  func.func @transform_1(%arg0: i32) -> (i32, i32) {
    %c0_i32 = arith.constant 0 : i32
    %c0_i32_0 = arith.constant 0 : i32
    return %arg0, %c0_i32 : i32, i32
  }
  func.func @transform_2(%arg0: i32) -> (i32, i32) {
    %c0_i32 = arith.constant 0 : i32
    %c0_i32_0 = arith.constant 0 : i32
    return %arg0, %c0_i32 : i32, i32
  }
}

</mosaic_0001>

<bundles_post_ra>
// kernel: tpu_custom_call.1
= control target key start
LH: loop header
LB: loop body
LE: loop exit
PB: predicated region body
PF: predicated region fallthrough
CT: control target
= control target key end

     0   :  { %7 = vsyncpa [#allocation3], 0  ;;  %s12353_s0 = inlined_call_operand.hbm [shape: f32[16,128], index: 0, kind: input, shape index: {}]   ;;  %s12354_s1 = inlined_call_operand.hbm [shape: bf16[16,128], index: 1, kind: input, shape index: {}]   ;;  %s12355_s2 = inlined_call_operand.hbm [shape: f32[8,256], index: 2, kind: output, shape index: {}]  }
   0x1   :  { %8 = vsyncpa [#allocation6], 0 }
   0x2   :  { %9 = vsyncpa [#allocation4], 0  ;;  %s8863_s9 = smov [#allocation2]  }
   0x3   :  { %s15_s10 = sshll.u32 %s8863_s9, 4  ;;  %s16_s10 = int_to_ptr.vmem [resolvable:$true] %s15_s10 }
   0x4   :  { %s8781_s11 = scalar_lea.vmem %s16_s10, 256  ;;  %p8786_p1 = scmp.lt.s32.totalorder %s16_s10, %s16_s10 }
   0x5   :  { %p8782_p0 = scmp.ne.s32.totalorder %s16_s10, %s8781_s11  ;;  %p8787_p2 = scmp.lt.s32.totalorder %s8781_s11, %s8781_s11 }
   0x7   :  { %p8788_p3 = por %p8787_p2, %p8786_p1 }
   0x9   :  { %p8789_p4 = pnand %p8788_p3, %p8782_p0 }
   0xb   :  { %8792 = shalt.err (!%p8789_p4)
}
   0xc   :  { %s8864_s12 = smov 128   ;;  %s8865_s13 = smov 8  }
   0xd   :  { %21 = dma.hbm_to_vmem [thread:$0]  %s12353_s0, 256, %s16_s10, [#allocation3], %s8864_s12, %s8864_s12, %s8865_s13  }
   0xe   :  { %s8866_s16 = smov [#allocation5]  }
   0xf   :  { %s27_s17 = sshll.u32 %s8866_s16, 4  ;;  %s28_s17 = int_to_ptr.vmem [resolvable:$true] %s27_s17 }
  0x10   :  { %s8801_s18 = scalar_lea.vmem %s28_s17, 128  ;;  %p8806_p6 = scmp.lt.s32.totalorder %s28_s17, %s28_s17 }
  0x11   :  { %p8802_p5 = scmp.ne.s32.totalorder %s28_s17, %s8801_s18  ;;  %p8807_p7 = scmp.lt.s32.totalorder %s8801_s18, %s8801_s18 }
  0x13   :  { %p8808_p8 = por %p8807_p7, %p8806_p6 }
  0x15   :  { %p8809_p9 = pnand %p8808_p8, %p8802_p5 }
  0x17   :  { %8812 = shalt.err (!%p8809_p9)
}
  0x18   :  { %s8867_s19 = smov 64   ;;  %s8868_s20 = smov 4  }
  0x19   :  { %33 = dma.hbm_to_vmem [thread:$0]  %s12354_s1, 128, %s28_s17, [#allocation6], %s8867_s19, %s8867_s19, %s8868_s20  }
  0x1a   :  { %8845 = dma.done.wait [#allocation3], 256  }
  0x1b   :  { %8846 = vsyncadd [#allocation3], 4294967040 }
  0x1c   :  { %8847 = dma.done.wait [#allocation6], 128  }
  0x1d   :  { %8848 = vsyncadd [#allocation6], 4294967168  ;;  %v43_v0 = vlaneseq  ;;  %v8904_v2 = vmov 0.0   ;;  %v8906_v3 = vmov 0.0   ;;  %s8908_s0 = smov 0  }
  0x1f   :  { %v8902_v1 = vshrl.u32 %v43_v0, 7 }
  0x20 LB: > { %12412 = vst [vmem:[#allocation11_spill] sm:$0xff] %v8857_v3  ;;  %s6205_s1 = sshll.u32 %s8861_s0, 3  ;;  %v8869_v5 = vmov 0   ;;  %v12372_v7 = vmov 0.0   ;;  %v8871_v39 = vmov 1   ;;  %v8872_v40 = vmov 2   ;;  %s8861_s0 = sphi %s8908_s0, %s50_s0   ;;  %v8857_v3 = vphi %v8906_v3, %v12472_v3   ;;  %v8853_v2 = vphi %v8904_v2, %v12471_v2  }
  0x21   : > { %s8918_s23 = scalar_lea.vmem [#allocation2], %s6205_s1  ;;  %s56_s24 = sshra.s32 %s6205_s1, 3  ;;  %8751 = vset.pattern.permute.xlu1 %v8869_v5  ;;  %7028 = vmatprep.subr.mxu0 %v12372_v7  ;;  %v8873_v41 = vmov 3   ;;  %vm8874_vm2 = vmmov 0   ;;  %v12371_v42 = vmov 4   ;;  %v12367_v43 = vmov 5  }
  0x22   : > { %v8921_v4 = vld [vmem:[%s8918_s23] sm:$0xff]  ;;  %s6206_s25 = sshll.u32 %s56_s24, 2  ;;  %7063 = vmatprep.subr.mxu1 %v12372_v7  ;;  %7060 = vmatprep.mubr.msk.f32.mxu0 %vm8874_vm2, %v12372_v7  ;;  %v9030_v44 = vsub.s32 0, %v8902_v1  ;;  %vm863_vm5 = vcmp.eq.s32.totalorder %v8902_v1, 0  ;;  %vm1620_vm6 = vcmp.eq.s32.totalorder %v8902_v1, 1  ;;  %vm2375_vm7 = vcmp.eq.s32.totalorder %v8902_v1, 2 }
  0x23   : > { %73 = vxpose.xlu0.b32.start.end [1/1] (short) %v8921_v4, 128  ;;  %8766 = vlog2.f32 %v8921_v4  ;;  %v6163_v6 = vsub.f32 1.0, %v8921_v4  ;;  %s59_s26 = scalar_lea.vmem [#allocation5], %s6206_s25  ;;  %7095 = vmatprep.mubr.msk.f32.mxu1 %vm8874_vm2, %v12372_v7  ;;  %vm3130_vm8 = vcmp.eq.s32.totalorder %v8902_v1, 3  ;;  %vm3885_vm9 = vcmp.eq.s32.totalorder %v8902_v1, 4  ;;  %s50_s0 = sadd.s32 1, %s8861_s0  }
  0x24   : > { %v60_v8 = vld [vmem:[%s59_s26] sm:$0xf]  ;;  %12414 = vst [vmem:[#allocation13_spill] sm:$0xff] %v9030_v44  ;;  %v9036_v45 = vrot.slane %v8921_v4, %v9030_v44  ;;  %v12421_v44 = vmov 5   ;;  %vm4640_vm10 = vcmp.eq.s32.totalorder %v8902_v1, 5  ;;  %vm5395_vm11 = vcmp.eq.s32.totalorder %v8902_v1, 6 }
  0x25   : > { %8768 = vlog2.f32 %v6163_v6  ;;  %vm61_vm0 = vcmp.eq.bf16.partialorder %v60_v8, 1065369472  ;;  %vm67_vm1 = vcmp.ne.bf16.partialorder %v60_v8, 1065369472  ;;  %v6159_v12 = vunpack.c.l.bf16 %v60_v8  ;;  %p47_p10 = scmp.ge.s32.totalorder %s50_s0, 2  }
  0x26   : > { %v8928_v9 = vsel %vm61_vm0, 65537, %v8869_v5  ;;  %v8930_v10 = vsel %vm67_vm1, 65537, %v8869_v5  ;;  %vm6150_vm12 = vcmp.eq.s32.totalorder %v8902_v1, 7  ;;  %s8880_s27 = smov (%p47_p10), [#allocation7]  }
  0x27   : > { %v6168_v17 = vsub.f32 1.0, %v6159_v12  ;;  %s6180_s28 = sshll.u32 (%p47_p10), %s8880_s27, 4  ;;  %s6181_s28 = int_to_ptr.vmem [resolvable:$true] %s6180_s28 }
  0x28   :  { %s8813_s29 = scalar_lea.vmem (%p47_p10), %s6181_s28, 256  ;;  %p8818_p12 = scmp.lt.s32.totalorder (%p47_p10), %s6181_s28, %s6181_s28 }
  0x29   :  { %p8814_p11 = scmp.ne.s32.totalorder (%p47_p10), %s6181_s28, %s8813_s29  ;;  %p8819_p13 = scmp.lt.s32.totalorder (%p47_p10), %s8813_s29, %s8813_s29 }
  0x2b   :  { %p8820_p0 = por (%p47_p10), %p8819_p13, %p8818_p12 }
  0x2d   :  { %p8821_p1 = pnand (%p47_p10), %p8820_p0, %p8814_p11 }
  0x30   : > { %v8767_v11 = vpop.eup %8766 }
  0x31   : > { %v6161_v13 = vmul.f32 0.6931472, %v8767_v11 }
  0x32   : > { %v8769_v14 = vpop.eup %8768 }
  0x33   : > { %v6162_v15 = vmax.f32 %v6161_v13, -100.0  ;;  %v6165_v16 = vmul.f32 0.6931472, %v8769_v14 }
  0x35   : > { %v6167_v18 = vmul.f32 %v6162_v15, %v6159_v12  ;;  %v6166_v19 = vmax.f32 %v6165_v16, -100.0 }
  0x37   : > { %v6169_v20 = vmul.f32 %v6168_v17, %v6166_v19 }
  0x39   : > { %v6170_v21 = vadd.f32 %v6169_v20, %v6167_v18 }
  0x3b   : > { %v8932_v2 = vsub.f32 %v8853_v2, %v6170_v21   ;;  %v12356_v21 = vmov 6  }
  0x3d   : > { %12413 = vst [vmem:[#allocation12_spill] sm:$0xff] %v8932_v2 }
  0x4c   : > { %8750 = vset.pattern.permute.xlu0 %v8869_v5 }
  0x9f   : > { %v8934_v23 = vpop.trf.xlu0 }
  0xa3   : > { %v8936_v24 = vpop.trf.xlu0 }
  0xa7   : > { %v8938_v25 = vpop.trf.xlu0 }
  0xab   : > { %v8940_v26 = vpop.trf.xlu0 }
  0xaf   : > { %v8942_v27 = vpop.trf.xlu0 }
  0xb3   : > { %v8944_v28 = vpop.trf.xlu0 }
  0xb7   : > { %v8946_v29 = vpop.trf.xlu0 }
  0xbb   : > { %v8948_v30 = vpop.trf.xlu0 }
  0xbf   : > { %v8950_v31 = vpop.trf.xlu0 }
  0xc3   : > { %v8952_v32 = vpop.trf.xlu0 }
  0xc7   : > { %v8954_v33 = vpop.trf.xlu0 }
  0xcb   : > { %v8956_v34 = vpop.trf.xlu0 }
  0xcf   : > { %v8958_v35 = vpop.trf.xlu0 }
  0xd3   : > { %v8960_v36 = vpop.trf.xlu0 }
  0xd7   : > { %v8962_v37 = vpop.trf.xlu0 }
  0xd8   : > { %181 = vperm.xlu1 %8751, %v8962_v37  }
  0xdb   : > { %v8965_v38 = vpop.trf.xlu0 }
  0xdc   : > { %176 = vperm.xlu1 %8751, %v8960_v36   ;;  %186 = vperm.xlu0 %8750, %v8965_v38  }
  0xe0   : > { %171 = vperm.xlu1 %8751, %v8958_v35   ;;  %8753 = vset.pattern.permute.xlu0 %v8871_v39 }
  0xe1   : > { %889 = vperm.xlu0 %8753, %v8940_v26  }
  0xe4   : > { %166 = vperm.xlu1 %8751, %v8956_v34  }
  0xe5   : > { %877 = vperm.xlu0 %8753, %v8934_v23  }
  0xe8   : > { %161 = vperm.xlu1 %8751, %v8954_v33  }
  0xe9   : > { %8754 = vset.pattern.permute.xlu0 %v8872_v40 }
  0xea   : > { %1690 = vperm.xlu0 %8754, %v8962_v37  }
  0xec   : > { %156 = vperm.xlu1 %8751, %v8952_v32  }
  0xee   : > { %1678 = vperm.xlu0 %8754, %v8956_v34  }
  0xf0   : > { %151 = vperm.xlu1 %8751, %v8950_v31  }
  0xf2   : > { %1670 = vperm.xlu0 %8754, %v8952_v32  }
  0xf4   : > { %146 = vperm.xlu1 %8751, %v8948_v30  }
  0xf6   : > { %1662 = vperm.xlu0 %8754, %v8948_v30  }
  0xf8   : > { %141 = vperm.xlu1 %8751, %v8946_v29  }
  0xfa   : > { %1654 = vperm.xlu0 %8754, %v8944_v28  }
  0xfc   : > { %136 = vperm.xlu1 %8751, %v8944_v28  }
  0xfe   : > { %1646 = vperm.xlu0 %8754, %v8940_v26  }
 0x100   : > { %131 = vperm.xlu1 %8751, %v8942_v27  }
 0x102   : > { %1638 = vperm.xlu0 %8754, %v8936_v24  }
 0x104   : > { %126 = vperm.xlu1 %8751, %v8940_v26  }
 0x106   : > { %8756 = vset.pattern.permute.xlu0 %v8873_v41 }
 0x107   : > { %2449 = vperm.xlu0 %8756, %v8965_v38  }
 0x108   : > { %121 = vperm.xlu1 %8751, %v8938_v25  }
 0x10b   : > { %2437 = vperm.xlu0 %8756, %v8958_v35  }
 0x10c   : > { %116 = vperm.xlu1 %8751, %v8936_v24  }
 0x10f   : > { %2429 = vperm.xlu0 %8756, %v8954_v33  }
 0x110   : > { %111 = vperm.xlu1 %8751, %v8934_v23  }
 0x113   : > { %2421 = vperm.xlu0 %8756, %v8950_v31  }
 0x114   : > { %8752 = vset.pattern.permute.xlu1 %v8871_v39 }
 0x115   : > { %933 = vperm.xlu1 %8752, %v8962_v37  }
 0x117   : > { %2413 = vperm.xlu0 %8756, %v8946_v29  }
 0x119   : > { %929 = vperm.xlu1 %8752, %v8960_v36  }
 0x11b   : > { %2405 = vperm.xlu0 %8756, %v8942_v27  }
 0x11d   : > { %925 = vperm.xlu1 %8752, %v8958_v35  }
 0x11f   : > { %2397 = vperm.xlu0 %8756, %v8938_v25  }
 0x121   : > { %921 = vperm.xlu1 %8752, %v8956_v34  }
 0x123   : > { %2389 = vperm.xlu0 %8756, %v8934_v23  }
 0x125   : > { %917 = vperm.xlu1 %8752, %v8954_v33  }
 0x127   : > { %8759 = vset.pattern.permute.xlu0 %v12371_v42 }
 0x128   : > { %3200 = vperm.xlu0 %8759, %v8962_v37  }
 0x129   : > { %913 = vperm.xlu1 %8752, %v8952_v32  }
 0x12c   : > { %3188 = vperm.xlu0 %8759, %v8956_v34  }
 0x12d   : > { %937 = vperm.xlu1 %8752, %v8965_v38  }
 0x130   : > { %3180 = vperm.xlu0 %8759, %v8952_v32  }
 0x131   : > { %909 = vperm.xlu1 %8752, %v8950_v31  }
 0x134   : > { %3172 = vperm.xlu0 %8759, %v8948_v30  }
 0x135   : > { %905 = vperm.xlu1 %8752, %v8948_v30  }
 0x138   : > { %3164 = vperm.xlu0 %8759, %v8944_v28  }
 0x139   : > { %901 = vperm.xlu1 %8752, %v8946_v29  }
 0x13c   : > { %3156 = vperm.xlu0 %8759, %v8940_v26  }
 0x13d   : > { %897 = vperm.xlu1 %8752, %v8944_v28  }
 0x140   : > { %3148 = vperm.xlu0 %8759, %v8936_v24  }
 0x141   : > { %893 = vperm.xlu1 %8752, %v8942_v27  }
 0x144   : > { %8760 = vset.pattern.permute.xlu0 %v12367_v43 }
 0x145   : > { %885 = vperm.xlu1 %8752, %v8938_v25   ;;  %3959 = vperm.xlu0 %8760, %v8965_v38  }
 0x149   : > { %881 = vperm.xlu1 %8752, %v8936_v24   ;;  %3947 = vperm.xlu0 %8760, %v8958_v35  }
 0x14d   : > { %8755 = vset.pattern.permute.xlu1 %v8872_v40  ;;  %3939 = vperm.xlu0 %8760, %v8954_v33  }
 0x14e   : > { %1694 = vperm.xlu1 %8755, %v8965_v38  }
 0x151   : > { %3931 = vperm.xlu0 %8760, %v8950_v31  }
 0x152   : > { %1686 = vperm.xlu1 %8755, %v8960_v36  }
 0x153   : > { %v182_v46 = vpop.permute.xlu1 %181 }
 0x154   : > { %v203_v47 = vsub.f32 %v9036_v45, %v182_v46 }
 0x155   : > { %3923 = vperm.xlu0 %8760, %v8946_v29  }
 0x156   : > { %v219_v48 = vmax.f32 %v203_v47, 0.0  ;;  %1682 = vperm.xlu1 %8755, %v8958_v35  }
 0x157   : > { %v177_v49 = vpop.permute.xlu1 %176  ;;  %v187_v50 = vpop.permute.xlu0 %186 }
 0x158   : > { %v9043_v51 = vand.u32 4294901760, %v219_v48  ;;  %v202_v52 = vsub.f32 %v9036_v45, %v177_v49  ;;  %v204_v53 = vsub.f32 %v9036_v45, %v187_v50 }
 0x159   : > { %3915 = vperm.xlu0 %8760, %v8942_v27  }
 0x15a   : > { %v218_v54 = vmax.f32 %v202_v52, 0.0  ;;  %v220_v55 = vmax.f32 %v204_v53, 0.0  ;;  %1674 = vperm.xlu1 %8755, %v8954_v33   ;;  %v9050_v56 = vsub.f32 %v219_v48, %v9043_v51 }
 0x15b   : > { %v172_v57 = vpop.permute.xlu1 %171 }
 0x15c   : > { %v9052_v58 = vand.u32 4294901760, %v218_v54  ;;  %v9054_v59 = vand.u32 4294901760, %v220_v55  ;;  %v201_v60 = vsub.f32 %v9036_v45, %v172_v57  ;;  %v12368_v2 = vand.u32 4294901760, %v9050_v56 }
 0x15d   : > { %3907 = vperm.xlu0 %8760, %v8938_v25  }
 0x15e   : > { %v9059_v61 = vsub.f32 %v218_v54, %v9052_v58  ;;  %v9062_v62 = vsub.f32 %v220_v55, %v9054_v59  ;;  %v217_v63 = vmax.f32 %v201_v60, 0.0  ;;  %1666 = vperm.xlu1 %8755, %v8950_v31   ;;  %7029 = vmatpush3.msra.mxu0 %v9054_v59  ;;  %v323_v16 = vsub.f32 %v9050_v56, %v12368_v2 }
 0x15f   : > { %v167_v0 = vpop.permute.xlu1 %166  ;;  %7030 = vmatprep.subr.mxu0 %v12372_v7 }
 0x160   : > { %v9068_v5 = vand.u32 4294901760, %v217_v63  ;;  %v200_v6 = vsub.f32 %v9036_v45, %v167_v0  ;;  %7031 = vmatpush3.msra.mxu0 %v9043_v51  ;;  %v12369_v8 = vand.u32 4294901760, %v9062_v62  ;;  %v12364_v14 = vand.u32 4294901760, %v9059_v61 }
 0x161   : > { %3899 = vperm.xlu0 %8760, %v8934_v23   ;;  %7032 = vmatprep.subr.mxu0 %v12372_v7  ;;  %v324_v48 = vand.u32 4294901760, %v323_v16 }
 0x162   : > { %v9076_v11 = vsub.f32 %v217_v63, %v9068_v5  ;;  %v216_v12 = vmax.f32 %v200_v6, 0.0  ;;  %1658 = vperm.xlu1 %8755, %v8946_v29   ;;  %7033 = vmatpush3.msra.mxu0 %v9052_v58  ;;  %v316_v13 = vsub.f32 %v9062_v62, %v12369_v8  ;;  %v330_v46 = vsub.f32 %v9059_v61, %v12364_v14 }
 0x163   : > { %v162_v15 = vpop.permute.xlu1 %161  ;;  %7034 = vmatprep.subr.mxu0 %v12372_v7 }
 0x164   : > { %v9088_v17 = vand.u32 4294901760, %v216_v12  ;;  %v199_v18 = vsub.f32 %v9036_v45, %v162_v15  ;;  %7035 = vmatpush3.msra.mxu0 %v9068_v5  ;;  %v317_v19 = vand.u32 4294901760, %v316_v13  ;;  %v12363_v20 = vand.u32 4294901760, %v9076_v11 }
 0x165   : > { %8763 = vset.pattern.permute.xlu0 %v12356_v21  ;;  %7036 = vmatprep.subr.mxu0 %v12372_v7  ;;  %v331_v57 = vand.u32 4294901760, %v330_v46 }
 0x166   : > { %v9096_v39 = vsub.f32 %v216_v12, %v9088_v17  ;;  %v215_v40 = vmax.f32 %v199_v18, 0.0  ;;  %1650 = vperm.xlu1 %8755, %v8942_v27   ;;  %4710 = vperm.xlu0 %8763, %v8962_v37   ;;  %v337_v52 = vsub.f32 %v9076_v11, %v12363_v20 }
 0x167   : > { %7037 = vmatpush3.msra.mxu0 %v9088_v17  ;;  %7064 = vmatpush3.msra.mxu1 %v317_v19  ;;  %v157_v47 = vpop.permute.xlu1 %156 }
 0x168   : > { %v9104_v49 = vand.u32 4294901760, %v215_v40  ;;  %v198_v50 = vsub.f32 %v9036_v45, %v157_v47  ;;  %7065 = vmatprep.subr.mxu1 %v12372_v7  ;;  %7038 = vmatprep.subr.mxu0 %v12372_v7  ;;  %v12362_v53 = vand.u32 4294901760, %v9096_v39  ;;  %v338_v12 = vand.u32 4294901760, %v337_v52 }
 0x169   : > { %7066 = vmatpush3.msra.mxu1 %v324_v48 }
 0x16a   : > { %v9114_v54 = vsub.f32 %v215_v40, %v9104_v49  ;;  %v214_v55 = vmax.f32 %v198_v50, 0.0  ;;  %7067 = vmatprep.subr.mxu1 %v12372_v7  ;;  %1642 = vperm.xlu1 %8755, %v8938_v25   ;;  %v344_v63 = vsub.f32 %v9096_v39, %v12362_v53  ;;  %v12365_v53 = vmov 7  }
 0x16b   : > { %4698 = vperm.xlu0 %8763, %v8956_v34   ;;  %7039 = vmatpush3.msra.mxu0 %v9104_v49  ;;  %v152_v60 = vpop.permute.xlu1 %151 }
 0x16c   : > { %v9123_v0 = vand.u32 4294901760, %v214_v55  ;;  %7068 = vmatpush3.msra.mxu1 %v331_v57  ;;  %v197_v6 = vsub.f32 %v9036_v45, %v152_v60  ;;  %7040 = vmatprep.subr.mxu0 %v12372_v7  ;;  %v345_v13 = vand.u32 4294901760, %v344_v63  ;;  %v12361_v15 = vand.u32 4294901760, %v9114_v54 }
 0x16d   : > { %7069 = vmatprep.subr.mxu1 %v12372_v7 }
 0x16e   : > { %v9130_v16 = vsub.f32 %v214_v55, %v9123_v0  ;;  %v213_v18 = vmax.f32 %v197_v6, 0.0  ;;  %7070 = vmatpush3.msra.mxu1 %v338_v12  ;;  %1634 = vperm.xlu1 %8755, %v8934_v23   ;;  %v351_v40 = vsub.f32 %v9114_v54, %v12361_v15 }
 0x16f   : > { %7071 = vmatprep.subr.mxu1 %v12372_v7  ;;  %4690 = vperm.xlu0 %8763, %v8952_v32   ;;  %v147_v19 = vpop.permute.xlu1 %146 }
 0x170   : > { %v9138_v46 = vand.u32 4294901760, %v213_v18  ;;  %7041 = vmatpush3.msra.mxu0 %v9123_v0  ;;  %7072 = vmatpush3.msra.mxu1 %v345_v13  ;;  %v196_v47 = vsub.f32 %v9036_v45, %v147_v19  ;;  %v352_v48 = vand.u32 4294901760, %v351_v40  ;;  %v12359_v50 = vand.u32 4294901760, %v9130_v16 }
 0x171   : > { %7042 = vmatprep.subr.mxu0 %v12372_v7  ;;  %7073 = vmatprep.subr.mxu1 %v12372_v7 }
 0x172   : > { %v9146_v52 = vsub.f32 %v213_v18, %v9138_v46  ;;  %v212_v55 = vmax.f32 %v196_v47, 0.0  ;;  %8757 = vset.pattern.permute.xlu1 %v8873_v41  ;;  %7043 = vmatpush3.msra.mxu0 %v9138_v46  ;;  %v358_v60 = vsub.f32 %v9130_v16, %v12359_v50 }
 0x173   : > { %4682 = vperm.xlu0 %8763, %v8948_v30   ;;  %7074 = vmatpush3.msra.mxu1 %v352_v48  ;;  %v142_v57 = vpop.permute.xlu1 %141 }
 0x174   : > { %v9154_v63 = vand.u32 4294901760, %v212_v55  ;;  %v195_v6 = vsub.f32 %v9036_v45, %v142_v57  ;;  %2445 = vperm.xlu1 %8757, %v8962_v37   ;;  %7044 = vmatprep.subr.mxu0 %v12372_v7  ;;  %v359_v41 = vand.u32 4294901760, %v358_v60  ;;  %v12357_v12 = vand.u32 4294901760, %v9146_v52 }
 0x175   : > { %7075 = vmatprep.subr.mxu1 %v12372_v7 }
 0x176   : > { %v9162_v13 = vsub.f32 %v212_v55, %v9154_v63  ;;  %v211_v18 = vmax.f32 %v195_v6, 0.0  ;;  %7045 = vmatpush3.msra.mxu0 %v9154_v63  ;;  %7076 = vmatpush3.msra.mxu1 %v359_v41  ;;  %v365_v40 = vsub.f32 %v9146_v52, %v12357_v12  ;;  %v63_v55 = vunpack.c.l.b16 %v8928_v9 }
 0x177   : > { %4674 = vperm.xlu0 %8763, %v8944_v28   ;;  %v137_v19 = vpop.permute.xlu1 %136  ;;  %7046 = vmatprep.subr.mxu0 %v12372_v7 }
 0x178   : > { %v9169_v47 = vand.u32 4294901760, %v211_v18  ;;  %v194_v48 = vsub.f32 %v9036_v45, %v137_v19  ;;  %2441 = vperm.xlu1 %8757, %v8960_v36   ;;  %7077 = vmatprep.subr.mxu1 %v12372_v7  ;;  %v366_v57 = vand.u32 4294901760, %v365_v40  ;;  %v12358_v60 = vand.u32 4294901760, %v9162_v13 }
 0x179   : > { %vm9190_vm3 = vcmp.ne.s32.totalorder %v63_v55, 0 }
 0x17a   : > { %v9178_v6 = vsub.f32 %v211_v18, %v9169_v47  ;;  %v210_v41 = vmax.f32 %v194_v48, 0.0  ;;  %7047 = vmatpush3.msra.mxu0 %v9169_v47  ;;  %7078 = vmatpush3.msra.mxu1 %v366_v57  ;;  %v372_v21 = vsub.f32 %v9162_v13, %v12358_v60 }
 0x17b   : > { %4666 = vperm.xlu0 %8763, %v8940_v26   ;;  %v132_v19 = vpop.permute.xlu1 %131  ;;  %7048 = vmatprep.subr.mxu0 %v12372_v7 }
 0x17c   : > { %v9185_v9 = vand.u32 4294901760, %v210_v41  ;;  %v193_v40 = vsub.f32 %v9036_v45, %v132_v19  ;;  %2433 = vperm.xlu1 %8757, %v8956_v34   ;;  %7079 = vmatprep.subr.mxu1 %v12372_v7  ;;  %v373_v48 = vand.u32 4294901760, %v372_v21  ;;  %v12360_v57 = vand.u32 4294901760, %v9178_v6 }
 0x17d   : > { %v9207_v21 = vsel %vm9190_vm3, 1.0, %v12372_v7 }
 0x17e   : > { %v9197_v12 = vsub.f32 %v210_v41, %v9185_v9  ;;  %v209_v60 = vmax.f32 %v193_v40, 0.0  ;;  %7049 = vmatpush3.msra.mxu0 %v9185_v9  ;;  %7080 = vmatpush3.msra.mxu1 %v373_v48  ;;  %v379_v55 = vsub.f32 %v9178_v6, %v12360_v57 }
 0x17f   : > { %4658 = vperm.xlu0 %8763, %v8936_v24   ;;  %v127_v19 = vpop.permute.xlu1 %126  ;;  %7050 = vmatprep.subr.mxu0 %v12372_v7 }
 0x180   : > { %v9209_v50 = vand.u32 4294901760, %v209_v60  ;;  %v192_v41 = vsub.f32 %v9036_v45, %v127_v19  ;;  %2425 = vperm.xlu1 %8757, %v8952_v32   ;;  %7081 = vmatprep.subr.mxu1 %v12372_v7  ;;  %v380_v40 = vand.u32 4294901760, %v379_v55  ;;  %v12366_v48 = vand.u32 4294901760, %v9197_v12 }
 0x181   : > { %v9226_v55 = vsub.f32 %v9207_v21, %v9207_v21 }
 0x182   : > { %v9217_v57 = vsub.f32 %v209_v60, %v9209_v50  ;;  %v208_v15 = vmax.f32 %v192_v41, 0.0  ;;  %7051 = vmatpush3.msra.mxu0 %v9209_v50  ;;  %7082 = vmatpush3.msra.mxu1 %v380_v40  ;;  %v386_v20 = vsub.f32 %v9197_v12, %v12366_v48 }
 0x183   : > { %8764 = vset.pattern.permute.xlu0 %v12365_v53  ;;  %v122_v19 = vpop.permute.xlu1 %121  ;;  %7052 = vmatprep.subr.mxu0 %v12372_v7  ;;  %v12375_v2 = vand.u32 4294901760, %v9226_v55 }
 0x184   : > { %v9228_v14 = vand.u32 4294901760, %v208_v15  ;;  %v191_v60 = vsub.f32 %v9036_v45, %v122_v19  ;;  %2417 = vperm.xlu1 %8757, %v8948_v30   ;;  %5469 = vperm.xlu0 %8764, %v8965_v38   ;;  %v12370_v41 = vand.u32 4294901760, %v9217_v57  ;;  %v387_v40 = vand.u32 4294901760, %v386_v20 }
 0x185   : > { %7083 = vmatprep.subr.mxu1 %v12372_v7 }
 0x186   : > { %v9237_v53 = vsub.f32 %v208_v15, %v9228_v14  ;;  %v207_v48 = vmax.f32 %v191_v60, 0.0  ;;  %7053 = vmatpush3.msra.mxu0 %v9228_v14  ;;  %v393_v19 = vsub.f32 %v9217_v57, %v12370_v41  ;;  %7084 = vmatpush3.msra.mxu1 %v387_v40 }
 0x187   : > { %v117_v43 = vpop.permute.xlu1 %116  ;;  %7054 = vmatprep.subr.mxu0 %v12372_v7  ;;  %7085 = vmatprep.subr.mxu1 %v12372_v7 }
 0x188   : > { %v9245_v8 = vand.u32 4294901760, %v207_v48  ;;  %v190_v20 = vsub.f32 %v9036_v45, %v117_v43  ;;  %2409 = vperm.xlu1 %8757, %v8944_v28   ;;  %5457 = vperm.xlu0 %8764, %v8958_v35   ;;  %v394_v15 = vand.u32 4294901760, %v393_v19  ;;  %v12374_v60 = vand.u32 4294901760, %v9237_v53 }
 0x189   : > { %v305_v19 = vsub.f32 %v9226_v55, %v12375_v2  ;;  %v12417_v2 = vmov 0.0  }
 0x18a   : > { %v9253_v40 = vsub.f32 %v207_v48, %v9245_v8  ;;  %v206_v41 = vmax.f32 %v190_v20, 0.0  ;;  %7055 = vmatpush3.msra.mxu0 %v9245_v8  ;;  %7086 = vmatpush3.msra.mxu1 %v394_v15  ;;  %v400_v43 = vsub.f32 %v9237_v53, %v12374_v60 }
 0x18b   : > { %v112_v42 = vpop.permute.xlu1 %111  ;;  %7056 = vmatprep.subr.mxu0 %v12372_v7  ;;  %7087 = vmatprep.subr.mxu1 %v12372_v7 }
 0x18c   : > { %v9264_v22 = vand.u32 4294901760, %v206_v41  ;;  %v189_v48 = vsub.f32 %v9036_v45, %v112_v42  ;;  %2401 = vperm.xlu1 %8757, %v8940_v26   ;;  %5449 = vperm.xlu0 %8764, %v8954_v33   ;;  %v12376_v20 = vand.u32 4294901760, %v9253_v40  ;;  %v401_v15 = vand.u32 4294901760, %v400_v43 }
 0x18d   : > { %v306_v42 = vand.u32 4294901760, %v305_v19 }
 0x18e   : > { %v9271_v7 = vsub.f32 %v206_v41, %v9264_v22  ;;  %v205_v3 = vmax.f32 %v189_v48, 0.0  ;;  %7057 = vmatpush3.msra.mxu0 %v9264_v22  ;;  %v407_v60 = vsub.f32 %v9253_v40, %v12376_v20  ;;  %7088 = vmatpush3.msra.mxu1 %v401_v15  ;;  %v12418_v15 = vmov 4  }
 0x18f   : > { %7058 = vmatprep.subr.mxu0 %v12417_v2  ;;  %7089 = vmatprep.subr.mxu1 %v12417_v2 }
 0x190   : > { %v9278_v45 = vand.u32 4294901760, %v205_v3  ;;  %2393 = vperm.xlu1 %8757, %v8936_v24   ;;  %5441 = vperm.xlu0 %8764, %v8950_v31   ;;  %v408_v43 = vand.u32 4294901760, %v407_v60  ;;  %v12380_v41 = vand.u32 4294901760, %v9271_v7 }
 0x192   : > { %v9285_v48 = vsub.f32 %v205_v3, %v9278_v45  ;;  %7059 = vmatpush3.msra.mxu0 %v9278_v45  ;;  %7090 = vmatpush3.msra.mxu1 %v408_v43  ;;  %v414_v19 = vsub.f32 %v9271_v7, %v12380_v41  ;;  %v12377_v43 = vmov 1.0  }
 0x193   : > { %7098 = vmatprep.subr.mxu0 %v12417_v2  ;;  %7061 = vmatmul.mubr.f32.vlgmr.msra.gmra.mxu0 %v306_v42 }
 0x194   : > { %8758 = vset.pattern.permute.xlu1 %v12418_v15  ;;  %5433 = vperm.xlu0 %8764, %v8946_v29   ;;  %v415_v60 = vand.u32 4294901760, %v414_v19  ;;  %v12379_v20 = vand.u32 4294901760, %v9285_v48  ;;  %v9322_v19 = vpop.permute.xlu1 %933 }
 0x195   : > { %3204 = vperm.xlu1 %8758, %v8965_v38   ;;  %7099 = vmatpush3.msra.mxu0 %v9062_v62 }
 0x196   : > { %7091 = vmatprep.subr.mxu1 %v12417_v2  ;;  %7100 = vmatprep.subr.mxu0 %v12417_v2  ;;  %v421_v3 = vsub.f32 %v9285_v48, %v12379_v20  ;;  %v12420_v20 = vand.u32 4294901760, %v9050_v56 }
 0x197   : > { %7092 = vmatpush3.msra.mxu1 %v415_v60  ;;  %7101 = vmatpush3.msra.mxu0 %v9050_v56  ;;  %v12423_v56 = vand.u32 4294901760, %v9076_v11 }
 0x198   : > { %5425 = vperm.xlu0 %8764, %v8942_v27   ;;  %7102 = vmatprep.subr.mxu0 %v12417_v2  ;;  %v422_v42 = vand.u32 4294901760, %v421_v3  ;;  %v9336_v15 = vpop.permute.xlu1 %929 }
 0x199   : > { %3196 = vperm.xlu1 %8758, %v8960_v36   ;;  %7103 = vmatpush3.msra.mxu0 %v9059_v61 }
 0x19a   : > { %7093 = vmatprep.subr.mxu1 %v12417_v2  ;;  %7104 = vmatprep.subr.mxu0 %v12417_v2 }
 0x19b   : > { %7094 = vmatpush3.msra.mxu1 %v422_v42  ;;  %7105 = vmatpush3.msra.mxu0 %v9076_v11  ;;  %v12426_v11 = vand.u32 4294901760, %v9114_v54 }
 0x19c   : > { %5417 = vperm.xlu0 %8764, %v8938_v25   ;;  %7096 = vmatmul.mubr.msk.f32.vlgmr.msra.gmra.mxu1 %vm9190_vm3, %v12377_v43  ;;  %v9350_v60 = vpop.permute.xlu1 %925  ;;  %v12419_v43 = vand.u32 4294901760, %v9062_v62  ;;  %v12422_v62 = vand.u32 4294901760, %v9059_v61 }
 0x19d   : > { %7106 = vmatprep.subr.mxu0 %v12417_v2  ;;  %7133 = vmatprep.subr.mxu1 %v12417_v2 }
 0x19e   : > { %3192 = vperm.xlu1 %8758, %v8958_v35   ;;  %7107 = vmatpush3.msra.mxu0 %v9096_v39 }
 0x19f   : > { %7134 = vmatpush3.msra.mxu1 %v9054_v59  ;;  %7108 = vmatprep.subr.mxu0 %v12417_v2 }
 0x1a0   : > { %7135 = vmatprep.subr.mxu1 %v12417_v2  ;;  %7109 = vmatpush3.msra.mxu0 %v9114_v54  ;;  %v9364_v3 = vpop.permute.xlu1 %921  ;;  %v874_v54 = vsub.s32 1, %v8902_v1 }
 0x1a1   : > { %7136 = vmatpush3.msra.mxu1 %v9043_v51  ;;  %5409 = vperm.xlu0 %8764, %v8934_v23  }
 0x1a2   : > { %7110 = vmatprep.subr.mxu0 %v12417_v2  ;;  %7137 = vmatprep.subr.mxu1 %v12417_v2 }
 0x1a3   : > { %3184 = vperm.xlu1 %8758, %v8954_v33   ;;  %7111 = vmatpush3.msra.mxu0 %v9130_v16 }
 0x1a4   : > { %7138 = vmatpush3.msra.mxu1 %v9052_v58  ;;  %7112 = vmatprep.subr.mxu0 %v12417_v2  ;;  %v9379_v42 = vpop.permute.xlu1 %917 }
 0x1a5   : > { %7139 = vmatprep.subr.mxu1 %v12417_v2  ;;  %7113 = vmatpush3.msra.mxu0 %v9146_v52 }
 0x1a6   : > { %7140 = vmatpush3.msra.mxu1 %v9068_v5  ;;  %7114 = vmatprep.subr.mxu0 %v12417_v2 }
 0x1a7   : > { %7141 = vmatprep.subr.mxu1 %v12417_v2  ;;  %3176 = vperm.xlu1 %8758, %v8950_v31  }
 0x1a8   : > { %7115 = vmatpush3.msra.mxu0 %v9162_v13  ;;  %7142 = vmatpush3.msra.mxu1 %v9088_v17  ;;  %v9395_v41 = vpop.permute.xlu1 %913 }
 0x1a9   : > { %7116 = vmatprep.subr.mxu0 %v12417_v2  ;;  %7143 = vmatprep.subr.mxu1 %v12417_v2 }
 0x1aa   : > { %7117 = vmatpush3.msra.mxu0 %v9178_v6  ;;  %7144 = vmatpush3.msra.mxu1 %v9104_v49 }
 0x1ab   : > { %7118 = vmatprep.subr.mxu0 %v12417_v2  ;;  %7145 = vmatprep.subr.mxu1 %v12417_v2 }
 0x1ac   : > { %3168 = vperm.xlu1 %8758, %v8946_v29   ;;  %7119 = vmatpush3.msra.mxu0 %v9197_v12  ;;  %v938_v61 = vpop.permute.xlu1 %937 }
 0x1ad   : > { %7146 = vmatpush3.msra.mxu1 %v9123_v0  ;;  %7120 = vmatprep.subr.mxu0 %v12417_v2 }
 0x1ae   : > { %7147 = vmatprep.subr.mxu1 %v12417_v2  ;;  %7121 = vmatpush3.msra.mxu0 %v9217_v57 }
 0x1af   : > { %7148 = vmatpush3.msra.mxu1 %v9138_v46  ;;  %7122 = vmatprep.subr.mxu0 %v12417_v2 }
 0x1b0   : > { %7149 = vmatprep.subr.mxu1 %v12417_v2  ;;  %3160 = vperm.xlu1 %8758, %v8942_v27  }
 0x1b1   : > { %7123 = vmatpush3.msra.mxu0 %v9237_v53  ;;  %7150 = vmatpush3.msra.mxu1 %v9154_v63 }
 0x1b2   : > { %7124 = vmatprep.subr.mxu0 %v12417_v2  ;;  %7151 = vmatprep.subr.mxu1 %v12417_v2 }
 0x1b3   : > { %7125 = vmatpush3.msra.mxu0 %v9253_v40  ;;  %7152 = vmatpush3.msra.mxu1 %v9169_v47 }
 0x1b4   : > { %7126 = vmatprep.subr.mxu0 %v12417_v2  ;;  %7153 = vmatprep.subr.mxu1 %v12417_v2 }
 0x1b5   : > { %3152 = vperm.xlu1 %8758, %v8938_v25   ;;  %7127 = vmatpush3.msra.mxu0 %v9271_v7 }
 0x1b6   : > { %7154 = vmatpush3.msra.mxu1 %v9185_v9  ;;  %7128 = vmatprep.subr.mxu0 %v12417_v2 }
 0x1b7   : > { %7155 = vmatprep.subr.mxu1 %v12417_v2  ;;  %7129 = vmatpush3.msra.mxu0 %v9285_v48 }
 0x1b8   : > { %7130 = vmatprep.mubr.msk.f32.mxu0 %vm8874_vm2, %v12417_v2  ;;  %7156 = vmatpush3.msra.mxu1 %v9209_v50 }
 0x1b9   : > { %7131 = vmatmul.mubr.f32.vlgmr.msra.gmra.mxu0 %v9226_v55  ;;  %7157 = vmatprep.subr.mxu1 %v12417_v2 }
 0x1ba   : > { %7168 = vmatprep.subr.mxu0 %v12417_v2  ;;  %3144 = vperm.xlu1 %8758, %v8934_v23  }
 0x1bb   : > { %7158 = vmatpush3.msra.mxu1 %v9228_v14  ;;  %7169 = vmatpush3.msra.mxu0 %v12419_v43 }
 0x1bc   : > { %7159 = vmatprep.subr.mxu1 %v12417_v2  ;;  %7170 = vmatprep.subr.mxu0 %v12417_v2 }
 0x1bd   : > { %7160 = vmatpush3.msra.mxu1 %v9245_v8  ;;  %7171 = vmatpush3.msra.mxu0 %v12420_v20  ;;  %v12425_v20 = vand.u32 4294901760, %v9096_v39  ;;  %v12427_v39 = vand.u32 4294901760, %v9130_v16  ;;  %v9444_v16 = vrot.slane %v8921_v4, %v874_v54 }
 0x1be   : > { %7161 = vmatprep.subr.mxu1 %v12417_v2  ;;  %7172 = vmatprep.subr.mxu0 %v12417_v2 }
 0x1bf   : > { %8761 = vset.pattern.permute.xlu1 %v12421_v44  ;;  %7162 = vmatpush3.msra.mxu1 %v9264_v22  ;;  %v12424_v44 = vand.u32 4294901760, %v9226_v55  ;;  %v954_v4 = vsub.f32 %v9444_v16, %v9322_v19  ;;  %v12433_v55 = vand.u32 4294901760, %v9237_v53  ;;  %v951_v53 = vsub.f32 %v9444_v16, %v9364_v3 }
 0x1c0   : > { %7173 = vmatpush3.msra.mxu0 %v12422_v62  ;;  %3955 = vperm.xlu1 %8761, %v8962_v37  }
 0x1c1   : > { %7163 = vmatprep.subr.mxu1 %v12417_v2  ;;  %7174 = vmatprep.subr.mxu0 %v12417_v2  ;;  %v970_v43 = vmax.f32 %v954_v4, 0.0 }
 0x1c2   : > { %7164 = vmatpush3.msra.mxu1 %v9278_v45  ;;  %7165 = vmatprep.mubr.msk.f32.mxu1 %vm8874_vm2, %v12417_v2 }
 0x1c3   : > { %7175 = vmatpush3.msra.mxu0 %v12423_v56  ;;  %7166 = vmatmul.mubr.f32.vlgmr.msra.gmra.mxu1 %v12424_v44  ;;  %v12436_v56 = vand.u32 4294901760, %v9285_v48  ;;  %v12437_v44 = vmov 1.0  }
 0x1c4   : > { %7176 = vmatprep.subr.mxu0 %v12417_v2  ;;  %7203 = vmatprep.subr.mxu1 %v12417_v2 }
 0x1c5   : > { %7177 = vmatpush3.msra.mxu0 %v12425_v20  ;;  %7204 = vmatpush3.msra.mxu1 %v9054_v59  ;;  %v9428_v59 = vpop.permute.xlu1 %909 }
 0x1c6   : > { %3951 = vperm.xlu1 %8761, %v8960_v36   ;;  %7178 = vmatprep.subr.mxu0 %v12417_v2 }
 0x1c7   : > { %7205 = vmatprep.subr.mxu1 %v12417_v2  ;;  %7179 = vmatpush3.msra.mxu0 %v12426_v11  ;;  %v948_v11 = vsub.f32 %v9444_v16, %v9428_v59 }
 0x1c8   : > { %7206 = vmatpush3.msra.mxu1 %v9043_v51  ;;  %7180 = vmatprep.subr.mxu0 %v12417_v2  ;;  %v12428_v51 = vand.u32 4294901760, %v9146_v52 }
 0x1c9   : > { %7207 = vmatprep.subr.mxu1 %v12417_v2  ;;  %7181 = vmatpush3.msra.mxu0 %v12427_v39  ;;  %v9449_v52 = vpop.permute.xlu1 %905 }
 0x1ca   : > { %7208 = vmatpush3.msra.mxu1 %v9052_v58  ;;  %3943 = vperm.xlu1 %8761, %v8956_v34   ;;  %v12429_v58 = vand.u32 4294901760, %v9162_v13  ;;  %v12431_v13 = vand.u32 4294901760, %v9197_v12  ;;  %v953_v12 = vsub.f32 %v9444_v16, %v9336_v15 }
 0x1cb   : > { %7182 = vmatprep.subr.mxu0 %v12417_v2  ;;  %7209 = vmatprep.subr.mxu1 %v12417_v2 }
 0x1cc   : > { %7183 = vmatpush3.msra.mxu0 %v12428_v51  ;;  %7210 = vmatpush3.msra.mxu1 %v9068_v5  ;;  %v12430_v5 = vand.u32 4294901760, %v9178_v6  ;;  %v969_v19 = vmax.f32 %v953_v12, 0.0 }
 0x1cd   : > { %7184 = vmatprep.subr.mxu0 %v12417_v2  ;;  %7211 = vmatprep.subr.mxu1 %v12417_v2 }
 0x1ce   : > { %7185 = vmatpush3.msra.mxu0 %v12429_v58  ;;  %7212 = vmatpush3.msra.mxu1 %v9088_v17  ;;  %v955_v17 = vsub.f32 %v9444_v16, %v938_v61  ;;  %v9501_v3 = vand.u32 4294901760, %v969_v19  ;;  %v947_v58 = vsub.f32 %v9444_v16, %v9449_v52  ;;  %v12438_v52 = vmov 6  }
 0x1cf   : > { %3935 = vperm.xlu1 %8761, %v8952_v32   ;;  %7186 = vmatprep.subr.mxu0 %v12417_v2 }
 0x1d0   : > { %7213 = vmatprep.subr.mxu1 %v12417_v2  ;;  %7187 = vmatpush3.msra.mxu0 %v12430_v5  ;;  %v971_v6 = vmax.f32 %v955_v17, 0.0  ;;  %v964_v17 = vmax.f32 %v948_v11, 0.0 }
 0x1d1   : > { %7214 = vmatpush3.msra.mxu1 %v9104_v49  ;;  %7188 = vmatprep.subr.mxu0 %v12417_v2  ;;  %v12432_v49 = vand.u32 4294901760, %v9217_v57  ;;  %v12434_v57 = vand.u32 4294901760, %v9253_v40 }
 0x1d2   : > { %7215 = vmatprep.subr.mxu1 %v12417_v2  ;;  %7189 = vmatpush3.msra.mxu0 %v12431_v13  ;;  %v9482_v15 = vand.u32 4294901760, %v971_v6 }
 0x1d3   : > { %7216 = vmatpush3.msra.mxu1 %v9123_v0  ;;  %3927 = vperm.xlu1 %8761, %v8948_v30   ;;  %v9470_v0 = vpop.permute.xlu1 %901 }
 0x1d4   : > { %7190 = vmatprep.subr.mxu0 %v12417_v2  ;;  %7217 = vmatprep.subr.mxu1 %v12417_v2  ;;  %v946_v13 = vsub.f32 %v9444_v16, %v9470_v0 }
 0x1d5   : > { %7191 = vmatpush3.msra.mxu0 %v12432_v49  ;;  %7218 = vmatpush3.msra.mxu1 %v9138_v46  ;;  %v952_v46 = vsub.f32 %v9444_v16, %v9350_v60  ;;  %v9491_v60 = vand.u32 4294901760, %v970_v43 }
 0x1d6   : > { %7192 = vmatprep.subr.mxu0 %v12417_v2  ;;  %7219 = vmatprep.subr.mxu1 %v12417_v2 }
 0x1d7   : > { %7193 = vmatpush3.msra.mxu0 %v12433_v55  ;;  %7220 = vmatpush3.msra.mxu1 %v9154_v63  ;;  %v12435_v63 = vand.u32 4294901760, %v9271_v7  ;;  %v968_v40 = vmax.f32 %v952_v46, 0.0  ;;  %v9497_v62 = vpop.permute.xlu1 %897  ;;  %v9504_v7 = vsub.f32 %v971_v6, %v9482_v15  ;;  %v9517_v61 = vsub.f32 %v970_v43, %v9491_v60 }
 0x1d8   : > { %3919 = vperm.xlu1 %8761, %v8944_v28   ;;  %7194 = vmatprep.subr.mxu0 %v12417_v2  ;;  %v945_v6 = vsub.f32 %v9444_v16, %v9497_v62 }
 0x1d9   : > { %7221 = vmatprep.subr.mxu1 %v12417_v2  ;;  %7195 = vmatpush3.msra.mxu0 %v12434_v57  ;;  %v9521_v48 = vand.u32 4294901760, %v968_v40  ;;  %v890_v57 = vpop.permute.xlu0 %889 }
 0x1da   : > { %7222 = vmatpush3.msra.mxu1 %v9169_v47  ;;  %7196 = vmatprep.subr.mxu0 %v12417_v2  ;;  %v950_v47 = vsub.f32 %v9444_v16, %v9379_v42  ;;  %v949_v42 = vsub.f32 %v9444_v16, %v9395_v41  ;;  %v1069_v41 = vand.u32 4294901760, %v9504_v7  ;;  %v961_v62 = vmax.f32 %v945_v6, 0.0 }
 0x1db   : > { %7223 = vmatprep.subr.mxu1 %v12417_v2  ;;  %7197 = vmatpush3.msra.mxu0 %v12435_v63  ;;  %v894_v51 = vpop.permute.xlu1 %893  ;;  %v9543_v59 = vsub.f32 %v968_v40, %v9521_v48 }
 0x1dc   : > { %7224 = vmatpush3.msra.mxu1 %v9185_v9  ;;  %3911 = vperm.xlu1 %8761, %v8940_v26   ;;  %v967_v9 = vmax.f32 %v951_v53, 0.0  ;;  %v966_v20 = vmax.f32 %v950_v47, 0.0  ;;  %v965_v54 = vmax.f32 %v949_v42, 0.0  ;;  %v1070_v4 = vsub.f32 %v9504_v7, %v1069_v41 }
 0x1dd   : > { %7198 = vmatprep.subr.mxu0 %v12417_v2  ;;  %7225 = vmatprep.subr.mxu1 %v12417_v2  ;;  %v12386_v55 = vand.u32 4294901760, %v9543_v59  ;;  %v944_v47 = vsub.f32 %v9444_v16, %v894_v51  ;;  %v9620_v6 = vand.u32 4294901760, %v961_v62 }
 0x1de   : > { %7199 = vmatpush3.msra.mxu0 %v12436_v56  ;;  %7200 = vmatprep.mubr.msk.f32.mxu0 %vm8874_vm2, %v12417_v2  ;;  %v9533_v39 = vand.u32 4294901760, %v967_v9  ;;  %v9545_v5 = vand.u32 4294901760, %v966_v20  ;;  %v9560_v12 = vand.u32 4294901760, %v965_v54 }
 0x1df   : > { %7226 = vmatpush3.msra.mxu1 %v9209_v50  ;;  %7201 = vmatmul.mubr.msk.f32.vlgmr.msra.gmra.mxu0 %vm9190_vm3, %v12437_v44  ;;  %v9526_v50 = vsub.f32 %v969_v19, %v9501_v3  ;;  %v886_v46 = vpop.permute.xlu1 %885  ;;  %v9578_v19 = vand.u32 4294901760, %v964_v17 }
 0x1e0   : > { %7227 = vmatprep.subr.mxu1 %v12417_v2  ;;  %7238 = vmatprep.subr.mxu0 %v12417_v2  ;;  %v9558_v49 = vsub.f32 %v967_v9, %v9533_v39  ;;  %v9573_v43 = vsub.f32 %v966_v20, %v9545_v5  ;;  %v9589_v40 = vsub.f32 %v965_v54, %v9560_v12 }
 0x1e1   : > { %7228 = vmatpush3.msra.mxu1 %v9228_v14  ;;  %7239 = vmatpush3.msra.mxu0 %v9482_v15  ;;  %v1076_v14 = vand.u32 4294901760, %v9517_v61  ;;  %v943_v9 = vsub.f32 %v9444_v16, %v890_v57  ;;  %v9605_v20 = vsub.f32 %v964_v17, %v9578_v19  ;;  %v973_v17 = vrot.slane %v9207_v21, 1 }
 0x1e2   : > { %3903 = vperm.xlu1 %8761, %v8936_v24   ;;  %7229 = vmatprep.subr.mxu1 %v12417_v2  ;;  %v12384_v63 = vand.u32 4294901760, %v9558_v49  ;;  %v12383_v42 = vand.u32 4294901760, %v9573_v43  ;;  %v12385_v51 = vand.u32 4294901760, %v9589_v40 }
 0x1e3   : > { %7240 = vmatprep.subr.mxu0 %v12417_v2  ;;  %7230 = vmatpush3.msra.mxu1 %v9245_v8  ;;  %v1083_v8 = vand.u32 4294901760, %v9526_v50  ;;  %v1077_v0 = vsub.f32 %v9517_v61, %v1076_v14  ;;  %v959_v57 = vmax.f32 %v943_v9, 0.0 }
 0x1e4   : > { %7241 = vmatpush3.msra.mxu0 %v9491_v60  ;;  %7231 = vmatprep.subr.mxu1 %v12417_v2 }
 0x1e5   : > { %7242 = vmatprep.subr.mxu0 %v12417_v2  ;;  %7232 = vmatpush3.msra.mxu1 %v9264_v22  ;;  %v963_v22 = vmax.f32 %v947_v58, 0.0  ;;  %v1084_v53 = vsub.f32 %v9526_v50, %v1083_v8  ;;  %v1078_v56 = vand.u32 4294901760, %v1077_v0  ;;  %v960_v58 = vmax.f32 %v944_v47, 0.0 }
 0x1e6   : > { %7243 = vmatpush3.msra.mxu0 %v9501_v3  ;;  %8762 = vset.pattern.permute.xlu1 %v12438_v52  ;;  %v1098_v52 = vsub.f32 %v9558_v49, %v12384_v63  ;;  %v942_v0 = vsub.f32 %v9444_v16, %v886_v46  ;;  %v1105_v47 = vsub.f32 %v9573_v43, %v12383_v42  ;;  %v9642_v42 = vand.u32 4294901760, %v973_v17 }
 0x1e7   : > { %7233 = vmatprep.subr.mxu1 %v12417_v2  ;;  %7244 = vmatprep.subr.mxu0 %v12417_v2  ;;  %v9594_v18 = vand.u32 4294901760, %v963_v22  ;;  %v1085_v54 = vand.u32 4294901760, %v1084_v53  ;;  %v9636_v9 = vand.u32 4294901760, %v960_v58 }
 0x1e8   : > { %4714 = vperm.xlu1 %8762, %v8965_v38   ;;  %7234 = vmatpush3.msra.mxu1 %v9278_v45  ;;  %v962_v38 = vmax.f32 %v946_v13, 0.0  ;;  %v1071_v45 = vand.u32 4294901760, %v1070_v4  ;;  %v882_v13 = vpop.permute.xlu1 %881  ;;  %v958_v63 = vmax.f32 %v942_v0, 0.0 }
 0x1e9   : > { %7235 = vmatprep.mubr.msk.f32.mxu1 %vm8874_vm2, %v12417_v2  ;;  %7245 = vmatpush3.msra.mxu0 %v9521_v48  ;;  %v9618_v4 = vsub.f32 %v963_v22, %v9594_v18  ;;  %v12389_v22 = vand.u32 4294901760, %v9605_v20  ;;  %v941_v46 = vsub.f32 %v9444_v16, %v882_v13 }
 0x1ea   : > { %7236 = vmatmul.mubr.msk.f32.vlgmr.msra.gmra.mxu1 %vm9190_vm3, %v12437_v44  ;;  %7246 = vmatprep.subr.mxu0 %v12417_v2  ;;  %v1091_v44 = vsub.f32 %v9543_v59, %v12386_v55  ;;  %v9607_v11 = vand.u32 4294901760, %v962_v38 }
 0x1eb   : > { %7273 = vmatprep.subr.mxu1 %v12417_v2  ;;  %7247 = vmatpush3.msra.mxu0 %v9533_v39  ;;  %v12387_v13 = vand.u32 4294901760, %v9618_v4  ;;  %v957_v55 = vmax.f32 %v941_v46, 0.0 }
 0x1ec   : > { %7274 = vmatpush3.msra.mxu1 %v1071_v45  ;;  %7248 = vmatprep.subr.mxu0 %v12417_v2  ;;  %v878_v45 = vpop.permute.xlu0 %877  ;;  %v1092_v53 = vand.u32 4294901760, %v1091_v44  ;;  %v1099_v44 = vand.u32 4294901760, %v1098_v52  ;;  %v1106_v52 = vand.u32 4294901760, %v1105_v47 }
 0x1ed   : > { %7275 = vmatprep.subr.mxu1 %v12417_v2  ;;  %4706 = vperm.xlu1 %8762, %v8960_v36  }
 0x1ee   : > { %7249 = vmatpush3.msra.mxu0 %v9545_v5  ;;  %7276 = vmatpush3.msra.mxu1 %v1078_v56  ;;  %v9631_v56 = vsub.f32 %v962_v38, %v9607_v11  ;;  %v940_v38 = vsub.f32 %v9444_v16, %v878_v45  ;;  %v1119_v16 = vsub.f32 %v9605_v20, %v12389_v22 }
 0x1ef   : > { %7250 = vmatprep.subr.mxu0 %v12417_v2  ;;  %7277 = vmatprep.subr.mxu1 %v12417_v2  ;;  %v9665_v45 = vsub.f32 %v973_v17, %v9642_v42  ;;  %v9679_v17 = vand.u32 4294901760, %v957_v55 }
 0x1f0   : > { %7251 = vmatpush3.msra.mxu0 %v9560_v12  ;;  %7278 = vmatpush3.msra.mxu1 %v1085_v54  ;;  %v1112_v54 = vsub.f32 %v9589_v40, %v12385_v51  ;;  %v12388_v51 = vand.u32 4294901760, %v9631_v56  ;;  %v956_v47 = vmax.f32 %v940_v38, 0.0 }
 0x1f1   : > { %7252 = vmatprep.subr.mxu0 %v12417_v2  ;;  %7279 = vmatprep.subr.mxu1 %v12417_v2 }
 0x1f2   : > { %4702 = vperm.xlu1 %8762, %v8958_v35   ;;  %7253 = vmatpush3.msra.mxu0 %v9578_v19  ;;  %v9647_v35 = vsub.f32 %v961_v62, %v9620_v6  ;;  %v9661_v62 = vsub.f32 %v960_v58, %v9636_v9  ;;  %v1113_v0 = vand.u32 4294901760, %v1112_v54  ;;  %v1120_v54 = vand.u32 4294901760, %v1119_v16 }
 0x1f3   : > { %7280 = vmatpush3.msra.mxu1 %v1092_v53  ;;  %7254 = vmatprep.subr.mxu0 %v12417_v2  ;;  %v9651_v53 = vand.u32 4294901760, %v959_v57  ;;  %v1133_v38 = vsub.f32 %v9631_v56, %v12388_v51 }
 0x1f4   : > { %7281 = vmatprep.subr.mxu1 %v12417_v2  ;;  %7255 = vmatpush3.msra.mxu0 %v9594_v18  ;;  %v12390_v46 = vand.u32 4294901760, %v9647_v35 }
 0x1f5   : > { %7282 = vmatpush3.msra.mxu1 %v1099_v44  ;;  %7256 = vmatprep.subr.mxu0 %v12417_v2  ;;  %v9668_v44 = vand.u32 4294901760, %v958_v63  ;;  %v9676_v58 = vsub.f32 %v959_v57, %v9651_v53  ;;  %v1058_v57 = vand.u32 4294901760, %v9665_v45 }
 0x1f6   : > { %7283 = vmatprep.subr.mxu1 %v12417_v2  ;;  %4694 = vperm.xlu1 %8762, %v8954_v33   ;;  %v1126_v33 = vsub.f32 %v9618_v4, %v12387_v13  ;;  %v1140_v51 = vsub.f32 %v9647_v35, %v12390_v46 }
 0x1f7   : > { %7257 = vmatpush3.msra.mxu0 %v9607_v11  ;;  %7284 = vmatpush3.msra.mxu1 %v1106_v52  ;;  %v1146_v52 = vand.u32 4294901760, %v9661_v62  ;;  %v9693_v13 = vsub.f32 %v958_v63, %v9668_v44  ;;  %v12391_v22 = vand.u32 4294901760, %v9676_v58  ;;  %v1134_v63 = vand.u32 4294901760, %v1133_v38 }
 0x1f8   : > { %7258 = vmatprep.subr.mxu0 %v12417_v2  ;;  %7285 = vmatprep.subr.mxu1 %v12417_v2  ;;  %v1127_v16 = vand.u32 4294901760, %v1126_v33  ;;  %v1141_v38 = vand.u32 4294901760, %v1140_v51 }
 0x1f9   : > { %7259 = vmatpush3.msra.mxu0 %v9620_v6  ;;  %7286 = vmatpush3.msra.mxu1 %v1113_v0  ;;  %v9690_v0 = vand.u32 4294901760, %v956_v47  ;;  %v1147_v33 = vsub.f32 %v9661_v62, %v1146_v52 }
 0x1fa   : > { %7260 = vmatprep.subr.mxu0 %v12417_v2  ;;  %7287 = vmatprep.subr.mxu1 %v12417_v2 }
 0x1fb   : > { %4686 = vperm.xlu1 %8762, %v8950_v31   ;;  %7261 = vmatpush3.msra.mxu0 %v9636_v9  ;;  %v9703_v31 = vsub.f32 %v957_v55, %v9679_v17  ;;  %v9715_v46 = vsub.f32 %v956_v47, %v9690_v0  ;;  %v1160_v55 = vand.u32 4294901760, %v9693_v13  ;;  %v1148_v47 = vand.u32 4294901760, %v1147_v33 }
 0x1fc   : > { %7288 = vmatpush3.msra.mxu1 %v1120_v54  ;;  %7262 = vmatprep.subr.mxu0 %v12417_v2  ;;  %v1059_v54 = vsub.f32 %v9665_v45, %v1058_v57 }
 0x1fd   : > { %7289 = vmatprep.subr.mxu1 %v12417_v2  ;;  %7263 = vmatpush3.msra.mxu0 %v9651_v53  ;;  %v1174_v51 = vand.u32 4294901760, %v9715_v46 }
 0x1fe   : > { %7290 = vmatpush3.msra.mxu1 %v1127_v16  ;;  %7264 = vmatprep.subr.mxu0 %v12417_v2  ;;  %v1167_v16 = vand.u32 4294901760, %v9703_v31 }
 0x1ff   : > { %7291 = vmatprep.subr.mxu1 %v12417_v2  ;;  %4678 = vperm.xlu1 %8762, %v8946_v29   ;;  %v1154_v29 = vsub.f32 %v9676_v58, %v12391_v22  ;;  %v1161_v22 = vsub.f32 %v9693_v13, %v1160_v55 }
 0x200   : > { %7265 = vmatpush3.msra.mxu0 %v9668_v44  ;;  %7292 = vmatpush3.msra.mxu1 %v1134_v63  ;;  %v1060_v63 = vand.u32 4294901760, %v1059_v54  ;;  %v1168_v33 = vsub.f32 %v9703_v31, %v1167_v16 }
 0x201   : > { %7266 = vmatprep.subr.mxu0 %v12417_v2  ;;  %7293 = vmatprep.subr.mxu1 %v12417_v2  ;;  %v1162_v54 = vand.u32 4294901760, %v1161_v22 }
 0x202   : > { %7267 = vmatpush3.msra.mxu0 %v9679_v17  ;;  %7294 = vmatpush3.msra.mxu1 %v1141_v38  ;;  %v1155_v38 = vand.u32 4294901760, %v1154_v29  ;;  %v1169_v29 = vand.u32 4294901760, %v1168_v33 }
 0x203   : > { %7268 = vmatprep.subr.mxu0 %v12417_v2  ;;  %7295 = vmatprep.subr.mxu1 %v12417_v2 }
 0x204   : > { %4670 = vperm.xlu1 %8762, %v8942_v27   ;;  %7269 = vmatpush3.msra.mxu0 %v9690_v0  ;;  %v1175_v27 = vsub.f32 %v9715_v46, %v1174_v51 }
 0x205   : > { %7296 = vmatpush3.msra.mxu1 %v1148_v47  ;;  %7270 = vmatprep.mubr.msk.f32.mxu0 %vm8874_vm2, %v12417_v2 }
 0x206   : > { %7297 = vmatprep.subr.mxu1 %v12417_v2  ;;  %7308 = vmatprep.subr.mxu0 %v12417_v2  ;;  %v1176_v47 = vand.u32 4294901760, %v1175_v27 }
 0x207   : > { %7271 = vmatmul.mubr.f32.vlgmr.msra.gmra.mxu0 %v1060_v63  ;;  %7298 = vmatpush3.msra.mxu1 %v1155_v38 }
 0x208   : > { %7309 = vmatpush3.msra.mxu0 %v9504_v7  ;;  %7299 = vmatprep.subr.mxu1 %v12417_v2  ;;  %v12443_v7 = vand.u32 4294901760, %v9589_v40 }
 0x209   : > { %7310 = vmatprep.subr.mxu0 %v12417_v2  ;;  %4662 = vperm.xlu1 %8762, %v8938_v25   ;;  %v1695_v25 = vpop.permute.xlu1 %1694 }
 0x20a   : > { %7300 = vmatpush3.msra.mxu1 %v1162_v54  ;;  %7311 = vmatpush3.msra.mxu0 %v9517_v61 }
 0x20b   : > { %7301 = vmatprep.subr.mxu1 %v12417_v2  ;;  %7312 = vmatprep.subr.mxu0 %v12417_v2 }
 0x20c   : > { %7302 = vmatpush3.msra.mxu1 %v1169_v29  ;;  %7313 = vmatpush3.msra.mxu0 %v9526_v50  ;;  %v12444_v50 = vand.u32 4294901760, %v9605_v20 }
 0x20d   : > { %7303 = vmatprep.subr.mxu1 %v12417_v2  ;;  %7314 = vmatprep.subr.mxu0 %v12417_v2 }
 0x20e   : > { %4654 = vperm.xlu1 %8762, %v8934_v23   ;;  %7304 = vmatpush3.msra.mxu1 %v1176_v47  ;;  %v12439_v23 = vmov 7  }
 0x20f   : > { %7305 = vmatprep.mubr.msk.f32.mxu1 %vm8874_vm2, %v12417_v2  ;;  %7315 = vmatpush3.msra.mxu0 %v9543_v59 }
 0x210   : > { %7306 = vmatmul.mubr.f32.vlgmr.msra.gmra.mxu1 %v9642_v42  ;;  %7316 = vmatprep.subr.mxu0 %v12417_v2 }
 0x211   : > { %7343 = vmatprep.subr.mxu1 %v12417_v2  ;;  %7317 = vmatpush3.msra.mxu0 %v9558_v49 }
 0x212   : > { %7344 = vmatpush3.msra.mxu1 %v9482_v15  ;;  %7318 = vmatprep.subr.mxu0 %v12417_v2 }
 0x213   : > { %7345 = vmatprep.subr.mxu1 %v12417_v2  ;;  %8765 = vset.pattern.permute.xlu1 %v12439_v23 }
 0x214   : > { %7319 = vmatpush3.msra.mxu0 %v9573_v43  ;;  %7346 = vmatpush3.msra.mxu1 %v9491_v60 }
 0x215   : > { %5465 = vperm.xlu1 %8765, %v8962_v37   ;;  %7320 = vmatprep.subr.mxu0 %v12417_v2 }
 0x216   : > { %7347 = vmatprep.subr.mxu1 %v12417_v2  ;;  %7321 = vmatpush3.msra.mxu0 %v9589_v40 }
 0x217   : > { %7348 = vmatpush3.msra.mxu1 %v9501_v3  ;;  %7322 = vmatprep.subr.mxu0 %v12417_v2 }
 0x218   : > { %7349 = vmatprep.subr.mxu1 %v12417_v2  ;;  %7323 = vmatpush3.msra.mxu0 %v9605_v20 }
 0x219   : > { %7350 = vmatpush3.msra.mxu1 %v9521_v48  ;;  %5461 = vperm.xlu1 %8765, %v8960_v36   ;;  %v1631_v36 = vsub.s32 2, %v8902_v1 }
 0x21a   : > { %7324 = vmatprep.subr.mxu0 %v12417_v2  ;;  %7351 = vmatprep.subr.mxu1 %v12417_v2 }
 0x21b   : > { %7325 = vmatpush3.msra.mxu0 %v9618_v4  ;;  %7352 = vmatpush3.msra.mxu1 %v9533_v39 }
 0x21c   : > { %7326 = vmatprep.subr.mxu0 %v12417_v2  ;;  %7353 = vmatprep.subr.mxu1 %v12417_v2 }
 0x21d   : > { %7327 = vmatpush3.msra.mxu0 %v9631_v56  ;;  %7354 = vmatpush3.msra.mxu1 %v9545_v5 }
 0x21e   : > { %5453 = vperm.xlu1 %8765, %v8956_v34   ;;  %7328 = vmatprep.subr.mxu0 %v12417_v2  ;;  %v12441_v34 = vand.u32 4294901760, %v9558_v49 }
 0x21f   : > { %7355 = vmatprep.subr.mxu1 %v12417_v2  ;;  %7329 = vmatpush3.msra.mxu0 %v9647_v35 }
 0x220   : > { %7356 = vmatpush3.msra.mxu1 %v9560_v12  ;;  %7330 = vmatprep.subr.mxu0 %v12417_v2 }
 0x221   : > { %7357 = vmatprep.subr.mxu1 %v12417_v2  ;;  %7331 = vmatpush3.msra.mxu0 %v9661_v62 }
 0x222   : > { %7358 = vmatpush3.msra.mxu1 %v9578_v19  ;;  %5445 = vperm.xlu1 %8765, %v8952_v32  }
 0x223   : > { %7332 = vmatprep.subr.mxu0 %v12417_v2  ;;  %7359 = vmatprep.subr.mxu1 %v12417_v2 }
 0x224   : > { %7333 = vmatpush3.msra.mxu0 %v9676_v58  ;;  %7360 = vmatpush3.msra.mxu1 %v9594_v18 }
 0x225   : > { %7334 = vmatprep.subr.mxu0 %v12417_v2  ;;  %7361 = vmatprep.subr.mxu1 %v12417_v2 }
 0x226   : > { %7335 = vmatpush3.msra.mxu0 %v9693_v13  ;;  %7362 = vmatpush3.msra.mxu1 %v9607_v11 }
 0x227   : > { %5437 = vperm.xlu1 %8765, %v8948_v30   ;;  %7336 = vmatprep.subr.mxu0 %v12417_v2  ;;  %v1691_v30 = vpop.permute.xlu0 %1690 }
 0x228   : > { %7363 = vmatprep.subr.mxu1 %v12417_v2  ;;  %7337 = vmatpush3.msra.mxu0 %v9703_v31 }
 0x229   : > { %7364 = vmatpush3.msra.mxu1 %v9620_v6  ;;  %7338 = vmatprep.subr.mxu0 %v12417_v2 }
 0x22a   : > { %7365 = vmatprep.subr.mxu1 %v12417_v2  ;;  %7339 = vmatpush3.msra.mxu0 %v9715_v46 }
 0x22b   : > { %7340 = vmatprep.mubr.msk.f32.mxu0 %vm8874_vm2, %v12417_v2  ;;  %7366 = vmatpush3.msra.mxu1 %v9636_v9  ;;  %v1679_v37 = vpop.permute.xlu0 %1678 }
 0x22c   : > { %5429 = vperm.xlu1 %8765, %v8944_v28   ;;  %7341 = vmatmul.mubr.f32.vlgmr.msra.gmra.mxu0 %v9665_v45  ;;  %v9829_v28 = vpop.permute.xlu1 %1686 }
 0x22d   : > { %7367 = vmatprep.subr.mxu1 %v12417_v2  ;;  %7378 = vmatprep.subr.mxu0 %v12417_v2 }
 0x22e   : > { %7368 = vmatpush3.msra.mxu1 %v9651_v53  ;;  %7379 = vmatpush3.msra.mxu0 %v1069_v41  ;;  %v12445_v41 = vand.u32 4294901760, %v9618_v4 }
 0x22f   : > { %7369 = vmatprep.subr.mxu1 %v12417_v2  ;;  %7380 = vmatprep.subr.mxu0 %v12417_v2 }
 0x230   : > { %7370 = vmatpush3.msra.mxu1 %v9668_v44  ;;  %7381 = vmatpush3.msra.mxu0 %v1076_v14  ;;  %v1683_v32 = vpop.permute.xlu1 %1682 }
 0x231   : > { %5421 = vperm.xlu1 %8765, %v8940_v26   ;;  %7371 = vmatprep.subr.mxu1 %v12417_v2  ;;  %v12440_v26 = vand.u32 4294901760, %v9543_v59  ;;  %v1671_v59 = vpop.permute.xlu0 %1670 }
 0x232   : > { %7382 = vmatprep.subr.mxu0 %v12417_v2  ;;  %7372 = vmatpush3.msra.mxu1 %v9679_v17 }
 0x233   : > { %7383 = vmatpush3.msra.mxu0 %v1083_v8  ;;  %7373 = vmatprep.subr.mxu1 %v12417_v2 }
 0x234   : > { %7384 = vmatprep.subr.mxu0 %v12417_v2  ;;  %7374 = vmatpush3.msra.mxu1 %v9690_v0 }
 0x235   : > { %7375 = vmatprep.mubr.msk.f32.mxu1 %vm8874_vm2, %v12417_v2  ;;  %7385 = vmatpush3.msra.mxu0 %v12440_v26  ;;  %v1663_v4 = vpop.permute.xlu0 %1662 }
 0x236   : > { %5413 = vperm.xlu1 %8765, %v8936_v24   ;;  %7376 = vmatmul.mubr.f32.vlgmr.msra.gmra.mxu1 %v1058_v57  ;;  %v12442_v24 = vand.u32 4294901760, %v9573_v43  ;;  %v12447_v43 = vand.u32 4294901760, %v9647_v35 }
 0x237   : > { %7386 = vmatprep.subr.mxu0 %v12417_v2  ;;  %7413 = vmatprep.subr.mxu1 %v12417_v2 }
 0x238   : > { %7387 = vmatpush3.msra.mxu0 %v12441_v34  ;;  %7414 = vmatpush3.msra.mxu1 %v9482_v15  ;;  %v9862_v15 = vld [vmem:[%s8918_s23] sm:$0xff] }
 0x239   : > { %7388 = vmatprep.subr.mxu0 %v12417_v2  ;;  %7415 = vmatprep.subr.mxu1 %v12417_v2  ;;  %v9865_v61 = vrot.slane %v9862_v15, %v1631_v36  ;;  %v1655_v63 = vpop.permute.xlu0 %1654 }
 0x23a   : > { %7389 = vmatpush3.msra.mxu0 %v12442_v24  ;;  %7416 = vmatpush3.msra.mxu1 %v9491_v60  ;;  %v1675_v60 = vpop.permute.xlu1 %1674 }
 0x23b   : > { %7390 = vmatprep.subr.mxu0 %v12417_v2  ;;  %7417 = vmatprep.subr.mxu1 %v12417_v2  ;;  %v1711_v14 = vsub.f32 %v9865_v61, %v1691_v30  ;;  %v1709_v20 = vsub.f32 %v9865_v61, %v1683_v32  ;;  %v1702_v26 = vsub.f32 %v9865_v61, %v1655_v63 }
 0x23c   : > { %7391 = vmatpush3.msra.mxu0 %v12443_v7  ;;  %7418 = vmatpush3.msra.mxu1 %v9501_v3  ;;  %v1712_v3 = vsub.f32 %v9865_v61, %v1695_v25 }
 0x23d   : > { %7392 = vmatprep.subr.mxu0 %v12417_v2  ;;  %7419 = vmatprep.subr.mxu1 %v12417_v2  ;;  %v1727_v40 = vmax.f32 %v1711_v14, 0.0  ;;  %v1725_v62 = vmax.f32 %v1709_v20, 0.0  ;;  %v1647_v30 = vpop.permute.xlu0 %1646 }
 0x23e   : > { %7393 = vmatpush3.msra.mxu0 %v12444_v50  ;;  %7420 = vmatpush3.msra.mxu1 %v9521_v48  ;;  %v12446_v48 = vand.u32 4294901760, %v9631_v56  ;;  %v1728_v8 = vmax.f32 %v1712_v3, 0.0  ;;  %v1667_v49 = vpop.permute.xlu1 %1666  ;;  %v12448_v56 = vand.u32 4294901760, %v9676_v58  ;;  %v1706_v58 = vsub.f32 %v9865_v61, %v1671_v59 }
 0x23f   : > { %7394 = vmatprep.subr.mxu0 %v12417_v2  ;;  %7421 = vmatprep.subr.mxu1 %v12417_v2  ;;  %v9905_v35 = vand.u32 4294901760, %v1727_v40  ;;  %v1705_v38 = vsub.f32 %v9865_v61, %v1667_v49 }
 0x240   : > { %7395 = vmatpush3.msra.mxu0 %v12445_v41  ;;  %7422 = vmatpush3.msra.mxu1 %v9533_v39  ;;  %v1710_v39 = vsub.f32 %v9865_v61, %v9829_v28  ;;  %v1722_v31 = vmax.f32 %v1706_v58, 0.0 }
 0x241   : > { %7396 = vmatprep.subr.mxu0 %v12417_v2  ;;  %7423 = vmatprep.subr.mxu1 %v12417_v2  ;;  %v9925_v13 = vsub.f32 %v1727_v40, %v9905_v35  ;;  %v1639_v40 = vpop.permute.xlu0 %1638 }
 0x242   : > { %7397 = vmatpush3.msra.mxu0 %v12446_v48  ;;  %7424 = vmatpush3.msra.mxu1 %v9545_v5  ;;  %v1708_v5 = vsub.f32 %v9865_v61, %v1679_v37  ;;  %v1726_v22 = vmax.f32 %v1710_v39, 0.0  ;;  %v1659_v45 = vpop.permute.xlu1 %1658  ;;  %v9961_v25 = vand.u32 4294901760, %v1722_v31  ;;  %v1700_v48 = vsub.f32 %v9865_v61, %v1647_v30 }
 0x243   : > { %7398 = vmatprep.subr.mxu0 %v12417_v2  ;;  %7425 = vmatprep.subr.mxu1 %v12417_v2  ;;  %v1832_v46 = vand.u32 4294901760, %v9925_v13  ;;  %v1703_v47 = vsub.f32 %v9865_v61, %v1659_v45 }
 0x244   : > { %7399 = vmatpush3.msra.mxu0 %v12447_v43  ;;  %7426 = vmatpush3.msra.mxu1 %v9560_v12  ;;  %v9900_v12 = vand.u32 4294901760, %v1728_v8  ;;  %v9919_v57 = vand.u32 4294901760, %v1726_v22  ;;  %v9988_v14 = vsub.f32 %v1722_v31, %v9961_v25 }
 0x245   : > { %7400 = vmatprep.subr.mxu0 %v12417_v2  ;;  %7427 = vmatprep.subr.mxu1 %v12417_v2 }
 0x246   : > { %7401 = vmatpush3.msra.mxu0 %v1146_v52  ;;  %7428 = vmatpush3.msra.mxu1 %v9578_v19  ;;  %v1707_v19 = vsub.f32 %v9865_v61, %v1675_v60  ;;  %v1724_v52 = vmax.f32 %v1708_v5, 0.0  ;;  %v9943_v27 = vsub.f32 %v1726_v22, %v9919_v57  ;;  %v1651_v54 = vpop.permute.xlu1 %1650  ;;  %v1719_v60 = vmax.f32 %v1703_v47, 0.0 }
 0x247   : > { %7402 = vmatprep.subr.mxu0 %v12417_v2  ;;  %7429 = vmatprep.subr.mxu1 %v12417_v2  ;;  %v1701_v50 = vsub.f32 %v9865_v61, %v1651_v54 }
 0x248   : > { %7403 = vmatpush3.msra.mxu0 %v12448_v56  ;;  %7430 = vmatpush3.msra.mxu1 %v9594_v18  ;;  %v9917_v18 = vsub.f32 %v1728_v8, %v9900_v12  ;;  %v1839_v32 = vand.u32 4294901760, %v9943_v27  ;;  %v1867_v56 = vand.u32 4294901760, %v9988_v14 }
 0x249   : > { %7404 = vmatprep.subr.mxu0 %v12417_v2  ;;  %7431 = vmatprep.subr.mxu1 %v12417_v2  ;;  %v1717_v5 = vmax.f32 %v1701_v50, 0.0 }
 0x24a   : > { %7405 = vmatpush3.msra.mxu0 %v1160_v55  ;;  %7432 = vmatpush3.msra.mxu1 %v9607_v11  ;;  %v9927_v11 = vand.u32 4294901760, %v1725_v62  ;;  %v1723_v55 = vmax.f32 %v1707_v19, 0.0  ;;  %v1825_v33 = vand.u32 4294901760, %v9917_v18  ;;  %v1643_v3 = vpop.permute.xlu1 %1642  ;;  %v1840_v39 = vsub.f32 %v9943_v27, %v1839_v32 }
 0x24b   : > { %7406 = vmatprep.subr.mxu0 %v12417_v2  ;;  %7433 = vmatprep.subr.mxu1 %v12417_v2 }
 0x24c   : > { %7407 = vmatpush3.msra.mxu0 %v1167_v16  ;;  %7434 = vmatpush3.msra.mxu1 %v9620_v6  ;;  %v9936_v6 = vand.u32 4294901760, %v1724_v52  ;;  %v1704_v16 = vsub.f32 %v9865_v61, %v1663_v4  ;;  %v9951_v29 = vand.u32 4294901760, %v1723_v55  ;;  %v1826_v34 = vsub.f32 %v9917_v18, %v1825_v33 }
 0x24d   : > { %7408 = vmatprep.subr.mxu0 %v12417_v2  ;;  %7435 = vmatprep.subr.mxu1 %v12417_v2  ;;  %v1729_v4 = vrot.slane %v9207_v21, 2 }
 0x24e   : > { %7409 = vmatpush3.msra.mxu0 %v1174_v51  ;;  %7410 = vmatprep.mubr.msk.f32.mxu0 %vm8874_vm2, %v12417_v2  ;;  %v9949_v51 = vsub.f32 %v1725_v62, %v9927_v11  ;;  %v9959_v23 = vsub.f32 %v1724_v52, %v9936_v6  ;;  %v1720_v28 = vmax.f32 %v1704_v16, 0.0  ;;  %v9977_v24 = vsub.f32 %v1723_v55, %v9951_v29  ;;  %v1635_v58 = vpop.permute.xlu1 %1634 }
 0x24f   : > { %7436 = vmatpush3.msra.mxu1 %v9636_v9  ;;  %7411 = vmatmul.mubr.f32.vlgmr.msra.gmra.mxu0 %v9642_v42  ;;  %v1721_v9 = vmax.f32 %v1705_v38, 0.0  ;;  %v1827_v8 = vand.u32 4294901760, %v1826_v34  ;;  %v1699_v62 = vsub.f32 %v9865_v61, %v1643_v3  ;;  %v1716_v52 = vmax.f32 %v1700_v48, 0.0 }
 0x250   : > { %7437 = vmatprep.subr.mxu1 %v12417_v2  ;;  %7448 = vmatprep.subr.mxu0 %v12417_v2  ;;  %v1846_v36 = vand.u32 4294901760, %v9949_v51  ;;  %v1853_v41 = vand.u32 4294901760, %v9959_v23  ;;  %v9990_v59 = vand.u32 4294901760, %v1720_v28  ;;  %v1841_v55 = vand.u32 4294901760, %v1840_v39 }
 0x251   : > { %7438 = vmatpush3.msra.mxu1 %v9651_v53  ;;  %7449 = vmatpush3.msra.mxu0 %v9900_v12  ;;  %v9981_v7 = vand.u32 4294901760, %v1721_v9  ;;  %v1698_v38 = vsub.f32 %v9865_v61, %v1639_v40  ;;  %v1715_v34 = vmax.f32 %v1699_v62, 0.0  ;;  %v10055_v3 = vand.u32 4294901760, %v1716_v52 }
 0x252   : > { %7439 = vmatprep.subr.mxu1 %v12417_v2  ;;  %7450 = vmatprep.subr.mxu0 %v12417_v2  ;;  %v1847_v49 = vsub.f32 %v9949_v51, %v1846_v36  ;;  %v1854_v22 = vsub.f32 %v9959_v23, %v1853_v41  ;;  %v10022_v19 = vsub.f32 %v1720_v28, %v9990_v59  ;;  %v10039_v28 = vand.u32 4294901760, %v1717_v5 }
 0x253   : > { %7440 = vmatpush3.msra.mxu1 %v9668_v44  ;;  %7451 = vmatpush3.msra.mxu0 %v9905_v35  ;;  %v308_v53 = vpop.f32.mrf.mxu0  ;;  %v1833_v44 = vsub.f32 %v9925_v13, %v1832_v46  ;;  %v10008_v20 = vsub.f32 %v1721_v9, %v9981_v7 }
 0x254   : > { %7441 = vmatprep.subr.mxu1 %v12417_v2  ;;  %7452 = vmatprep.subr.mxu0 %v12417_v2  ;;  %v1848_v16 = vand.u32 4294901760, %v1847_v49  ;;  %v1855_v50 = vand.u32 4294901760, %v1854_v22 }
 0x255   : > { %7442 = vmatpush3.msra.mxu1 %v9679_v17  ;;  %7453 = vmatpush3.msra.mxu0 %v9919_v57  ;;  %v7062_v37 = vpop.f32.mrf.mxu0  ;;  %v1718_v17 = vmax.f32 %v1702_v26, 0.0  ;;  %v1834_v43 = vand.u32 4294901760, %v1833_v44  ;;  %v1874_v9 = vand.u32 4294901760, %v10008_v20  ;;  %v10042_v26 = vand.u32 4294901760, %v1729_v4 }
 0x256   : > { %7443 = vmatprep.subr.mxu1 %v12417_v2  ;;  %7454 = vmatprep.subr.mxu0 %v12417_v2  ;;  %v1697_v44 = vsub.f32 %v9865_v61, %v1635_v58  ;;  %v1881_v37 = vand.u32 4294901760, %v10022_v19  ;;  %v1714_v61 = vmax.f32 %v1698_v38, 0.0 }
 0x257   : > { %7444 = vmatpush3.msra.mxu1 %v9690_v0  ;;  %7445 = vmatprep.mubr.msk.f32.mxu1 %vm8874_vm2, %v12417_v2  ;;  %v1860_v0 = vand.u32 4294901760, %v9977_v24  ;;  %v10024_v45 = vand.u32 4294901760, %v1718_v17  ;;  %v10068_v49 = vsub.f32 %v1729_v4, %v10042_v26  ;;  %v10080_v4 = vsub.f32 %v1716_v52, %v10055_v3 }
 0x258   : > { %7455 = vmatpush3.msra.mxu0 %v9927_v11  ;;  %7446 = vmatmul.mubr.f32.vlgmr.msra.gmra.mxu1 %v9642_v42  ;;  %v10010_v42 = vand.u32 4294901760, %v1719_v60  ;;  %v1713_v40 = vmax.f32 %v1697_v44, 0.0  ;;  %v1882_v22 = vsub.f32 %v10022_v19, %v1881_v37  ;;  %v10082_v58 = vand.u32 4294901760, %v1714_v61 }
 0x259   : > { %7456 = vmatprep.subr.mxu0 %v12417_v2  ;;  %7483 = vmatprep.subr.mxu1 %v12417_v2  ;;  %v1861_v31 = vsub.f32 %v9977_v24, %v1860_v0 }
 0x25a   : > { %7457 = vmatpush3.msra.mxu0 %v9936_v6  ;;  %7484 = vmatpush3.msra.mxu1 %v1827_v8  ;;  %v10037_v47 = vsub.f32 %v1719_v60, %v10010_v42  ;;  %v10052_v60 = vsub.f32 %v1718_v17, %v10024_v45  ;;  %v1875_v8 = vsub.f32 %v10008_v20, %v1874_v9  ;;  %v1883_v44 = vand.u32 4294901760, %v1882_v22 }
 0x25b   : > { %7458 = vmatprep.subr.mxu0 %v12417_v2  ;;  %7485 = vmatprep.subr.mxu1 %v12417_v2  ;;  %v1862_v48 = vand.u32 4294901760, %v1861_v31  ;;  %v10064_v17 = vsub.f32 %v1717_v5, %v10039_v28  ;;  %v1814_v31 = vand.u32 4294901760, %v10068_v49 }
 0x25c   : > { %7459 = vmatpush3.msra.mxu0 %v9951_v29  ;;  %7486 = vmatpush3.msra.mxu1 %v1834_v43  ;;  %v459_v63 = vpop.f32.mrf.mxu1  ;;  %v1888_v39 = vand.u32 4294901760, %v10037_v47  ;;  %v10070_v43 = vand.u32 4294901760, %v1715_v34  ;;  %v1895_v5 = vand.u32 4294901760, %v10052_v60  ;;  %v1876_v38 = vand.u32 4294901760, %v1875_v8 }
 0x25d   : > { %7460 = vmatprep.subr.mxu0 %v12417_v2  ;;  %7487 = vmatprep.subr.mxu1 %v12417_v2  ;;  %v10033_v54 = vadd.f32 %v459_v63, %v308_v53  ;;  %v1868_v53 = vsub.f32 %v9988_v14, %v1867_v56  ;;  %v1902_v63 = vand.u32 4294901760, %v10064_v17  ;;  %v1815_v8 = vsub.f32 %v10068_v49, %v1814_v31 }
 0x25e   : > { %7461 = vmatpush3.msra.mxu0 %v9961_v25  ;;  %7488 = vmatpush3.msra.mxu1 %v1841_v55  ;;  %v7097_v30 = vpop.f32.mrf.mxu1  ;;  %v1889_v55 = vsub.f32 %v10037_v47, %v1888_v39  ;;  %v10093_v52 = vsub.f32 %v1715_v34, %v10070_v43 }
 0x25f   : > { %7462 = vmatprep.subr.mxu0 %v12417_v2  ;;  %7489 = vmatprep.subr.mxu1 %v12417_v2  ;;  %v1869_v62 = vand.u32 4294901760, %v1868_v53  ;;  %v1896_v30 = vsub.f32 %v10052_v60, %v1895_v5  ;;  %v12392_v53 = vand.u32 4294901760, %v10080_v4  ;;  %v1903_v34 = vsub.f32 %v10064_v17, %v1902_v63 }
 0x260   : > { %7463 = vmatpush3.msra.mxu0 %v9981_v7  ;;  %7490 = vmatpush3.msra.mxu1 %v1848_v16  ;;  %v10095_v16 = vand.u32 4294901760, %v1713_v40  ;;  %v1916_v22 = vand.u32 4294901760, %v10093_v52 }
 0x261   : > { %7464 = vmatprep.subr.mxu0 %v12417_v2  ;;  %7491 = vmatprep.subr.mxu1 %v12417_v2 }
 0x262   : > { %7465 = vmatpush3.msra.mxu0 %v9990_v59  ;;  %7492 = vmatpush3.msra.mxu1 %v1855_v50  ;;  %v10105_v50 = vsub.f32 %v1714_v61, %v10082_v58  ;;  %v10118_v61 = vsub.f32 %v1713_v40, %v10095_v16  ;;  %v1904_v40 = vand.u32 4294901760, %v1903_v34 }
 0x263   : > { %7466 = vmatprep.subr.mxu0 %v12417_v2  ;;  %7493 = vmatprep.subr.mxu1 %v12417_v2 }
 0x264   : > { %7467 = vmatpush3.msra.mxu0 %v10010_v42  ;;  %7494 = vmatpush3.msra.mxu1 %v1862_v48  ;;  %v1890_v48 = vand.u32 4294901760, %v1889_v55  ;;  %v1910_v55 = vsub.f32 %v10080_v4, %v12392_v53 }
 0x265   : > { %7468 = vmatprep.subr.mxu0 %v12417_v2  ;;  %7495 = vmatprep.subr.mxu1 %v12417_v2 }
 0x266   : > { %7469 = vmatpush3.msra.mxu0 %v10024_v45  ;;  %7496 = vmatpush3.msra.mxu1 %v1869_v62  ;;  %v1897_v62 = vand.u32 4294901760, %v1896_v30  ;;  %v1930_v30 = vand.u32 4294901760, %v10118_v61  ;;  %v1911_v34 = vand.u32 4294901760, %v1910_v55 }
 0x267   : > { %7470 = vmatprep.subr.mxu0 %v12417_v2  ;;  %7497 = vmatprep.subr.mxu1 %v12417_v2 }
 0x268   : > { %7471 = vmatpush3.msra.mxu0 %v10039_v28  ;;  %7498 = vmatpush3.msra.mxu1 %v1876_v38  ;;  %v1923_v38 = vand.u32 4294901760, %v10105_v50 }
 0x269   : > { %7472 = vmatprep.subr.mxu0 %v12417_v2  ;;  %7499 = vmatprep.subr.mxu1 %v12417_v2 }
 0x26a   : > { %7473 = vmatpush3.msra.mxu0 %v10055_v3  ;;  %7500 = vmatpush3.msra.mxu1 %v1883_v44  ;;  %v1816_v44 = vand.u32 4294901760, %v1815_v8  ;;  %v1924_v53 = vsub.f32 %v10105_v50, %v1923_v38  ;;  %v1931_v8 = vsub.f32 %v10118_v61, %v1930_v30 }
 0x26b   : > { %7474 = vmatprep.subr.mxu0 %v12417_v2  ;;  %7501 = vmatprep.subr.mxu1 %v12417_v2 }
 0x26c   : > { %7475 = vmatpush3.msra.mxu0 %v10070_v43  ;;  %7502 = vmatpush3.msra.mxu1 %v1890_v48  ;;  %v1917_v48 = vsub.f32 %v10093_v52, %v1916_v22  ;;  %v1932_v55 = vand.u32 4294901760, %v1931_v8 }
 0x26d   : > { %7476 = vmatprep.subr.mxu0 %v12417_v2  ;;  %7503 = vmatprep.subr.mxu1 %v12417_v2 }
 0x26e   : > { %7477 = vmatpush3.msra.mxu0 %v10082_v58  ;;  %7504 = vmatpush3.msra.mxu1 %v1897_v62  ;;  %v1918_v62 = vand.u32 4294901760, %v1917_v48 }
 0x26f   : > { %7478 = vmatprep.subr.mxu0 %v12417_v2  ;;  %7505 = vmatprep.subr.mxu1 %v12417_v2 }
 0x270   : > { %7479 = vmatpush3.msra.mxu0 %v10095_v16  ;;  %7506 = vmatpush3.msra.mxu1 %v1904_v40  ;;  %v1925_v40 = vand.u32 4294901760, %v1924_v53 }
 0x271   : > { %7480 = vmatprep.mubr.msk.f32.mxu0 %vm8874_vm2, %v12417_v2  ;;  %7507 = vmatprep.subr.mxu1 %v12417_v2 }
 0x272   : > { %7518 = vmatprep.subr.mxu0 %v12417_v2  ;;  %7481 = vmatmul.mubr.f32.vlgmr.msra.gmra.mxu0 %v1816_v44 }
 0x273   : > { %7508 = vmatpush3.msra.mxu1 %v1911_v34  ;;  %7519 = vmatpush3.msra.mxu0 %v9917_v18 }
 0x274   : > { %7509 = vmatprep.subr.mxu1 %v12417_v2  ;;  %7520 = vmatprep.subr.mxu0 %v12417_v2 }
 0x275   : > { %7510 = vmatpush3.msra.mxu1 %v1918_v62  ;;  %7521 = vmatpush3.msra.mxu0 %v9925_v13  ;;  %v10219_v62 = vpop.permute.xlu1 %2445  ;;  %v2386_v13 = vsub.s32 3, %v8902_v1 }
 0x276   : > { %7511 = vmatprep.subr.mxu1 %v12417_v2  ;;  %7522 = vmatprep.subr.mxu0 %v12417_v2 }
 0x277   : > { %7512 = vmatpush3.msra.mxu1 %v1925_v40  ;;  %7523 = vmatpush3.msra.mxu0 %v9943_v27  ;;  %v2450_v40 = vpop.permute.xlu0 %2449 }
 0x278   : > { %7513 = vmatprep.subr.mxu1 %v12417_v2  ;;  %7524 = vmatprep.subr.mxu0 %v12417_v2 }
 0x279   : > { %7514 = vmatpush3.msra.mxu1 %v1932_v55  ;;  %7515 = vmatprep.mubr.msk.f32.mxu1 %vm8874_vm2, %v12417_v2  ;;  %v563_v44 = vpop.f32.mrf.mxu0  ;;  %v2442_v18 = vpop.permute.xlu1 %2441 }
 0x27a   : > { %7525 = vmatpush3.msra.mxu0 %v9949_v51  ;;  %7516 = vmatmul.mubr.f32.vlgmr.msra.gmra.mxu1 %v10042_v26  ;;  %v564_v53 = vadd.f32 %v563_v44, %v10033_v54  ;;  %v10253_v51 = vrot.slane %v9862_v15, %v2386_v13 }
 0x27b   : > { %7526 = vmatprep.subr.mxu0 %v12417_v2  ;;  %7553 = vmatprep.subr.mxu1 %v12417_v2  ;;  %v7132_v48 = vpop.f32.mrf.mxu0 }
 0x27c   : > { %7527 = vmatpush3.msra.mxu0 %v9959_v23  ;;  %7554 = vmatpush3.msra.mxu1 %v9900_v12  ;;  %v2467_v15 = vsub.f32 %v10253_v51, %v2450_v40 }
 0x27d   : > { %7528 = vmatprep.subr.mxu0 %v12417_v2  ;;  %7555 = vmatprep.subr.mxu1 %v12417_v2  ;;  %v2434_v23 = vpop.permute.xlu1 %2433 }
 0x27e   : > { %7529 = vmatpush3.msra.mxu0 %v9977_v24  ;;  %7556 = vmatpush3.msra.mxu1 %v9905_v35 }
 0x27f   : > { %7530 = vmatprep.subr.mxu0 %v12417_v2  ;;  %7557 = vmatprep.subr.mxu1 %v12417_v2 }
 0x280   : > { %7531 = vmatpush3.msra.mxu0 %v9988_v14  ;;  %7558 = vmatpush3.msra.mxu1 %v9919_v57 }
 0x281   : > { %7532 = vmatprep.subr.mxu0 %v12417_v2  ;;  %7559 = vmatprep.subr.mxu1 %v12417_v2 }
 0x282   : > { %7533 = vmatpush3.msra.mxu0 %v10008_v20  ;;  %7560 = vmatpush3.msra.mxu1 %v9927_v11 }
 0x283   : > { %7534 = vmatprep.subr.mxu0 %v12417_v2  ;;  %7561 = vmatprep.subr.mxu1 %v12417_v2  ;;  %v652_v54 = vpop.f32.mrf.mxu1 }
 0x284   : > { %7535 = vmatpush3.msra.mxu0 %v10022_v19  ;;  %7562 = vmatpush3.msra.mxu1 %v9936_v6  ;;  %v10181_v34 = vadd.f32 %v652_v54, %v564_v53 }
 0x285   : > { %7536 = vmatprep.subr.mxu0 %v12417_v2  ;;  %7563 = vmatprep.subr.mxu1 %v12417_v2  ;;  %v7167_v8 = vpop.f32.mrf.mxu1 }
 0x286   : > { %7537 = vmatpush3.msra.mxu0 %v10037_v47  ;;  %7564 = vmatpush3.msra.mxu1 %v9951_v29 }
 0x287   : > { %7538 = vmatprep.subr.mxu0 %v12417_v2  ;;  %7565 = vmatprep.subr.mxu1 %v12417_v2 }
 0x288   : > { %7539 = vmatpush3.msra.mxu0 %v10052_v60  ;;  %7566 = vmatpush3.msra.mxu1 %v9961_v25 }
 0x289   : > { %7540 = vmatprep.subr.mxu0 %v12417_v2  ;;  %7567 = vmatprep.subr.mxu1 %v12417_v2 }
 0x28a   : > { %7541 = vmatpush3.msra.mxu0 %v10064_v17  ;;  %7568 = vmatpush3.msra.mxu1 %v9981_v7 }
 0x28b   : > { %7542 = vmatprep.subr.mxu0 %v12417_v2  ;;  %7569 = vmatprep.subr.mxu1 %v12417_v2 }
 0x28c   : > { %7543 = vmatpush3.msra.mxu0 %v10080_v4  ;;  %7570 = vmatpush3.msra.mxu1 %v9990_v59 }
 0x28d   : > { %7544 = vmatprep.subr.mxu0 %v12417_v2  ;;  %7571 = vmatprep.subr.mxu1 %v12417_v2 }
 0x28e   : > { %7545 = vmatpush3.msra.mxu0 %v10093_v52  ;;  %7572 = vmatpush3.msra.mxu1 %v10010_v42 }
 0x28f   : > { %7546 = vmatprep.subr.mxu0 %v12417_v2  ;;  %7573 = vmatprep.subr.mxu1 %v12417_v2 }
 0x290   : > { %7547 = vmatpush3.msra.mxu0 %v10105_v50  ;;  %7574 = vmatpush3.msra.mxu1 %v10024_v45 }
 0x291   : > { %7548 = vmatprep.subr.mxu0 %v12417_v2  ;;  %7575 = vmatprep.subr.mxu1 %v12417_v2 }
 0x292   : > { %7549 = vmatpush3.msra.mxu0 %v10118_v61  ;;  %7550 = vmatprep.mubr.msk.f32.mxu0 %vm8874_vm2, %v12417_v2 }
 0x293   : > { %7576 = vmatpush3.msra.mxu1 %v10039_v28  ;;  %7551 = vmatmul.mubr.f32.vlgmr.msra.gmra.mxu0 %v10068_v49 }
 0x294   : > { %7577 = vmatprep.subr.mxu1 %v12417_v2  ;;  %7588 = vmatprep.subr.mxu0 %v12417_v2 }
 0x295   : > { %7578 = vmatpush3.msra.mxu1 %v10055_v3  ;;  %7589 = vmatpush3.msra.mxu0 %v1825_v33  ;;  %v2438_v33 = vpop.permute.xlu0 %2437 }
 0x296   : > { %7579 = vmatprep.subr.mxu1 %v12417_v2  ;;  %7590 = vmatprep.subr.mxu0 %v12417_v2  ;;  %v2464_v14 = vsub.f32 %v10253_v51, %v2438_v33 }
 0x297   : > { %7580 = vmatpush3.msra.mxu1 %v10070_v43  ;;  %7591 = vmatpush3.msra.mxu0 %v1832_v46 }
 0x298   : > { %7581 = vmatprep.subr.mxu1 %v12417_v2  ;;  %7592 = vmatprep.subr.mxu0 %v12417_v2 }
 0x299   : > { %7582 = vmatpush3.msra.mxu1 %v10082_v58  ;;  %7593 = vmatpush3.msra.mxu0 %v1839_v32  ;;  %v69_v32 = vunpack.c.l.b16 %v8930_v10  ;;  %v2466_v10 = vsub.f32 %v10253_v51, %v10219_v62 }
 0x29a   : > { %7583 = vmatprep.subr.mxu1 %v12417_v2  ;;  %7594 = vmatprep.subr.mxu0 %v12417_v2 }
 0x29b   : > { %7584 = vmatpush3.msra.mxu1 %v10095_v16  ;;  %7585 = vmatprep.mubr.msk.f32.mxu1 %vm8874_vm2, %v12417_v2  ;;  %vm70_vm4 = vcmp.ne.s32.totalorder %v69_v32, 0 }
 0x29c   : > { %7595 = vmatpush3.msra.mxu0 %v1846_v36  ;;  %7586 = vmatmul.mubr.f32.vlgmr.msra.gmra.mxu1 %v1814_v31  ;;  %v2465_v36 = vsub.f32 %v10253_v51, %v2442_v18 }
 0x29d   : > { %7596 = vmatprep.subr.mxu0 %v12417_v2  ;;  %7623 = vmatprep.subr.mxu1 %v12417_v2 }
 0x29e   : > { %7597 = vmatpush3.msra.mxu0 %v1853_v41  ;;  %7624 = vmatpush3.msra.mxu1 %v9900_v12  ;;  %v2481_v19 = vmax.f32 %v2465_v36, 0.0 }
 0x29f   : > { %7598 = vmatprep.subr.mxu0 %v12417_v2  ;;  %7625 = vmatprep.subr.mxu1 %v12417_v2  ;;  %v771_v27 = vpop.f32.mrf.mxu0 }
 0x2a0   : > { %7599 = vmatpush3.msra.mxu0 %v1860_v0  ;;  %7626 = vmatpush3.msra.mxu1 %v9905_v35  ;;  %v772_v46 = vadd.f32 %v771_v27, %v10181_v34  ;;  %v2430_v35 = vpop.permute.xlu0 %2429  ;;  %v2482_v0 = vmax.f32 %v2466_v10, 0.0 }
 0x2a1   : > { %7600 = vmatprep.subr.mxu0 %v12417_v2  ;;  %7627 = vmatprep.subr.mxu1 %v12417_v2  ;;  %v7202_v12 = vpop.f32.mrf.mxu0  ;;  %v2462_v60 = vsub.f32 %v10253_v51, %v2430_v35 }
 0x2a2   : > { %7601 = vmatpush3.msra.mxu0 %v1867_v56  ;;  %7628 = vmatpush3.msra.mxu1 %v9919_v57  ;;  %v2426_v57 = vpop.permute.xlu1 %2425  ;;  %v10308_v17 = vand.u32 4294901760, %v2482_v0 }
 0x2a3   : > { %7602 = vmatprep.subr.mxu0 %v12417_v2  ;;  %7629 = vmatprep.subr.mxu1 %v12417_v2 }
 0x2a4   : > { %7603 = vmatpush3.msra.mxu0 %v1874_v9  ;;  %7630 = vmatpush3.msra.mxu1 %v9927_v11  ;;  %v2483_v11 = vmax.f32 %v2467_v15, 0.0  ;;  %v2422_v24 = vpop.permute.xlu0 %2421  ;;  %v2463_v9 = vsub.f32 %v10253_v51, %v2434_v23  ;;  %v10330_v52 = vsub.f32 %v2482_v0, %v10308_v17 }
 0x2a5   : > { %7604 = vmatprep.subr.mxu0 %v12417_v2  ;;  %7631 = vmatprep.subr.mxu1 %v12417_v2  ;;  %v2460_v31 = vsub.f32 %v10253_v51, %v2422_v24 }
 0x2a6   : > { %7605 = vmatpush3.msra.mxu0 %v1881_v37  ;;  %7632 = vmatpush3.msra.mxu1 %v9936_v6  ;;  %v10283_v6 = vsel %vm70_vm4, 1.0, %v12417_v2  ;;  %v10294_v56 = vand.u32 4294901760, %v2483_v11  ;;  %v2418_v47 = vpop.permute.xlu1 %2417  ;;  %v12449_v37 = vand.u32 4294901760, %v10080_v4  ;;  %v2461_v4 = vsub.f32 %v10253_v51, %v2426_v57 }
 0x2a7   : > { %7606 = vmatprep.subr.mxu0 %v12417_v2  ;;  %7633 = vmatprep.subr.mxu1 %v12417_v2  ;;  %v2459_v53 = vsub.f32 %v10253_v51, %v2418_v47  ;;  %v2476_v48 = vmax.f32 %v2460_v31, 0.0  ;;  %v2587_v54 = vand.u32 4294901760, %v10330_v52 }
 0x2a8   : > { %7607 = vmatpush3.msra.mxu0 %v1888_v39  ;;  %7634 = vmatpush3.msra.mxu1 %v9951_v29  ;;  %v2414_v39 = vpop.permute.xlu0 %2413  ;;  %v10314_v49 = vsub.f32 %v2483_v11, %v10294_v56  ;;  %v2477_v44 = vmax.f32 %v2461_v4, 0.0 }
 0x2a9   : > { %7608 = vmatprep.subr.mxu0 %v12417_v2  ;;  %7635 = vmatprep.subr.mxu1 %v12417_v2  ;;  %v2475_v40 = vmax.f32 %v2459_v53, 0.0  ;;  %v2588_v32 = vsub.f32 %v10330_v52, %v2587_v54 }
 0x2aa   : > { %7609 = vmatpush3.msra.mxu0 %v1895_v5  ;;  %7636 = vmatpush3.msra.mxu1 %v9961_v25  ;;  %v858_v41 = vpop.f32.mrf.mxu1  ;;  %v10316_v5 = vand.u32 4294901760, %v2481_v19  ;;  %v10367_v62 = vand.u32 4294901760, %v2477_v44 }
 0x2ab   : > { %7610 = vmatprep.subr.mxu0 %v12417_v2  ;;  %7637 = vmatprep.subr.mxu1 %v12417_v2  ;;  %v859_v29 = vadd.f32 %v858_v41, %v772_v46  ;;  %v10396_v57 = vand.u32 4294901760, %v2475_v40 }
 0x2ac   : > { %7611 = vmatpush3.msra.mxu0 %v1902_v63  ;;  %7638 = vmatpush3.msra.mxu1 %v9981_v7  ;;  %v7237_v20 = vpop.f32.mrf.mxu1  ;;  %v2480_v7 = vmax.f32 %v2464_v14, 0.0  ;;  %v10338_v50 = vsub.f32 %v2481_v19, %v10316_v5  ;;  %v10394_v10 = vsub.f32 %v2477_v44, %v10367_v62 }
 0x2ad   : > { %7612 = vmatprep.subr.mxu0 %v12417_v2  ;;  %7639 = vmatprep.subr.mxu1 %v12417_v2  ;;  %v10299_v25 = vmul.f32 %v10283_v6, %v859_v29  ;;  %v2484_v20 = vrot.slane %v9207_v21, 3 }
 0x2ae   : > { %7613 = vmatpush3.msra.mxu0 %v12449_v37  ;;  %7640 = vmatpush3.msra.mxu1 %v9990_v59  ;;  %v2479_v59 = vmax.f32 %v2463_v9, 0.0  ;;  %v10324_v63 = vand.u32 4294901760, %v2480_v7  ;;  %v2594_v8 = vand.u32 4294901760, %v10338_v50 }
 0x2af   : > { %7614 = vmatprep.subr.mxu0 %v12417_v2  ;;  %7641 = vmatprep.subr.mxu1 %v12417_v2  ;;  %v10440_v53 = vand.u32 4294901760, %v2484_v20 }
 0x2b0   : > { %7615 = vmatpush3.msra.mxu0 %v1916_v22  ;;  %7642 = vmatpush3.msra.mxu1 %v10010_v42  ;;  %v2478_v42 = vmax.f32 %v2462_v60, 0.0  ;;  %v2410_v22 = vpop.permute.xlu1 %2409  ;;  %v10342_v55 = vand.u32 4294901760, %v2479_v59  ;;  %v10348_v61 = vsub.f32 %v2480_v7, %v10324_v63  ;;  %v2595_v35 = vsub.f32 %v10338_v50, %v2594_v8 }
 0x2b1   : > { %7616 = vmatprep.subr.mxu0 %v12417_v2  ;;  %7643 = vmatprep.subr.mxu1 %v12417_v2  ;;  %v2457_v18 = vsub.f32 %v10253_v51, %v2410_v22  ;;  %v2622_v7 = vand.u32 4294901760, %v10394_v10  ;;  %v10422_v60 = vsub.f32 %v2475_v40, %v10396_v57 }
 0x2b2   : > { %7617 = vmatpush3.msra.mxu0 %v1923_v38  ;;  %7644 = vmatpush3.msra.mxu1 %v10024_v45  ;;  %v2580_v45 = vand.u32 4294901760, %v10314_v49  ;;  %v2406_v38 = vpop.permute.xlu0 %2405  ;;  %v2601_v33 = vand.u32 4294901760, %v10348_v61  ;;  %v2596_v9 = vand.u32 4294901760, %v2595_v35 }
 0x2b3   : > { %7618 = vmatprep.subr.mxu0 %v12417_v2  ;;  %7645 = vmatprep.subr.mxu1 %v12417_v2  ;;  %v2456_v12 = vsub.f32 %v10253_v51, %v2406_v38  ;;  %v2473_v11 = vmax.f32 %v2457_v18, 0.0  ;;  %v2636_v40 = vand.u32 4294901760, %v10422_v60 }
 0x2b4   : > { %7619 = vmatpush3.msra.mxu0 %v1930_v30  ;;  %7620 = vmatprep.mubr.msk.f32.mxu0 %vm8874_vm2, %v12417_v2  ;;  %v10350_v30 = vand.u32 4294901760, %v2478_v42  ;;  %v2581_v34 = vsub.f32 %v10314_v49, %v2580_v45  ;;  %v2402_v13 = vpop.permute.xlu1 %2401 }
 0x2b5   : > { %7646 = vmatpush3.msra.mxu1 %v10039_v28  ;;  %7621 = vmatmul.mubr.f32.vlgmr.msra.gmra.mxu0 %v10042_v26  ;;  %v2458_v28 = vsub.f32 %v10253_v51, %v2414_v39  ;;  %v2455_v41 = vsub.f32 %v10253_v51, %v2402_v13  ;;  %v2472_v29 = vmax.f32 %v2456_v12, 0.0  ;;  %v10424_v39 = vand.u32 4294901760, %v2473_v11 }
 0x2b6   : > { %7647 = vmatprep.subr.mxu1 %v12417_v2  ;;  %7658 = vmatprep.subr.mxu0 %v12417_v2  ;;  %v10374_v27 = vsub.f32 %v2478_v42, %v10350_v30  ;;  %v2398_v23 = vpop.permute.xlu0 %2397 }
 0x2b7   : > { %7648 = vmatpush3.msra.mxu1 %v10055_v3  ;;  %7659 = vmatpush3.msra.mxu0 %v10294_v56  ;;  %v10365_v3 = vsub.f32 %v2479_v59, %v10342_v55  ;;  %v2474_v46 = vmax.f32 %v2458_v28, 0.0  ;;  %v2454_v19 = vsub.f32 %v10253_v51, %v2398_v23  ;;  %v2471_v4 = vmax.f32 %v2455_v41, 0.0 }
 0x2b8   : > { %7649 = vmatprep.subr.mxu1 %v12417_v2  ;;  %7660 = vmatprep.subr.mxu0 %v12417_v2  ;;  %v2615_v36 = vand.u32 4294901760, %v10374_v27  ;;  %v2394_v0 = vpop.permute.xlu1 %2393  ;;  %v10437_v44 = vand.u32 4294901760, %v2472_v29  ;;  %v10450_v18 = vsub.f32 %v2473_v11, %v10424_v39  ;;  %v10466_v11 = vsub.f32 %v2484_v20, %v10440_v53 }
 0x2b9   : > { %7650 = vmatpush3.msra.mxu1 %v10070_v43  ;;  %7661 = vmatpush3.msra.mxu0 %v10308_v17  ;;  %v10376_v43 = vand.u32 4294901760, %v2476_v48  ;;  %v2608_v15 = vand.u32 4294901760, %v10365_v3  ;;  %v10410_v14 = vand.u32 4294901760, %v2474_v46  ;;  %v2453_v42 = vsub.f32 %v10253_v51, %v2394_v0 }
 0x2ba   : > { %7651 = vmatprep.subr.mxu1 %v12417_v2  ;;  %7662 = vmatprep.subr.mxu0 %v12417_v2  ;;  %v2390_v47 = vpop.permute.xlu0 %2389  ;;  %v2616_v59 = vsub.f32 %v10374_v27, %v2615_v36 }
 0x2bb   : > { %7652 = vmatpush3.msra.mxu1 %v10082_v58  ;;  %7663 = vmatpush3.msra.mxu0 %v10316_v5  ;;  %v2582_v58 = vand.u32 4294901760, %v2581_v34  ;;  %v10405_v24 = vsub.f32 %v2476_v48, %v10376_v43  ;;  %v2609_v37 = vsub.f32 %v10365_v3, %v2608_v15  ;;  %v10435_v38 = vsub.f32 %v2474_v46, %v10410_v14 }
 0x2bc   : > { %7653 = vmatprep.subr.mxu1 %v12417_v2  ;;  %7664 = vmatprep.subr.mxu0 %v12417_v2  ;;  %v2470_v48 = vmax.f32 %v2454_v19, 0.0  ;;  %v2452_v28 = vsub.f32 %v10253_v51, %v2390_v47  ;;  %v2623_v34 = vsub.f32 %v10394_v10, %v2622_v7  ;;  %v10453_v46 = vand.u32 4294901760, %v2471_v4 }
 0x2bd   : > { %7654 = vmatpush3.msra.mxu1 %v10095_v16  ;;  %7655 = vmatprep.mubr.msk.f32.mxu1 %vm8874_vm2, %v12417_v2  ;;  %v2602_v16 = vsub.f32 %v10348_v61, %v2601_v33  ;;  %v2629_v22 = vand.u32 4294901760, %v10405_v24  ;;  %v2610_v13 = vand.u32 4294901760, %v2609_v37  ;;  %v2469_v51 = vmax.f32 %v2453_v42, 0.0 }
 0x2be   : > { %7665 = vmatpush3.msra.mxu0 %v10324_v63  ;;  %7656 = vmatmul.mubr.f32.vlgmr.msra.gmra.mxu1 %v10042_v26  ;;  %v2589_v26 = vand.u32 4294901760, %v2588_v32  ;;  %v2617_v12 = vand.u32 4294901760, %v2616_v59  ;;  %v2643_v35 = vand.u32 4294901760, %v10435_v38  ;;  %v2468_v41 = vmax.f32 %v2452_v28, 0.0 }
 0x2bf   : > { %7666 = vmatprep.subr.mxu0 %v12417_v2  ;;  %7693 = vmatprep.subr.mxu1 %v12417_v2  ;;  %v2603_v31 = vand.u32 4294901760, %v2602_v16  ;;  %v2630_v32 = vsub.f32 %v10405_v24, %v2629_v22  ;;  %v10468_v16 = vand.u32 4294901760, %v2470_v48  ;;  %v2624_v19 = vand.u32 4294901760, %v2623_v34 }
 0x2c0   : > { %7667 = vmatpush3.msra.mxu0 %v10342_v55  ;;  %7694 = vmatpush3.msra.mxu1 %v2582_v58  ;;  %v10462_v58 = vsub.f32 %v2472_v29, %v10437_v44  ;;  %v12394_v29 = vand.u32 4294901760, %v10450_v18  ;;  %v10478_v20 = vsub.f32 %v2471_v4, %v10453_v46  ;;  %v2644_v47 = vsub.f32 %v10435_v38, %v2643_v35 }
 0x2c1   : > { %7668 = vmatprep.subr.mxu0 %v12417_v2  ;;  %7695 = vmatprep.subr.mxu1 %v12417_v2  ;;  %v2631_v59 = vand.u32 4294901760, %v2630_v32  ;;  %v2569_v42 = vand.u32 4294901760, %v10466_v11  ;;  %v10491_v4 = vsub.f32 %v2470_v48, %v10468_v16 }
 0x2c2   : > { %7669 = vmatpush3.msra.mxu0 %v10350_v30  ;;  %7696 = vmatpush3.msra.mxu1 %v2589_v26  ;;  %v2637_v26 = vsub.f32 %v10422_v60, %v2636_v40  ;;  %v12393_v37 = vand.u32 4294901760, %v10462_v58  ;;  %v2651_v28 = vsub.f32 %v10450_v18, %v12394_v29  ;;  %v2645_v32 = vand.u32 4294901760, %v2644_v47 }
 0x2c3   : > { %7670 = vmatprep.subr.mxu0 %v12417_v2  ;;  %7697 = vmatprep.subr.mxu1 %v12417_v2 }
 0x2c4   : > { %7671 = vmatpush3.msra.mxu0 %v10367_v62  ;;  %7698 = vmatpush3.msra.mxu1 %v2596_v9  ;;  %v10480_v9 = vand.u32 4294901760, %v2469_v51  ;;  %v2638_v34 = vand.u32 4294901760, %v2637_v26  ;;  %v2658_v48 = vsub.f32 %v10462_v58, %v12393_v37  ;;  %v2652_v47 = vand.u32 4294901760, %v2651_v28 }
 0x2c5   : > { %7672 = vmatprep.subr.mxu0 %v12417_v2  ;;  %7699 = vmatprep.subr.mxu1 %v12417_v2 }
 0x2c6   : > { %7673 = vmatpush3.msra.mxu0 %v10376_v43  ;;  %7700 = vmatpush3.msra.mxu1 %v2603_v31  ;;  %v10493_v31 = vand.u32 4294901760, %v2468_v41 }
 0x2c7   : > { %7674 = vmatprep.subr.mxu0 %v12417_v2  ;;  %7701 = vmatprep.subr.mxu1 %v12417_v2  ;;  %v1062_v23 = vpop.f32.mrf.mxu0 }
 0x2c8   : > { %7675 = vmatpush3.msra.mxu0 %v10396_v57  ;;  %7702 = vmatpush3.msra.mxu1 %v2610_v13  ;;  %v2664_v13 = vand.u32 4294901760, %v10478_v20 }
 0x2c9   : > { %7676 = vmatprep.subr.mxu0 %v12417_v2  ;;  %7703 = vmatprep.subr.mxu1 %v12417_v2  ;;  %v7272_v0 = vpop.f32.mrf.mxu0 }
 0x2ca   : > { %7677 = vmatpush3.msra.mxu0 %v10410_v14  ;;  %7704 = vmatpush3.msra.mxu1 %v2617_v12  ;;  %v10503_v12 = vsub.f32 %v2469_v51, %v10480_v9  ;;  %v2570_v0 = vsub.f32 %v10466_v11, %v2569_v42  ;;  %v2671_v51 = vand.u32 4294901760, %v10491_v4  ;;  %v2665_v37 = vsub.f32 %v10478_v20, %v2664_v13 }
 0x2cb   : > { %7678 = vmatprep.subr.mxu0 %v12417_v2  ;;  %7705 = vmatprep.subr.mxu1 %v12417_v2 }
 0x2cc   : > { %7679 = vmatpush3.msra.mxu0 %v10424_v39  ;;  %7706 = vmatpush3.msra.mxu1 %v2624_v19  ;;  %v10516_v19 = vsub.f32 %v2468_v41, %v10493_v31  ;;  %v2678_v29 = vand.u32 4294901760, %v10503_v12  ;;  %v2571_v41 = vand.u32 4294901760, %v2570_v0  ;;  %v2672_v28 = vsub.f32 %v10491_v4, %v2671_v51 }
 0x2cd   : > { %7680 = vmatprep.subr.mxu0 %v12417_v2  ;;  %7707 = vmatprep.subr.mxu1 %v12417_v2 }
 0x2ce   : > { %7681 = vmatpush3.msra.mxu0 %v10437_v44  ;;  %7708 = vmatpush3.msra.mxu1 %v2631_v59 }
 0x2cf   : > { %7682 = vmatprep.subr.mxu0 %v12417_v2  ;;  %7709 = vmatprep.subr.mxu1 %v12417_v2 }
 0x2d0   : > { %7683 = vmatpush3.msra.mxu0 %v10453_v46  ;;  %7710 = vmatpush3.msra.mxu1 %v2638_v34  ;;  %v1213_v26 = vpop.f32.mrf.mxu1 }
 0x2d1   : > { %7684 = vmatprep.subr.mxu0 %v12417_v2  ;;  %7711 = vmatprep.subr.mxu1 %v12417_v2  ;;  %v10520_v59 = vadd.f32 %v1213_v26, %v1062_v23  ;;  %v2659_v23 = vand.u32 4294901760, %v2658_v48  ;;  %v2679_v26 = vsub.f32 %v10503_v12, %v2678_v29  ;;  %v2666_v48 = vand.u32 4294901760, %v2665_v37 }
 0x2d2   : > { %7685 = vmatpush3.msra.mxu0 %v10468_v16  ;;  %7712 = vmatpush3.msra.mxu1 %v2645_v32  ;;  %v7307_v34 = vpop.f32.mrf.mxu1  ;;  %v2685_v32 = vand.u32 4294901760, %v10516_v19 }
 0x2d3   : > { %7686 = vmatprep.subr.mxu0 %v12417_v2  ;;  %7713 = vmatprep.subr.mxu1 %v12417_v2  ;;  %v2680_v34 = vand.u32 4294901760, %v2679_v26 }
 0x2d4   : > { %7687 = vmatpush3.msra.mxu0 %v10480_v9  ;;  %7714 = vmatpush3.msra.mxu1 %v2652_v47  ;;  %v2686_v0 = vsub.f32 %v10516_v19, %v2685_v32  ;;  %v2673_v47 = vand.u32 4294901760, %v2672_v28 }
 0x2d5   : > { %7688 = vmatprep.subr.mxu0 %v12417_v2  ;;  %7715 = vmatprep.subr.mxu1 %v12417_v2 }
 0x2d6   : > { %7689 = vmatpush3.msra.mxu0 %v10493_v31  ;;  %7716 = vmatpush3.msra.mxu1 %v2659_v23  ;;  %v2687_v37 = vand.u32 4294901760, %v2686_v0 }
 0x2d7   : > { %7690 = vmatprep.mubr.msk.f32.mxu0 %vm8874_vm2, %v12417_v2  ;;  %7717 = vmatprep.subr.mxu1 %v12417_v2 }
 0x2d8   : > { %7728 = vmatprep.subr.mxu0 %v12417_v2  ;;  %7691 = vmatmul.mubr.f32.vlgmr.msra.gmra.mxu0 %v2571_v41 }
 0x2d9   : > { %7718 = vmatpush3.msra.mxu1 %v2666_v48  ;;  %7729 = vmatpush3.msra.mxu0 %v10314_v49  ;;  %v3205_v48 = vpop.permute.xlu1 %3204  ;;  %v3201_v49 = vpop.permute.xlu0 %3200 }
 0x2da   : > { %7719 = vmatprep.subr.mxu1 %v12417_v2  ;;  %7730 = vmatprep.subr.mxu0 %v12417_v2 }
 0x2db   : > { %7720 = vmatpush3.msra.mxu1 %v2673_v47  ;;  %7731 = vmatpush3.msra.mxu0 %v10330_v52 }
 0x2dc   : > { %7721 = vmatprep.subr.mxu1 %v12417_v2  ;;  %7732 = vmatprep.subr.mxu0 %v12417_v2 }
 0x2dd   : > { %7722 = vmatpush3.msra.mxu1 %v2680_v34  ;;  %7733 = vmatpush3.msra.mxu0 %v10338_v50  ;;  %v10624_v47 = vpop.permute.xlu1 %3196  ;;  %v3189_v50 = vpop.permute.xlu0 %3188 }
 0x2de   : > { %7723 = vmatprep.subr.mxu1 %v12417_v2  ;;  %7734 = vmatprep.subr.mxu0 %v12417_v2 }
 0x2df   : > { %7724 = vmatpush3.msra.mxu1 %v2687_v37  ;;  %7725 = vmatprep.mubr.msk.f32.mxu1 %vm8874_vm2, %v12417_v2 }
 0x2e0   : > { %7735 = vmatpush3.msra.mxu0 %v10348_v61  ;;  %7726 = vmatmul.mubr.f32.vlgmr.msra.gmra.mxu1 %v10440_v53 }
 0x2e1   : > { %7736 = vmatprep.subr.mxu0 %v12417_v2  ;;  %7763 = vmatprep.subr.mxu1 %v12417_v2  ;;  %v3193_v52 = vpop.permute.xlu1 %3192 }
 0x2e2   : > { %7737 = vmatpush3.msra.mxu0 %v10365_v3  ;;  %7764 = vmatpush3.msra.mxu1 %v10294_v56 }
 0x2e3   : > { %7738 = vmatprep.subr.mxu0 %v12417_v2  ;;  %7765 = vmatprep.subr.mxu1 %v12417_v2 }
 0x2e4   : > { %7739 = vmatpush3.msra.mxu0 %v10374_v27  ;;  %7766 = vmatpush3.msra.mxu1 %v10308_v17  ;;  %v12450_v27 = vand.u32 4294901760, %v10450_v18 }
 0x2e5   : > { %7740 = vmatprep.subr.mxu0 %v12417_v2  ;;  %7767 = vmatprep.subr.mxu1 %v12417_v2 }
 0x2e6   : > { %7741 = vmatpush3.msra.mxu0 %v10394_v10  ;;  %7768 = vmatpush3.msra.mxu1 %v10316_v5 }
 0x2e7   : > { %7742 = vmatprep.subr.mxu0 %v12417_v2  ;;  %7769 = vmatprep.subr.mxu1 %v12417_v2 }
 0x2e8   : > { %7743 = vmatpush3.msra.mxu0 %v10405_v24  ;;  %7770 = vmatpush3.msra.mxu1 %v10324_v63 }
 0x2e9   : > { %7744 = vmatprep.subr.mxu0 %v12417_v2  ;;  %7771 = vmatprep.subr.mxu1 %v12417_v2 }
 0x2ea   : > { %7745 = vmatpush3.msra.mxu0 %v10422_v60  ;;  %7772 = vmatpush3.msra.mxu1 %v10342_v55 }
 0x2eb   : > { %7746 = vmatprep.subr.mxu0 %v12417_v2  ;;  %7773 = vmatprep.subr.mxu1 %v12417_v2 }
 0x2ec   : > { %7747 = vmatpush3.msra.mxu0 %v10435_v38  ;;  %7774 = vmatpush3.msra.mxu1 %v10350_v30  ;;  %v1317_v23 = vpop.f32.mrf.mxu0 }
 0x2ed   : > { %7748 = vmatprep.subr.mxu0 %v12417_v2  ;;  %7775 = vmatprep.subr.mxu1 %v12417_v2  ;;  %v1318_v41 = vadd.f32 %v1317_v23, %v10520_v59 }
 0x2ee   : > { %7749 = vmatpush3.msra.mxu0 %v10450_v18  ;;  %7776 = vmatpush3.msra.mxu1 %v10367_v62  ;;  %v7342_v28 = vpop.f32.mrf.mxu0 }
 0x2ef   : > { %7750 = vmatprep.subr.mxu0 %v12417_v2  ;;  %7777 = vmatprep.subr.mxu1 %v12417_v2 }
 0x2f0   : > { %7751 = vmatpush3.msra.mxu0 %v10462_v58  ;;  %7778 = vmatpush3.msra.mxu1 %v10376_v43 }
 0x2f1   : > { %7752 = vmatprep.subr.mxu0 %v12417_v2  ;;  %7779 = vmatprep.subr.mxu1 %v12417_v2 }
 0x2f2   : > { %7753 = vmatpush3.msra.mxu0 %v10478_v20  ;;  %7780 = vmatpush3.msra.mxu1 %v10396_v57  ;;  %v1617_v20 = vrot.slane %v10283_v6, 1 }
 0x2f3   : > { %7754 = vmatprep.subr.mxu0 %v12417_v2  ;;  %7781 = vmatprep.subr.mxu1 %v12417_v2 }
 0x2f4   : > { %7755 = vmatpush3.msra.mxu0 %v10491_v4  ;;  %7782 = vmatpush3.msra.mxu1 %v10410_v14 }
 0x2f5   : > { %7756 = vmatprep.subr.mxu0 %v12417_v2  ;;  %7783 = vmatprep.subr.mxu1 %v12417_v2 }
 0x2f6   : > { %7757 = vmatpush3.msra.mxu0 %v10503_v12  ;;  %7784 = vmatpush3.msra.mxu1 %v10424_v39  ;;  %v1406_v59 = vpop.f32.mrf.mxu1 }
 0x2f7   : > { %7758 = vmatprep.subr.mxu0 %v12417_v2  ;;  %7785 = vmatprep.subr.mxu1 %v12417_v2  ;;  %v10607_v26 = vadd.f32 %v1406_v59, %v1318_v41 }
 0x2f8   : > { %7759 = vmatpush3.msra.mxu0 %v10516_v19  ;;  %7760 = vmatprep.mubr.msk.f32.mxu0 %vm8874_vm2, %v12417_v2  ;;  %v7377_v0 = vpop.f32.mrf.mxu1 }
 0x2f9   : > { %7786 = vmatpush3.msra.mxu1 %v10437_v44  ;;  %7761 = vmatmul.mubr.f32.vlgmr.msra.gmra.mxu0 %v10466_v11 }
 0x2fa   : > { %7787 = vmatprep.subr.mxu1 %v12417_v2  ;;  %7798 = vmatprep.subr.mxu0 %v12417_v2 }
 0x2fb   : > { %7788 = vmatpush3.msra.mxu1 %v10453_v46  ;;  %7799 = vmatpush3.msra.mxu0 %v2580_v45  ;;  %v3141_v45 = vsub.s32 4, %v8902_v1 }
 0x2fc   : > { %7789 = vmatprep.subr.mxu1 %v12417_v2  ;;  %7800 = vmatprep.subr.mxu0 %v12417_v2 }
 0x2fd   : > { %7790 = vmatpush3.msra.mxu1 %v10468_v16  ;;  %7801 = vmatpush3.msra.mxu0 %v2587_v54 }
 0x2fe   : > { %7791 = vmatprep.subr.mxu1 %v12417_v2  ;;  %7802 = vmatprep.subr.mxu0 %v12417_v2 }
 0x2ff   : > { %7792 = vmatpush3.msra.mxu1 %v10480_v9  ;;  %7803 = vmatpush3.msra.mxu0 %v2594_v8  ;;  %v3181_v8 = vpop.permute.xlu0 %3180 }
 0x300   : > { %7793 = vmatprep.subr.mxu1 %v12417_v2  ;;  %7804 = vmatprep.subr.mxu0 %v12417_v2 }
 0x301   : > { %7794 = vmatpush3.msra.mxu1 %v10493_v31  ;;  %7795 = vmatprep.mubr.msk.f32.mxu1 %vm8874_vm2, %v12417_v2 }
 0x302   : > { %7805 = vmatpush3.msra.mxu0 %v2601_v33  ;;  %7796 = vmatmul.mubr.f32.vlgmr.msra.gmra.mxu1 %v2569_v42 }
 0x303   : > { %7806 = vmatprep.subr.mxu0 %v12417_v2  ;;  %7833 = vmatprep.subr.mxu1 %v12417_v2 }
 0x304   : > { %7807 = vmatpush3.msra.mxu0 %v2608_v15  ;;  %7834 = vmatpush3.msra.mxu1 %v10294_v56  ;;  %v10657_v56 = vld [vmem:[%s8918_s23] sm:$0xff] }
 0x305   : > { %7808 = vmatprep.subr.mxu0 %v12417_v2  ;;  %7835 = vmatprep.subr.mxu1 %v12417_v2  ;;  %v10660_v61 = vrot.slane %v10657_v56, %v3141_v45  ;;  %v12453_v45 = vld [vmem:[#allocation11_spill] sm:$0xff] }
 0x306   : > { %7809 = vmatpush3.msra.mxu0 %v2615_v36  ;;  %7836 = vmatpush3.msra.mxu1 %v10308_v17  ;;  %v3185_v17 = vpop.permute.xlu1 %3184 }
 0x307   : > { %7810 = vmatprep.subr.mxu0 %v12417_v2  ;;  %7837 = vmatprep.subr.mxu1 %v12417_v2  ;;  %v3221_v54 = vsub.f32 %v10660_v61, %v3201_v49  ;;  %v3218_v24 = vsub.f32 %v10660_v61, %v3189_v50  ;;  %v3217_v18 = vsub.f32 %v10660_v61, %v3185_v17 }
 0x308   : > { %7811 = vmatpush3.msra.mxu0 %v2622_v7  ;;  %7838 = vmatpush3.msra.mxu1 %v10316_v5  ;;  %v3222_v5 = vsub.f32 %v10660_v61, %v3205_v48  ;;  %v12451_v7 = vand.u32 4294901760, %v10462_v58 }
 0x309   : > { %7812 = vmatprep.subr.mxu0 %v12417_v2  ;;  %7839 = vmatprep.subr.mxu1 %v12417_v2  ;;  %v3237_v10 = vmax.f32 %v3221_v54, 0.0 }
 0x30a   : > { %7813 = vmatpush3.msra.mxu0 %v2629_v22  ;;  %7840 = vmatpush3.msra.mxu1 %v10324_v63  ;;  %v3238_v3 = vmax.f32 %v3222_v5, 0.0  ;;  %v10683_v33 = vpop.permute.xlu1 %3176 }
 0x30b   : > { %7814 = vmatprep.subr.mxu0 %v12417_v2  ;;  %7841 = vmatprep.subr.mxu1 %v12417_v2  ;;  %v10703_v38 = vand.u32 4294901760, %v3237_v10 }
 0x30c   : > { %7815 = vmatpush3.msra.mxu0 %v2636_v40  ;;  %7842 = vmatpush3.msra.mxu1 %v10342_v55  ;;  %v3220_v55 = vsub.f32 %v10660_v61, %v10624_v47  ;;  %v10698_v60 = vand.u32 4294901760, %v3238_v3 }
 0x30d   : > { %7816 = vmatprep.subr.mxu0 %v12417_v2  ;;  %7843 = vmatprep.subr.mxu1 %v12417_v2 }
 0x30e   : > { %7817 = vmatpush3.msra.mxu0 %v2643_v35  ;;  %7844 = vmatpush3.msra.mxu1 %v10350_v30  ;;  %v3219_v30 = vsub.f32 %v10660_v61, %v3193_v52  ;;  %v3236_v22 = vmax.f32 %v3220_v55, 0.0  ;;  %v3216_v35 = vsub.f32 %v10660_v61, %v3181_v8  ;;  %v10709_v58 = vpop.permute.xlu1 %3168  ;;  %v10720_v42 = vsub.f32 %v3238_v3, %v10698_v60 }
 0x30f   : > { %7818 = vmatprep.subr.mxu0 %v12417_v2  ;;  %7845 = vmatprep.subr.mxu1 %v12417_v2  ;;  %v1525_v63 = vpop.f32.mrf.mxu0  ;;  %v3213_v52 = vsub.f32 %v10660_v61, %v10709_v58 }
 0x310   : > { %7819 = vmatpush3.msra.mxu0 %v12450_v27  ;;  %7846 = vmatpush3.msra.mxu1 %v10367_v62  ;;  %v1526_v15 = vadd.f32 %v1525_v63, %v10607_v26  ;;  %v3173_v62 = vpop.permute.xlu0 %3172  ;;  %v3235_v40 = vmax.f32 %v3219_v30, 0.0  ;;  %v3232_v23 = vmax.f32 %v3216_v35, 0.0  ;;  %v3335_v26 = vand.u32 4294901760, %v10720_v42 }
 0x311   : > { %7820 = vmatprep.subr.mxu0 %v12417_v2  ;;  %7847 = vmatprep.subr.mxu1 %v12417_v2  ;;  %v7412_v36 = vpop.f32.mrf.mxu0  ;;  %v3214_v12 = vsub.f32 %v10660_v61, %v3173_v62  ;;  %v3229_v30 = vmax.f32 %v3213_v52, 0.0 }
 0x312   : > { %7821 = vmatpush3.msra.mxu0 %v12451_v7  ;;  %7848 = vmatpush3.msra.mxu1 %v10376_v43  ;;  %v3234_v43 = vmax.f32 %v3218_v24, 0.0  ;;  %v10731_v4 = vand.u32 4294901760, %v3235_v40  ;;  %v3161_v19 = vpop.permute.xlu1 %3160  ;;  %v10772_v5 = vand.u32 4294901760, %v3232_v23  ;;  %v3336_v3 = vsub.f32 %v10720_v42, %v3335_v26 }
 0x313   : > { %7822 = vmatprep.subr.mxu0 %v12417_v2  ;;  %7849 = vmatprep.subr.mxu1 %v12417_v2  ;;  %v3211_v36 = vsub.f32 %v10660_v61, %v3161_v19 }
 0x314   : > { %7823 = vmatpush3.msra.mxu0 %v2664_v13  ;;  %7850 = vmatpush3.msra.mxu1 %v10396_v57  ;;  %v12452_v57 = vld [vmem:[#allocation13_spill] sm:$0xff]  ;;  %v10722_v13 = vand.u32 4294901760, %v3236_v22  ;;  %v10735_v37 = vand.u32 4294901760, %v3234_v43  ;;  %v3165_v41 = vpop.permute.xlu0 %3164  ;;  %v10757_v0 = vsub.f32 %v3235_v40, %v10731_v4  ;;  %v10803_v62 = vsub.f32 %v3232_v23, %v10772_v5 }
 0x315   : > { %7824 = vmatprep.subr.mxu0 %v12417_v2  ;;  %7851 = vmatprep.subr.mxu1 %v12417_v2  ;;  %v869_v11 = vrot.slane %v10299_v25, %v12452_v57  ;;  %v10729_v25 = vsub.f32 %v3237_v10, %v10703_v38  ;;  %v3212_v8 = vsub.f32 %v10660_v61, %v3165_v41 }
 0x316   : > { %7825 = vmatpush3.msra.mxu0 %v2671_v51  ;;  %7852 = vmatpush3.msra.mxu1 %v10410_v14  ;;  %v3233_v51 = vmax.f32 %v3217_v18, 0.0  ;;  %v10750_v48 = vsub.f32 %v3236_v22, %v10722_v13  ;;  %v10770_v17 = vsub.f32 %v3234_v43, %v10735_v37  ;;  %v3356_v27 = vand.u32 4294901760, %v10757_v0  ;;  %v3153_v24 = vpop.permute.xlu1 %3152 }
 0x317   : > { %7826 = vmatprep.subr.mxu0 %v12417_v2  ;;  %7853 = vmatprep.subr.mxu1 %v12417_v2  ;;  %v870_v28 = vsel %vm863_vm5, %v869_v11, 0.0  ;;  %v3228_v22 = vmax.f32 %v3212_v8, 0.0  ;;  %v3337_v18 = vand.u32 4294901760, %v3336_v3  ;;  %v3209_v23 = vsub.f32 %v10660_v61, %v3153_v24 }
 0x318   : > { %7827 = vmatpush3.msra.mxu0 %v2678_v29  ;;  %7854 = vmatpush3.msra.mxu1 %v10424_v39  ;;  %v1612_v14 = vpop.f32.mrf.mxu1  ;;  %v3215_v29 = vsub.f32 %v10660_v61, %v10683_v33  ;;  %v871_v50 = vadd.f32 %v12453_v45, %v870_v28  ;;  %v3157_v63 = vpop.permute.xlu0 %3156  ;;  %v3349_v55 = vand.u32 4294901760, %v10750_v48  ;;  %v3363_v7 = vand.u32 4294901760, %v10770_v17 }
 0x319   : > { %7828 = vmatprep.subr.mxu0 %v12417_v2  ;;  %7855 = vmatprep.subr.mxu1 %v12417_v2  ;;  %v1613_v34 = vadd.f32 %v1612_v14, %v1526_v15  ;;  %v3210_v43 = vsub.f32 %v10660_v61, %v3157_v63  ;;  %v10825_v14 = vand.u32 4294901760, %v3229_v30  ;;  %v3377_v41 = vand.u32 4294901760, %v10803_v62 }
 0x31a   : > { %7829 = vmatpush3.msra.mxu0 %v2685_v32  ;;  %7830 = vmatprep.mubr.msk.f32.mxu0 %vm8874_vm2, %v12417_v2  ;;  %v7447_v39 = vpop.f32.mrf.mxu1  ;;  %v3342_v32 = vand.u32 4294901760, %v10729_v25  ;;  %v3231_v49 = vmax.f32 %v3215_v29, 0.0  ;;  %v3350_v40 = vsub.f32 %v10750_v48, %v3349_v55 }
 0x31b   : > { %7856 = vmatpush3.msra.mxu1 %v10437_v44  ;;  %7831 = vmatmul.mubr.f32.vlgmr.msra.gmra.mxu0 %v10440_v53  ;;  %v1619_v59 = vmul.f32 %v1617_v20, %v1613_v34  ;;  %v10759_v44 = vand.u32 4294901760, %v3233_v51  ;;  %v3364_v34 = vsub.f32 %v10770_v17, %v3363_v7  ;;  %v10839_v39 = vand.u32 4294901760, %v3228_v22 }
 0x31c   : > { %7857 = vmatprep.subr.mxu1 %v12417_v2  ;;  %7868 = vmatprep.subr.mxu0 %v12417_v2  ;;  %v10796_v10 = vand.u32 4294901760, %v3231_v49  ;;  %v3149_v11 = vpop.permute.xlu0 %3148  ;;  %v3351_v28 = vand.u32 4294901760, %v3350_v40  ;;  %v10850_v45 = vsub.f32 %v3229_v30, %v10825_v14  ;;  %v3378_v63 = vsub.f32 %v10803_v62, %v3377_v41 }
 0x31d   : > { %7858 = vmatpush3.msra.mxu1 %v10453_v46  ;;  %7869 = vmatpush3.msra.mxu0 %v10698_v60  ;;  %v1626_v47 = vrot.slane %v1619_v59, %v12452_v57  ;;  %v3230_v46 = vmax.f32 %v3214_v12, 0.0  ;;  %v10792_v15 = vsub.f32 %v3233_v51, %v10759_v44  ;;  %v3239_v51 = vrot.slane %v9207_v21, 4  ;;  %v3145_v12 = vpop.permute.xlu1 %3144 }
 0x31e   : > { %7859 = vmatprep.subr.mxu1 %v12417_v2  ;;  %7870 = vmatprep.subr.mxu0 %v12417_v2  ;;  %v10823_v20 = vsub.f32 %v3231_v49, %v10796_v10  ;;  %v3226_v59 = vmax.f32 %v3210_v43, 0.0  ;;  %v3208_v19 = vsub.f32 %v10660_v61, %v3149_v11  ;;  %v3207_v8 = vsub.f32 %v10660_v61, %v3145_v12 }
 0x31f   : > { %7860 = vmatpush3.msra.mxu1 %v10468_v16  ;;  %7871 = vmatpush3.msra.mxu0 %v10703_v38  ;;  %v1627_v54 = vsel %vm1620_vm6, %v1626_v47, 0.0  ;;  %v3343_v16 = vsub.f32 %v10729_v25, %v3342_v32  ;;  %v3370_v35 = vand.u32 4294901760, %v10792_v15  ;;  %v3365_v30 = vand.u32 4294901760, %v3364_v34 }
 0x320   : > { %7861 = vmatprep.subr.mxu1 %v12417_v2  ;;  %7872 = vmatprep.subr.mxu0 %v12417_v2  ;;  %v10785_v33 = vadd.f32 %v1627_v54, %v871_v50  ;;  %v3384_v52 = vand.u32 4294901760, %v10823_v20  ;;  %v3225_v54 = vmax.f32 %v3209_v23, 0.0  ;;  %v3224_v61 = vmax.f32 %v3208_v19, 0.0 }
 0x321   : > { %7862 = vmatpush3.msra.mxu1 %v10480_v9  ;;  %7873 = vmatpush3.msra.mxu0 %v10722_v13  ;;  %v10808_v9 = vand.u32 4294901760, %v3230_v46  ;;  %v3344_v58 = vand.u32 4294901760, %v3343_v16  ;;  %v3371_v47 = vsub.f32 %v10792_v15, %v3370_v35  ;;  %v10865_v16 = vsub.f32 %v3228_v22, %v10839_v39 }
 0x322   : > { %7863 = vmatprep.subr.mxu1 %v12417_v2  ;;  %7874 = vmatprep.subr.mxu0 %v12417_v2  ;;  %v3385_v40 = vsub.f32 %v10823_v20, %v3384_v52  ;;  %v3379_v34 = vand.u32 4294901760, %v3378_v63  ;;  %v10895_v23 = vand.u32 4294901760, %v3224_v61 }
 0x323   : > { %7864 = vmatpush3.msra.mxu1 %v10493_v31  ;;  %7865 = vmatprep.mubr.msk.f32.mxu1 %vm8874_vm2, %v12417_v2  ;;  %v3357_v31 = vsub.f32 %v10757_v0, %v3356_v27  ;;  %v10837_v29 = vsub.f32 %v3230_v46, %v10808_v9  ;;  %v10855_v46 = vand.u32 4294901760, %v3239_v51  ;;  %v3372_v24 = vand.u32 4294901760, %v3371_v47 }
 0x324   : > { %7875 = vmatpush3.msra.mxu0 %v10731_v4  ;;  %7866 = vmatmul.mubr.f32.vlgmr.msra.gmra.mxu1 %v10440_v53  ;;  %v3227_v53 = vmax.f32 %v3211_v36, 0.0  ;;  %v10868_v36 = vand.u32 4294901760, %v3226_v59  ;;  %v3386_v19 = vand.u32 4294901760, %v3385_v40 }
 0x325   : > { %7876 = vmatprep.subr.mxu0 %v12417_v2  ;;  %7903 = vmatprep.subr.mxu1 %v12417_v2  ;;  %v3358_v49 = vand.u32 4294901760, %v3357_v31  ;;  %v12399_v3 = vand.u32 4294901760, %v10837_v29  ;;  %v10881_v43 = vsub.f32 %v3239_v51, %v10855_v46  ;;  %v10883_v31 = vand.u32 4294901760, %v3225_v54 }
 0x326   : > { %7877 = vmatpush3.msra.mxu0 %v10735_v37  ;;  %7904 = vmatpush3.msra.mxu1 %v3337_v18  ;;  %v10852_v50 = vand.u32 4294901760, %v3227_v53  ;;  %v12397_v18 = vand.u32 4294901760, %v10850_v45  ;;  %v10893_v51 = vsub.f32 %v3226_v59, %v10868_v36 }
 0x327   : > { %7878 = vmatprep.subr.mxu0 %v12417_v2  ;;  %7905 = vmatprep.subr.mxu1 %v12417_v2  ;;  %v3392_v11 = vsub.f32 %v10837_v29, %v12399_v3  ;;  %v3324_v47 = vand.u32 4294901760, %v10881_v43 }
 0x328   : > { %7879 = vmatpush3.msra.mxu0 %v10759_v44  ;;  %7906 = vmatpush3.msra.mxu1 %v3344_v58  ;;  %v10877_v22 = vsub.f32 %v3227_v53, %v10852_v50  ;;  %v3223_v58 = vmax.f32 %v3207_v8, 0.0  ;;  %v12395_v53 = vand.u32 4294901760, %v10865_v16  ;;  %v3399_v12 = vsub.f32 %v10850_v45, %v12397_v18 }
 0x329   : > { %7880 = vmatprep.subr.mxu0 %v12417_v2  ;;  %7907 = vmatprep.subr.mxu1 %v12417_v2  ;;  %v12398_v40 = vand.u32 4294901760, %v10893_v51 }
 0x32a   : > { %7881 = vmatpush3.msra.mxu0 %v10772_v5  ;;  %7908 = vmatpush3.msra.mxu1 %v3351_v28  ;;  %v12396_v28 = vand.u32 4294901760, %v10877_v22  ;;  %v10908_v8 = vand.u32 4294901760, %v3223_v58  ;;  %v3406_v63 = vsub.f32 %v10865_v16, %v12395_v53  ;;  %v3400_v53 = vand.u32 4294901760, %v3399_v12 }
 0x32b   : > { %7882 = vmatprep.subr.mxu0 %v12417_v2  ;;  %7909 = vmatprep.subr.mxu1 %v12417_v2  ;;  %v3420_v12 = vsub.f32 %v10893_v51, %v12398_v40 }
 0x32c   : > { %7883 = vmatpush3.msra.mxu0 %v10796_v10  ;;  %7910 = vmatpush3.msra.mxu1 %v3358_v49  ;;  %v10906_v49 = vsub.f32 %v3225_v54, %v10883_v31  ;;  %v10918_v54 = vsub.f32 %v3224_v61, %v10895_v23  ;;  %v10931_v61 = vsub.f32 %v3223_v58, %v10908_v8 }
 0x32d   : > { %7884 = vmatprep.subr.mxu0 %v12417_v2  ;;  %7911 = vmatprep.subr.mxu1 %v12417_v2 }
 0x32e   : > { %7885 = vmatpush3.msra.mxu0 %v10808_v9  ;;  %7912 = vmatpush3.msra.mxu1 %v3365_v30  ;;  %v3393_v30 = vand.u32 4294901760, %v3392_v11  ;;  %v3325_v11 = vsub.f32 %v10881_v43, %v3324_v47 }
 0x32f   : > { %7886 = vmatprep.subr.mxu0 %v12417_v2  ;;  %7913 = vmatprep.subr.mxu1 %v12417_v2 }
 0x330   : > { %7887 = vmatpush3.msra.mxu0 %v10825_v14  ;;  %7914 = vmatpush3.msra.mxu1 %v3372_v24 }
 0x331   : > { %7888 = vmatprep.subr.mxu0 %v12417_v2  ;;  %7915 = vmatprep.subr.mxu1 %v12417_v2 }
 0x332   : > { %7889 = vmatpush3.msra.mxu0 %v10839_v39  ;;  %7916 = vmatpush3.msra.mxu1 %v3379_v34  ;;  %v1818_v59 = vpop.f32.mrf.mxu0  ;;  %v3413_v34 = vsub.f32 %v10877_v22, %v12396_v28  ;;  %v3326_v28 = vand.u32 4294901760, %v3325_v11  ;;  %v3421_v11 = vand.u32 4294901760, %v3420_v12 }
 0x333   : > { %7890 = vmatprep.subr.mxu0 %v12417_v2  ;;  %7917 = vmatprep.subr.mxu1 %v12417_v2 }
 0x334   : > { %7891 = vmatpush3.msra.mxu0 %v10852_v50  ;;  %7918 = vmatpush3.msra.mxu1 %v3386_v19  ;;  %v7482_v24 = vpop.f32.mrf.mxu0  ;;  %v3426_v19 = vand.u32 4294901760, %v10906_v49  ;;  %v3414_v58 = vand.u32 4294901760, %v3413_v34 }
 0x335   : > { %7892 = vmatprep.subr.mxu0 %v12417_v2  ;;  %7919 = vmatprep.subr.mxu1 %v12417_v2  ;;  %v3407_v24 = vand.u32 4294901760, %v3406_v63  ;;  %v3440_v63 = vand.u32 4294901760, %v10931_v61 }
 0x336   : > { %7893 = vmatpush3.msra.mxu0 %v10868_v36  ;;  %7920 = vmatpush3.msra.mxu1 %v3393_v30  ;;  %v3433_v30 = vand.u32 4294901760, %v10918_v54 }
 0x337   : > { %7894 = vmatprep.subr.mxu0 %v12417_v2  ;;  %7921 = vmatprep.subr.mxu1 %v12417_v2 }
 0x338   : > { %7895 = vmatpush3.msra.mxu0 %v10883_v31  ;;  %7922 = vmatpush3.msra.mxu1 %v3400_v53  ;;  %v3427_v53 = vsub.f32 %v10906_v49, %v3426_v19  ;;  %v3434_v34 = vsub.f32 %v10918_v54, %v3433_v30 }
 0x339   : > { %7896 = vmatprep.subr.mxu0 %v12417_v2  ;;  %7923 = vmatprep.subr.mxu1 %v12417_v2 }
 0x33a   : > { %7897 = vmatpush3.msra.mxu0 %v10895_v23  ;;  %7924 = vmatpush3.msra.mxu1 %v3407_v24  ;;  %v1969_v18 = vpop.f32.mrf.mxu1 }
 0x33b   : > { %7898 = vmatprep.subr.mxu0 %v12417_v2  ;;  %7925 = vmatprep.subr.mxu1 %v12417_v2  ;;  %v1970_v40 = vadd.f32 %v1969_v18, %v1818_v59  ;;  %v3441_v18 = vsub.f32 %v10931_v61, %v3440_v63  ;;  %v3435_v59 = vand.u32 4294901760, %v3434_v34 }
 0x33c   : > { %7899 = vmatpush3.msra.mxu0 %v10908_v8  ;;  %7926 = vmatpush3.msra.mxu1 %v3414_v58  ;;  %v7517_v3 = vpop.f32.mrf.mxu1 }
 0x33d   : > { %7900 = vmatprep.mubr.msk.f32.mxu0 %vm8874_vm2, %v12417_v2  ;;  %7927 = vmatprep.subr.mxu1 %v12417_v2  ;;  %v3428_v3 = vand.u32 4294901760, %v3427_v53 }
 0x33e   : > { %7938 = vmatprep.subr.mxu0 %v12417_v2  ;;  %7901 = vmatmul.mubr.f32.vlgmr.msra.gmra.mxu0 %v3326_v28  ;;  %v3442_v28 = vand.u32 4294901760, %v3441_v18  ;;  %v3960_v18 = vpop.permute.xlu0 %3959 }
 0x33f   : > { %7928 = vmatpush3.msra.mxu1 %v3421_v11  ;;  %7939 = vmatpush3.msra.mxu0 %v10720_v42  ;;  %v3956_v11 = vpop.permute.xlu1 %3955 }
 0x340   : > { %7929 = vmatprep.subr.mxu1 %v12417_v2  ;;  %7940 = vmatprep.subr.mxu0 %v12417_v2 }
 0x341   : > { %7930 = vmatpush3.msra.mxu1 %v3428_v3  ;;  %7941 = vmatpush3.msra.mxu0 %v10729_v25  ;;  %v3896_v25 = vsub.s32 5, %v8902_v1  ;;  %v2372_v3 = vrot.slane %v10283_v6, 2 }
 0x342   : > { %7931 = vmatprep.subr.mxu1 %v12417_v2  ;;  %7942 = vmatprep.subr.mxu0 %v12417_v2 }
 0x343   : > { %7932 = vmatpush3.msra.mxu1 %v3435_v59  ;;  %7943 = vmatpush3.msra.mxu0 %v10750_v48  ;;  %v3952_v42 = vpop.permute.xlu1 %3951  ;;  %v11062_v48 = vrot.slane %v10657_v56, %v3896_v25 }
 0x344   : > { %7933 = vmatprep.subr.mxu1 %v12417_v2  ;;  %7944 = vmatprep.subr.mxu0 %v12417_v2 }
 0x345   : > { %7934 = vmatpush3.msra.mxu1 %v3442_v28  ;;  %7935 = vmatprep.mubr.msk.f32.mxu1 %vm8874_vm2, %v12417_v2  ;;  %v3977_v56 = vsub.f32 %v11062_v48, %v3960_v18 }
 0x346   : > { %7945 = vmatpush3.msra.mxu0 %v10757_v0  ;;  %7936 = vmatmul.mubr.f32.vlgmr.msra.gmra.mxu1 %v10855_v46 }
 0x347   : > { %7946 = vmatprep.subr.mxu0 %v12417_v2  ;;  %7973 = vmatprep.subr.mxu1 %v12417_v2 }
 0x348   : > { %7947 = vmatpush3.msra.mxu0 %v10770_v17  ;;  %7974 = vmatpush3.msra.mxu1 %v10698_v60  ;;  %v3993_v17 = vmax.f32 %v3977_v56, 0.0 }
 0x349   : > { %7948 = vmatprep.subr.mxu0 %v12417_v2  ;;  %7975 = vmatprep.subr.mxu1 %v12417_v2 }
 0x34a   : > { %7949 = vmatpush3.msra.mxu0 %v10792_v15  ;;  %7976 = vmatpush3.msra.mxu1 %v10703_v38  ;;  %v12456_v15 = vand.u32 4294901760, %v10865_v16 }
 0x34b   : > { %7950 = vmatprep.subr.mxu0 %v12417_v2  ;;  %7977 = vmatprep.subr.mxu1 %v12417_v2 }
 0x34c   : > { %7951 = vmatpush3.msra.mxu0 %v10803_v62  ;;  %7978 = vmatpush3.msra.mxu1 %v10722_v13 }
 0x34d   : > { %7952 = vmatprep.subr.mxu0 %v12417_v2  ;;  %7979 = vmatprep.subr.mxu1 %v12417_v2 }
 0x34e   : > { %7953 = vmatpush3.msra.mxu0 %v10823_v20  ;;  %7980 = vmatpush3.msra.mxu1 %v10731_v4  ;;  %v12457_v20 = vand.u32 4294901760, %v10877_v22 }
 0x34f   : > { %7954 = vmatprep.subr.mxu0 %v12417_v2  ;;  %7981 = vmatprep.subr.mxu1 %v12417_v2 }
 0x350   : > { %7955 = vmatpush3.msra.mxu0 %v10837_v29  ;;  %7982 = vmatpush3.msra.mxu1 %v10735_v37 }
 0x351   : > { %7956 = vmatprep.subr.mxu0 %v12417_v2  ;;  %7983 = vmatprep.subr.mxu1 %v12417_v2 }
 0x352   : > { %7957 = vmatpush3.msra.mxu0 %v10850_v45  ;;  %7984 = vmatpush3.msra.mxu1 %v10759_v44 }
 0x353   : > { %7958 = vmatprep.subr.mxu0 %v12417_v2  ;;  %7985 = vmatprep.subr.mxu1 %v12417_v2  ;;  %v2073_v24 = vpop.f32.mrf.mxu0 }
 0x354   : > { %7959 = vmatpush3.msra.mxu0 %v10865_v16  ;;  %7986 = vmatpush3.msra.mxu1 %v10772_v5  ;;  %v2074_v12 = vadd.f32 %v2073_v24, %v1970_v40 }
 0x355   : > { %7960 = vmatprep.subr.mxu0 %v12417_v2  ;;  %7987 = vmatprep.subr.mxu1 %v12417_v2  ;;  %v7552_v58 = vpop.f32.mrf.mxu0 }
 0x356   : > { %7961 = vmatpush3.msra.mxu0 %v10877_v22  ;;  %7988 = vmatpush3.msra.mxu1 %v10796_v10 }
 0x357   : > { %7962 = vmatprep.subr.mxu0 %v12417_v2  ;;  %7989 = vmatprep.subr.mxu1 %v12417_v2 }
 0x358   : > { %7963 = vmatpush3.msra.mxu0 %v10893_v51  ;;  %7990 = vmatpush3.msra.mxu1 %v10808_v9 }
 0x359   : > { %7964 = vmatprep.subr.mxu0 %v12417_v2  ;;  %7991 = vmatprep.subr.mxu1 %v12417_v2 }
 0x35a   : > { %7965 = vmatpush3.msra.mxu0 %v10906_v49  ;;  %7992 = vmatpush3.msra.mxu1 %v10825_v14 }
 0x35b   : > { %7966 = vmatprep.subr.mxu0 %v12417_v2  ;;  %7993 = vmatprep.subr.mxu1 %v12417_v2 }
 0x35c   : > { %7967 = vmatpush3.msra.mxu0 %v10918_v54  ;;  %7994 = vmatpush3.msra.mxu1 %v10839_v39  ;;  %v2162_v40 = vpop.f32.mrf.mxu1 }
 0x35d   : > { %7968 = vmatprep.subr.mxu0 %v12417_v2  ;;  %7995 = vmatprep.subr.mxu1 %v12417_v2  ;;  %v11019_v53 = vadd.f32 %v2162_v40, %v2074_v12 }
 0x35e   : > { %7969 = vmatpush3.msra.mxu0 %v10931_v61  ;;  %7970 = vmatprep.mubr.msk.f32.mxu0 %vm8874_vm2, %v12417_v2  ;;  %v7587_v34 = vpop.f32.mrf.mxu1 }
 0x35f   : > { %7996 = vmatpush3.msra.mxu1 %v10852_v50  ;;  %7971 = vmatmul.mubr.f32.vlgmr.msra.gmra.mxu0 %v10881_v43 }
 0x360   : > { %7997 = vmatprep.subr.mxu1 %v12417_v2  ;;  %8008 = vmatprep.subr.mxu0 %v12417_v2 }
 0x361   : > { %7998 = vmatpush3.msra.mxu1 %v10868_v36  ;;  %8009 = vmatpush3.msra.mxu0 %v3335_v26  ;;  %v3948_v26 = vpop.permute.xlu0 %3947 }
 0x362   : > { %7999 = vmatprep.subr.mxu1 %v12417_v2  ;;  %8010 = vmatprep.subr.mxu0 %v12417_v2  ;;  %v3974_v62 = vsub.f32 %v11062_v48, %v3948_v26 }
 0x363   : > { %8000 = vmatpush3.msra.mxu1 %v10883_v31  ;;  %8011 = vmatpush3.msra.mxu0 %v3342_v32  ;;  %v3944_v32 = vpop.permute.xlu1 %3943 }
 0x364   : > { %8001 = vmatprep.subr.mxu1 %v12417_v2  ;;  %8012 = vmatprep.subr.mxu0 %v12417_v2  ;;  %v3990_v16 = vmax.f32 %v3974_v62, 0.0 }
 0x365   : > { %8002 = vmatpush3.msra.mxu1 %v10895_v23  ;;  %8013 = vmatpush3.msra.mxu0 %v3349_v55  ;;  %v3975_v55 = vsub.f32 %v11062_v48, %v3952_v42 }
 0x366   : > { %8003 = vmatprep.subr.mxu1 %v12417_v2  ;;  %8014 = vmatprep.subr.mxu0 %v12417_v2  ;;  %v11132_v49 = vand.u32 4294901760, %v3990_v16 }
 0x367   : > { %8004 = vmatpush3.msra.mxu1 %v10908_v8  ;;  %8005 = vmatprep.mubr.msk.f32.mxu1 %vm8874_vm2, %v12417_v2  ;;  %v11083_v0 = vpop.permute.xlu1 %3935 }
 0x368   : > { %8015 = vmatpush3.msra.mxu0 %v3356_v27  ;;  %8006 = vmatmul.mubr.f32.vlgmr.msra.gmra.mxu1 %v3324_v47  ;;  %v3971_v59 = vsub.f32 %v11062_v48, %v11083_v0 }
 0x369   : > { %8016 = vmatprep.subr.mxu0 %v12417_v2  ;;  %8043 = vmatprep.subr.mxu1 %v12417_v2 }
 0x36a   : > { %8017 = vmatpush3.msra.mxu0 %v3363_v7  ;;  %8044 = vmatpush3.msra.mxu1 %v10698_v60  ;;  %v3940_v60 = vpop.permute.xlu0 %3939 }
 0x36b   : > { %8018 = vmatprep.subr.mxu0 %v12417_v2  ;;  %8045 = vmatprep.subr.mxu1 %v12417_v2  ;;  %v3972_v22 = vsub.f32 %v11062_v48, %v3940_v60 }
 0x36c   : > { %8019 = vmatpush3.msra.mxu0 %v3370_v35  ;;  %8046 = vmatpush3.msra.mxu1 %v10703_v38  ;;  %v12454_v38 = vand.u32 4294901760, %v10837_v29  ;;  %v3991_v29 = vmax.f32 %v3975_v55, 0.0 }
 0x36d   : > { %8020 = vmatprep.subr.mxu0 %v12417_v2  ;;  %8047 = vmatprep.subr.mxu1 %v12417_v2 }
 0x36e   : > { %8021 = vmatpush3.msra.mxu0 %v3377_v41  ;;  %8048 = vmatpush3.msra.mxu1 %v10722_v13  ;;  %v3976_v13 = vsub.f32 %v11062_v48, %v3956_v11  ;;  %v3932_v27 = vpop.permute.xlu0 %3931  ;;  %v11101_v41 = vand.u32 4294901760, %v3993_v17  ;;  %v3987_v11 = vmax.f32 %v3971_v59, 0.0 }
 0x36f   : > { %8022 = vmatprep.subr.mxu0 %v12417_v2  ;;  %8049 = vmatprep.subr.mxu1 %v12417_v2  ;;  %v3970_v28 = vsub.f32 %v11062_v48, %v3932_v27 }
 0x370   : > { %8023 = vmatpush3.msra.mxu0 %v3384_v52  ;;  %8050 = vmatpush3.msra.mxu1 %v10731_v4  ;;  %v12455_v4 = vand.u32 4294901760, %v10850_v45  ;;  %v3992_v35 = vmax.f32 %v3976_v13, 0.0  ;;  %v3928_v52 = vpop.permute.xlu1 %3927  ;;  %v12458_v45 = vand.u32 4294901760, %v10893_v51  ;;  %v11120_v51 = vsub.f32 %v3993_v17, %v11101_v41 }
 0x371   : > { %8024 = vmatprep.subr.mxu0 %v12417_v2  ;;  %8051 = vmatprep.subr.mxu1 %v12417_v2  ;;  %v3969_v61 = vsub.f32 %v11062_v48, %v3928_v52  ;;  %v3986_v42 = vmax.f32 %v3970_v28, 0.0 }
 0x372   : > { %8025 = vmatpush3.msra.mxu0 %v12454_v38  ;;  %8052 = vmatpush3.msra.mxu1 %v10735_v37  ;;  %v11114_v43 = vand.u32 4294901760, %v3992_v35  ;;  %v4090_v54 = vand.u32 4294901760, %v11120_v51  ;;  %v11180_v38 = vand.u32 4294901760, %v3987_v11 }
 0x373   : > { %8026 = vmatprep.subr.mxu0 %v12417_v2  ;;  %8053 = vmatprep.subr.mxu1 %v12417_v2  ;;  %v3985_v13 = vmax.f32 %v3969_v61, 0.0 }
 0x374   : > { %8027 = vmatpush3.msra.mxu0 %v12455_v4  ;;  %8054 = vmatpush3.msra.mxu1 %v10759_v44  ;;  %v11138_v12 = vsub.f32 %v3992_v35, %v11114_v43  ;;  %v3920_v58 = vpop.permute.xlu1 %3919  ;;  %v11210_v35 = vsub.f32 %v3987_v11, %v11180_v38 }
 0x375   : > { %8028 = vmatprep.subr.mxu0 %v12417_v2  ;;  %8055 = vmatprep.subr.mxu1 %v12417_v2  ;;  %v2281_v37 = vpop.f32.mrf.mxu0  ;;  %v3967_v0 = vsub.f32 %v11062_v48, %v3920_v58 }
 0x376   : > { %8029 = vmatpush3.msra.mxu0 %v12456_v15  ;;  %8056 = vmatpush3.msra.mxu1 %v10772_v5  ;;  %v2282_v7 = vadd.f32 %v2281_v37, %v11019_v53  ;;  %v3973_v5 = vsub.f32 %v11062_v48, %v3944_v32  ;;  %v4097_v26 = vand.u32 4294901760, %v11138_v12  ;;  %v4091_v32 = vsub.f32 %v11120_v51, %v4090_v54 }
 0x377   : > { %8030 = vmatprep.subr.mxu0 %v12417_v2  ;;  %8057 = vmatprep.subr.mxu1 %v12417_v2  ;;  %v7622_v44 = vpop.f32.mrf.mxu0  ;;  %v11192_v37 = vand.u32 4294901760, %v3986_v42  ;;  %v4132_v28 = vand.u32 4294901760, %v11210_v35 }
 0x378   : > { %8031 = vmatpush3.msra.mxu0 %v12457_v20  ;;  %8058 = vmatpush3.msra.mxu1 %v10796_v10  ;;  %v11112_v10 = vpop.permute.xlu0 %3923  ;;  %v3989_v47 = vmax.f32 %v3973_v5, 0.0  ;;  %v3912_v4 = vpop.permute.xlu1 %3911  ;;  %v11212_v20 = vand.u32 4294901760, %v3985_v13 }
 0x379   : > { %8032 = vmatprep.subr.mxu0 %v12417_v2  ;;  %8059 = vmatprep.subr.mxu1 %v12417_v2  ;;  %v3968_v25 = vsub.f32 %v11062_v48, %v11112_v10  ;;  %v11221_v52 = vsub.f32 %v3986_v42, %v11192_v37 }
 0x37a   : > { %8033 = vmatpush3.msra.mxu0 %v12458_v45  ;;  %8060 = vmatpush3.msra.mxu1 %v10808_v9  ;;  %v11122_v9 = vand.u32 4294901760, %v3991_v29  ;;  %v11148_v40 = vand.u32 4294901760, %v3989_v47  ;;  %v3965_v45 = vsub.f32 %v11062_v48, %v3912_v4 }
 0x37b   : > { %8034 = vmatprep.subr.mxu0 %v12417_v2  ;;  %8061 = vmatprep.subr.mxu1 %v12417_v2  ;;  %v3984_v27 = vmax.f32 %v3968_v25, 0.0  ;;  %v4139_v61 = vand.u32 4294901760, %v11221_v52 }
 0x37c   : > { %8035 = vmatpush3.msra.mxu0 %v3426_v19  ;;  %8062 = vmatpush3.msra.mxu1 %v10825_v14  ;;  %v3988_v19 = vmax.f32 %v3972_v22, 0.0  ;;  %v3916_v34 = vpop.permute.xlu0 %3915  ;;  %v3904_v10 = vpop.permute.xlu1 %3903 }
 0x37d   : > { %8036 = vmatprep.subr.mxu0 %v12417_v2  ;;  %8063 = vmatprep.subr.mxu1 %v12417_v2  ;;  %v3966_v15 = vsub.f32 %v11062_v48, %v3916_v34  ;;  %v3963_v34 = vsub.f32 %v11062_v48, %v3904_v10 }
 0x37e   : > { %8037 = vmatpush3.msra.mxu0 %v3433_v30  ;;  %8064 = vmatpush3.msra.mxu1 %v10839_v39  ;;  %v2368_v14 = vpop.f32.mrf.mxu1  ;;  %v11146_v30 = vsub.f32 %v3991_v29, %v11122_v9  ;;  %v11159_v18 = vand.u32 4294901760, %v3988_v19  ;;  %v3983_v29 = vmax.f32 %v3967_v0, 0.0 }
 0x37f   : > { %8038 = vmatprep.subr.mxu0 %v12417_v2  ;;  %8065 = vmatprep.subr.mxu1 %v12417_v2  ;;  %v2369_v24 = vadd.f32 %v2368_v14, %v2282_v7  ;;  %v3982_v22 = vmax.f32 %v3966_v15, 0.0 }
 0x380   : > { %8039 = vmatpush3.msra.mxu0 %v3440_v63  ;;  %8040 = vmatprep.mubr.msk.f32.mxu0 %vm8874_vm2, %v12417_v2  ;;  %v7657_v39 = vpop.f32.mrf.mxu1  ;;  %v11157_v63 = vsub.f32 %v3990_v16, %v11132_v49  ;;  %v4104_v60 = vand.u32 4294901760, %v11146_v30  ;;  %v11190_v55 = vsub.f32 %v3988_v19, %v11159_v18  ;;  %v3908_v7 = vpop.permute.xlu0 %3907  ;;  %v11226_v16 = vand.u32 4294901760, %v3984_v27 }
 0x381   : > { %8066 = vmatpush3.msra.mxu1 %v10852_v50  ;;  %8041 = vmatmul.mubr.f32.vlgmr.msra.gmra.mxu0 %v10855_v46  ;;  %v2374_v53 = vmul.f32 %v2372_v3, %v2369_v24  ;;  %v3964_v3 = vsub.f32 %v11062_v48, %v3908_v7  ;;  %v11238_v24 = vsub.f32 %v3985_v13, %v11212_v20  ;;  %v11240_v58 = vand.u32 4294901760, %v3983_v29 }
 0x382   : > { %8067 = vmatprep.subr.mxu1 %v12417_v2  ;;  %8078 = vmatprep.subr.mxu0 %v12417_v2  ;;  %v4105_v62 = vsub.f32 %v11146_v30, %v4104_v60  ;;  %v4125_v5 = vand.u32 4294901760, %v11190_v55  ;;  %v11251_v42 = vsub.f32 %v3984_v27, %v11226_v16  ;;  %v4133_v13 = vsub.f32 %v11210_v35, %v4132_v28 }
 0x383   : > { %8068 = vmatpush3.msra.mxu1 %v10868_v36  ;;  %8079 = vmatpush3.msra.mxu0 %v11101_v41  ;;  %v2381_v50 = vrot.slane %v2374_v53, %v12452_v57  ;;  %v11174_v36 = vsub.f32 %v3989_v47, %v11148_v40  ;;  %v3994_v47 = vrot.slane %v9207_v21, 5  ;;  %v3981_v53 = vmax.f32 %v3965_v45, 0.0 }
 0x384   : > { %8069 = vmatprep.subr.mxu1 %v12417_v2  ;;  %8080 = vmatprep.subr.mxu0 %v12417_v2  ;;  %v4106_v59 = vand.u32 4294901760, %v4105_v62  ;;  %v3900_v14 = vpop.permute.xlu0 %3899  ;;  %v4126_v39 = vsub.f32 %v11190_v55, %v4125_v5  ;;  %v4146_v0 = vand.u32 4294901760, %v11238_v24  ;;  %v11266_v4 = vsub.f32 %v3983_v29, %v11240_v58 }
 0x385   : > { %8070 = vmatpush3.msra.mxu1 %v10883_v31  ;;  %8081 = vmatpush3.msra.mxu0 %v11114_v43  ;;  %v2382_v56 = vsel %vm2375_vm7, %v2381_v50, 0.0  ;;  %v4111_v31 = vand.u32 4294901760, %v11157_v63  ;;  %v4118_v44 = vand.u32 4294901760, %v11174_v36  ;;  %v11253_v50 = vand.u32 4294901760, %v3982_v22 }
 0x386   : > { %8071 = vmatprep.subr.mxu1 %v12417_v2  ;;  %8082 = vmatprep.subr.mxu0 %v12417_v2  ;;  %v11186_v17 = vadd.f32 %v2382_v56, %v10785_v33  ;;  %v4098_v33 = vsub.f32 %v11138_v12, %v4097_v26  ;;  %v11256_v25 = vand.u32 4294901760, %v3994_v47  ;;  %v3962_v56 = vsub.f32 %v11062_v48, %v3900_v14 }
 0x387   : > { %8072 = vmatpush3.msra.mxu1 %v10895_v23  ;;  %8083 = vmatpush3.msra.mxu0 %v11122_v9  ;;  %v4092_v23 = vand.u32 4294901760, %v4091_v32  ;;  %v4119_v19 = vsub.f32 %v11174_v36, %v4118_v44  ;;  %v3980_v32 = vmax.f32 %v3964_v3, 0.0  ;;  %v11269_v15 = vand.u32 4294901760, %v3981_v53 }
 0x388   : > { %8073 = vmatprep.subr.mxu1 %v12417_v2  ;;  %8084 = vmatprep.subr.mxu0 %v12417_v2  ;;  %v3979_v48 = vmax.f32 %v3963_v34, 0.0  ;;  %v4127_v7 = vand.u32 4294901760, %v4126_v39  ;;  %v12403_v62 = vand.u32 4294901760, %v11251_v42  ;;  %v11282_v29 = vsub.f32 %v3994_v47, %v11256_v25 }
 0x389   : > { %8074 = vmatpush3.msra.mxu1 %v10908_v8  ;;  %8075 = vmatprep.mubr.msk.f32.mxu1 %vm8874_vm2, %v12417_v2  ;;  %v4112_v8 = vsub.f32 %v11157_v63, %v4111_v31  ;;  %v4120_v27 = vand.u32 4294901760, %v4119_v19  ;;  %v3978_v45 = vmax.f32 %v3962_v56, 0.0  ;;  %v4147_v10 = vsub.f32 %v11238_v24, %v4146_v0 }
 0x38a   : > { %8085 = vmatpush3.msra.mxu0 %v11132_v49  ;;  %8076 = vmatmul.mubr.f32.vlgmr.msra.gmra.mxu1 %v10855_v46  ;;  %v4099_v46 = vand.u32 4294901760, %v4098_v33  ;;  %v4140_v33 = vsub.f32 %v11221_v52, %v4139_v61  ;;  %v11294_v47 = vsub.f32 %v3981_v53, %v11269_v15  ;;  %v11296_v3 = vand.u32 4294901760, %v3979_v48 }
 0x38b   : > { %8086 = vmatprep.subr.mxu0 %v12417_v2  ;;  %8113 = vmatprep.subr.mxu1 %v12417_v2  ;;  %v4113_v11 = vand.u32 4294901760, %v4112_v8  ;;  %v11284_v8 = vand.u32 4294901760, %v3980_v32  ;;  %v4079_v39 = vand.u32 4294901760, %v11282_v29 }
 0x38c   : > { %8087 = vmatpush3.msra.mxu0 %v11148_v40  ;;  %8114 = vmatpush3.msra.mxu1 %v4092_v23  ;;  %v11278_v23 = vsub.f32 %v3982_v22, %v11253_v50  ;;  %v12401_v22 = vand.u32 4294901760, %v11266_v4  ;;  %v4141_v19 = vand.u32 4294901760, %v4140_v33 }
 0x38d   : > { %8088 = vmatprep.subr.mxu0 %v12417_v2  ;;  %8115 = vmatprep.subr.mxu1 %v12417_v2  ;;  %v11307_v34 = vsub.f32 %v3980_v32, %v11284_v8  ;;  %v11319_v32 = vsub.f32 %v3979_v48, %v11296_v3 }
 0x38e   : > { %8089 = vmatpush3.msra.mxu0 %v11159_v18  ;;  %8116 = vmatpush3.msra.mxu1 %v4099_v46  ;;  %v4134_v46 = vand.u32 4294901760, %v4133_v13  ;;  %v12400_v14 = vand.u32 4294901760, %v11278_v23  ;;  %v4161_v56 = vsub.f32 %v11266_v4, %v12401_v22  ;;  %v4148_v13 = vand.u32 4294901760, %v4147_v10 }
 0x38f   : > { %8090 = vmatprep.subr.mxu0 %v12417_v2  ;;  %8117 = vmatprep.subr.mxu1 %v12417_v2  ;;  %v4080_v10 = vsub.f32 %v11282_v29, %v4079_v39 }
 0x390   : > { %8091 = vmatpush3.msra.mxu0 %v11180_v38  ;;  %8118 = vmatpush3.msra.mxu1 %v4106_v59  ;;  %v4154_v59 = vsub.f32 %v11251_v42, %v12403_v62  ;;  %v4168_v33 = vsub.f32 %v11278_v23, %v12400_v14 }
 0x391   : > { %8092 = vmatprep.subr.mxu0 %v12417_v2  ;;  %8119 = vmatprep.subr.mxu1 %v12417_v2  ;;  %v4081_v14 = vand.u32 4294901760, %v4080_v10 }
 0x392   : > { %8093 = vmatpush3.msra.mxu0 %v11192_v37  ;;  %8120 = vmatpush3.msra.mxu1 %v4113_v11  ;;  %v11309_v11 = vand.u32 4294901760, %v3978_v45 }
 0x393   : > { %8094 = vmatprep.subr.mxu0 %v12417_v2  ;;  %8121 = vmatprep.subr.mxu1 %v12417_v2 }
 0x394   : > { %8095 = vmatpush3.msra.mxu0 %v11212_v20  ;;  %8122 = vmatpush3.msra.mxu1 %v4120_v27  ;;  %v11332_v48 = vsub.f32 %v3978_v45, %v11309_v11  ;;  %v4169_v45 = vand.u32 4294901760, %v4168_v33 }
 0x395   : > { %8096 = vmatprep.subr.mxu0 %v12417_v2  ;;  %8123 = vmatprep.subr.mxu1 %v12417_v2 }
 0x396   : > { %8097 = vmatpush3.msra.mxu0 %v11226_v16  ;;  %8124 = vmatpush3.msra.mxu1 %v4127_v7  ;;  %v12402_v7 = vand.u32 4294901760, %v11294_v47 }
 0x397   : > { %8098 = vmatprep.subr.mxu0 %v12417_v2  ;;  %8125 = vmatprep.subr.mxu1 %v12417_v2 }
 0x398   : > { %8099 = vmatpush3.msra.mxu0 %v11240_v58  ;;  %8126 = vmatpush3.msra.mxu1 %v4134_v46  ;;  %v2573_v53 = vpop.f32.mrf.mxu0  ;;  %v4155_v46 = vand.u32 4294901760, %v4154_v59  ;;  %v4175_v59 = vsub.f32 %v11294_v47, %v12402_v7 }
 0x399   : > { %8100 = vmatprep.subr.mxu0 %v12417_v2  ;;  %8127 = vmatprep.subr.mxu1 %v12417_v2 }
 0x39a   : > { %8101 = vmatpush3.msra.mxu0 %v11253_v50  ;;  %8128 = vmatpush3.msra.mxu1 %v4141_v19  ;;  %v7692_v27 = vpop.f32.mrf.mxu0  ;;  %v4181_v19 = vand.u32 4294901760, %v11307_v34  ;;  %v4176_v10 = vand.u32 4294901760, %v4175_v59 }
 0x39b   : > { %8102 = vmatprep.subr.mxu0 %v12417_v2  ;;  %8129 = vmatprep.subr.mxu1 %v12417_v2  ;;  %v4162_v27 = vand.u32 4294901760, %v4161_v56 }
 0x39c   : > { %8103 = vmatpush3.msra.mxu0 %v11269_v15  ;;  %8130 = vmatpush3.msra.mxu1 %v4148_v13  ;;  %v4188_v13 = vand.u32 4294901760, %v11319_v32  ;;  %v4182_v56 = vsub.f32 %v11307_v34, %v4181_v19 }
 0x39d   : > { %8104 = vmatprep.subr.mxu0 %v12417_v2  ;;  %8131 = vmatprep.subr.mxu1 %v12417_v2 }
 0x39e   : > { %8105 = vmatpush3.msra.mxu0 %v11284_v8  ;;  %8132 = vmatpush3.msra.mxu1 %v4155_v46  ;;  %v4195_v46 = vand.u32 4294901760, %v11332_v48  ;;  %v4189_v33 = vsub.f32 %v11319_v32, %v4188_v13 }
 0x39f   : > { %8106 = vmatprep.subr.mxu0 %v12417_v2  ;;  %8133 = vmatprep.subr.mxu1 %v12417_v2 }
 0x3a0   : > { %8107 = vmatpush3.msra.mxu0 %v11296_v3  ;;  %8134 = vmatpush3.msra.mxu1 %v4162_v27  ;;  %v2724_v22 = vpop.f32.mrf.mxu1 }
 0x3a1   : > { %8108 = vmatprep.subr.mxu0 %v12417_v2  ;;  %8135 = vmatprep.subr.mxu1 %v12417_v2  ;;  %v2725_v7 = vadd.f32 %v2724_v22, %v2573_v53  ;;  %v4196_v22 = vsub.f32 %v11332_v48, %v4195_v46  ;;  %v4190_v53 = vand.u32 4294901760, %v4189_v33  ;;  %v4715_v33 = vpop.permute.xlu1 %4714 }
 0x3a2   : > { %8109 = vmatpush3.msra.mxu0 %v11309_v11  ;;  %8136 = vmatpush3.msra.mxu1 %v4169_v45  ;;  %v7727_v62 = vpop.f32.mrf.mxu1 }
 0x3a3   : > { %8110 = vmatprep.mubr.msk.f32.mxu0 %vm8874_vm2, %v12417_v2  ;;  %8137 = vmatprep.subr.mxu1 %v12417_v2  ;;  %v4183_v62 = vand.u32 4294901760, %v4182_v56 }
 0x3a4   : > { %8148 = vmatprep.subr.mxu0 %v12417_v2  ;;  %8111 = vmatmul.mubr.f32.vlgmr.msra.gmra.mxu0 %v4081_v14  ;;  %v4197_v14 = vand.u32 4294901760, %v4196_v22 }
 0x3a5   : > { %8138 = vmatpush3.msra.mxu1 %v4176_v10  ;;  %8149 = vmatpush3.msra.mxu0 %v11120_v51  ;;  %v11437_v22 = vpop.permute.xlu1 %4706  ;;  %v4711_v51 = vpop.permute.xlu0 %4710 }
 0x3a6   : > { %8139 = vmatprep.subr.mxu1 %v12417_v2  ;;  %8150 = vmatprep.subr.mxu0 %v12417_v2 }
 0x3a7   : > { %8140 = vmatpush3.msra.mxu1 %v4183_v62  ;;  %8151 = vmatpush3.msra.mxu0 %v11138_v12 }
 0x3a8   : > { %8141 = vmatprep.subr.mxu1 %v12417_v2  ;;  %8152 = vmatprep.subr.mxu0 %v12417_v2 }
 0x3a9   : > { %8142 = vmatpush3.msra.mxu1 %v4190_v53  ;;  %8153 = vmatpush3.msra.mxu0 %v11146_v30  ;;  %v4703_v12 = vpop.permute.xlu1 %4702  ;;  %v4699_v30 = vpop.permute.xlu0 %4698 }
 0x3aa   : > { %8143 = vmatprep.subr.mxu1 %v12417_v2  ;;  %8154 = vmatprep.subr.mxu0 %v12417_v2 }
 0x3ab   : > { %8144 = vmatpush3.msra.mxu1 %v4197_v14  ;;  %8145 = vmatprep.mubr.msk.f32.mxu1 %vm8874_vm2, %v12417_v2 }
 0x3ac   : > { %8155 = vmatpush3.msra.mxu0 %v11157_v63  ;;  %8146 = vmatmul.mubr.f32.vlgmr.msra.gmra.mxu1 %v11256_v25 }
 0x3ad   : > { %8156 = vmatprep.subr.mxu0 %v12417_v2  ;;  %8183 = vmatprep.subr.mxu1 %v12417_v2 }
 0x3ae   : > { %8157 = vmatpush3.msra.mxu0 %v11174_v36  ;;  %8184 = vmatpush3.msra.mxu1 %v11101_v41 }
 0x3af   : > { %8158 = vmatprep.subr.mxu0 %v12417_v2  ;;  %8185 = vmatprep.subr.mxu1 %v12417_v2 }
 0x3b0   : > { %8159 = vmatpush3.msra.mxu0 %v11190_v55  ;;  %8186 = vmatpush3.msra.mxu1 %v11114_v43 }
 0x3b1   : > { %8160 = vmatprep.subr.mxu0 %v12417_v2  ;;  %8187 = vmatprep.subr.mxu1 %v12417_v2 }
 0x3b2   : > { %8161 = vmatpush3.msra.mxu0 %v11210_v35  ;;  %8188 = vmatpush3.msra.mxu1 %v11122_v9 }
 0x3b3   : > { %8162 = vmatprep.subr.mxu0 %v12417_v2  ;;  %8189 = vmatprep.subr.mxu1 %v12417_v2 }
 0x3b4   : > { %8163 = vmatpush3.msra.mxu0 %v11221_v52  ;;  %8190 = vmatpush3.msra.mxu1 %v11132_v49 }
 0x3b5   : > { %8164 = vmatprep.subr.mxu0 %v12417_v2  ;;  %8191 = vmatprep.subr.mxu1 %v12417_v2 }
 0x3b6   : > { %8165 = vmatpush3.msra.mxu0 %v11238_v24  ;;  %8192 = vmatpush3.msra.mxu1 %v11148_v40 }
 0x3b7   : > { %8166 = vmatprep.subr.mxu0 %v12417_v2  ;;  %8193 = vmatprep.subr.mxu1 %v12417_v2 }
 0x3b8   : > { %8167 = vmatpush3.msra.mxu0 %v11251_v42  ;;  %8194 = vmatpush3.msra.mxu1 %v11159_v18 }
 0x3b9   : > { %8168 = vmatprep.subr.mxu0 %v12417_v2  ;;  %8195 = vmatprep.subr.mxu1 %v12417_v2  ;;  %v2828_v27 = vpop.f32.mrf.mxu0 }
 0x3ba   : > { %8169 = vmatpush3.msra.mxu0 %v11266_v4  ;;  %8196 = vmatpush3.msra.mxu1 %v11180_v38  ;;  %v2829_v59 = vadd.f32 %v2828_v27, %v2725_v7 }
 0x3bb   : > { %8170 = vmatprep.subr.mxu0 %v12417_v2  ;;  %8197 = vmatprep.subr.mxu1 %v12417_v2  ;;  %v7762_v45 = vpop.f32.mrf.mxu0 }
 0x3bc   : > { %8171 = vmatpush3.msra.mxu0 %v11278_v23  ;;  %8198 = vmatpush3.msra.mxu1 %v11192_v37 }
 0x3bd   : > { %8172 = vmatprep.subr.mxu0 %v12417_v2  ;;  %8199 = vmatprep.subr.mxu1 %v12417_v2 }
 0x3be   : > { %8173 = vmatpush3.msra.mxu0 %v11294_v47  ;;  %8200 = vmatpush3.msra.mxu1 %v11212_v20 }
 0x3bf   : > { %8174 = vmatprep.subr.mxu0 %v12417_v2  ;;  %8201 = vmatprep.subr.mxu1 %v12417_v2 }
 0x3c0   : > { %8175 = vmatpush3.msra.mxu0 %v11307_v34  ;;  %8202 = vmatpush3.msra.mxu1 %v11226_v16 }
 0x3c1   : > { %8176 = vmatprep.subr.mxu0 %v12417_v2  ;;  %8203 = vmatprep.subr.mxu1 %v12417_v2 }
 0x3c2   : > { %8177 = vmatpush3.msra.mxu0 %v11319_v32  ;;  %8204 = vmatpush3.msra.mxu1 %v11240_v58  ;;  %v2917_v7 = vpop.f32.mrf.mxu1 }
 0x3c3   : > { %8178 = vmatprep.subr.mxu0 %v12417_v2  ;;  %8205 = vmatprep.subr.mxu1 %v12417_v2  ;;  %v11420_v56 = vadd.f32 %v2917_v7, %v2829_v59 }
 0x3c4   : > { %8179 = vmatpush3.msra.mxu0 %v11332_v48  ;;  %8180 = vmatprep.mubr.msk.f32.mxu0 %vm8874_vm2, %v12417_v2  ;;  %v7797_v10 = vpop.f32.mrf.mxu1 }
 0x3c5   : > { %8206 = vmatpush3.msra.mxu1 %v11253_v50  ;;  %8181 = vmatmul.mubr.f32.vlgmr.msra.gmra.mxu0 %v11282_v29 }
 0x3c6   : > { %8207 = vmatprep.subr.mxu1 %v12417_v2  ;;  %8218 = vmatprep.subr.mxu0 %v12417_v2 }
 0x3c7   : > { %8208 = vmatpush3.msra.mxu1 %v11269_v15  ;;  %8219 = vmatpush3.msra.mxu0 %v4090_v54  ;;  %v4651_v54 = vsub.s32 6, %v8902_v1 }
 0x3c8   : > { %8209 = vmatprep.subr.mxu1 %v12417_v2  ;;  %8220 = vmatprep.subr.mxu0 %v12417_v2 }
 0x3c9   : > { %8210 = vmatpush3.msra.mxu1 %v11284_v8  ;;  %8221 = vmatpush3.msra.mxu0 %v4097_v26 }
 0x3ca   : > { %8211 = vmatprep.subr.mxu1 %v12417_v2  ;;  %8222 = vmatprep.subr.mxu0 %v12417_v2 }
 0x3cb   : > { %8212 = vmatpush3.msra.mxu1 %v11296_v3  ;;  %8223 = vmatpush3.msra.mxu0 %v4104_v60  ;;  %v4691_v60 = vpop.permute.xlu0 %4690 }
 0x3cc   : > { %8213 = vmatprep.subr.mxu1 %v12417_v2  ;;  %8224 = vmatprep.subr.mxu0 %v12417_v2 }
 0x3cd   : > { %8214 = vmatpush3.msra.mxu1 %v11309_v11  ;;  %8215 = vmatprep.mubr.msk.f32.mxu1 %vm8874_vm2, %v12417_v2 }
 0x3ce   : > { %8225 = vmatpush3.msra.mxu0 %v4111_v31  ;;  %8216 = vmatmul.mubr.f32.vlgmr.msra.gmra.mxu1 %v4079_v39 }
 0x3cf   : > { %8226 = vmatprep.subr.mxu0 %v12417_v2  ;;  %8253 = vmatprep.subr.mxu1 %v12417_v2 }
 0x3d0   : > { %8227 = vmatpush3.msra.mxu0 %v4118_v44  ;;  %8254 = vmatpush3.msra.mxu1 %v11101_v41  ;;  %v11470_v41 = vld [vmem:[%s8918_s23] sm:$0xff]  ;;  %v12460_v44 = vand.u32 4294901760, %v11266_v4 }
 0x3d1   : > { %8228 = vmatprep.subr.mxu0 %v12417_v2  ;;  %8255 = vmatprep.subr.mxu1 %v12417_v2  ;;  %v11473_v63 = vrot.slane %v11470_v41, %v4651_v54 }
 0x3d2   : > { %8229 = vmatpush3.msra.mxu0 %v4125_v5  ;;  %8256 = vmatpush3.msra.mxu1 %v11114_v43  ;;  %v4695_v43 = vpop.permute.xlu1 %4694 }
 0x3d3   : > { %8230 = vmatprep.subr.mxu0 %v12417_v2  ;;  %8257 = vmatprep.subr.mxu1 %v12417_v2  ;;  %v4731_v26 = vsub.f32 %v11473_v63, %v4711_v51  ;;  %v4728_v24 = vsub.f32 %v11473_v63, %v4699_v30  ;;  %v4726_v39 = vsub.f32 %v11473_v63, %v4691_v60 }
 0x3d4   : > { %8231 = vmatpush3.msra.mxu0 %v4132_v28  ;;  %8258 = vmatpush3.msra.mxu1 %v11122_v9  ;;  %v4732_v9 = vsub.f32 %v11473_v63, %v4715_v33  ;;  %v12461_v28 = vand.u32 4294901760, %v11278_v23 }
 0x3d5   : > { %8232 = vmatprep.subr.mxu0 %v12417_v2  ;;  %8259 = vmatprep.subr.mxu1 %v12417_v2  ;;  %v4747_v5 = vmax.f32 %v4731_v26, 0.0 }
 0x3d6   : > { %8233 = vmatpush3.msra.mxu0 %v4139_v61  ;;  %8260 = vmatpush3.msra.mxu1 %v11132_v49  ;;  %v12459_v49 = vand.u32 4294901760, %v11251_v42  ;;  %v4748_v31 = vmax.f32 %v4732_v9, 0.0  ;;  %v11496_v55 = vpop.permute.xlu1 %4686 }
 0x3d7   : > { %8234 = vmatprep.subr.mxu0 %v12417_v2  ;;  %8261 = vmatprep.subr.mxu1 %v12417_v2  ;;  %v11516_v4 = vand.u32 4294901760, %v4747_v5  ;;  %v4725_v45 = vsub.f32 %v11473_v63, %v11496_v55 }
 0x3d8   : > { %8235 = vmatpush3.msra.mxu0 %v4146_v0  ;;  %8262 = vmatpush3.msra.mxu1 %v11148_v40  ;;  %v4730_v40 = vsub.f32 %v11473_v63, %v11437_v22  ;;  %v11511_v61 = vand.u32 4294901760, %v4748_v31  ;;  %v12462_v0 = vand.u32 4294901760, %v11294_v47  ;;  %v4744_v47 = vmax.f32 %v4728_v24, 0.0 }
 0x3d9   : > { %8236 = vmatprep.subr.mxu0 %v12417_v2  ;;  %8263 = vmatprep.subr.mxu1 %v12417_v2  ;;  %v11539_v34 = vsub.f32 %v4747_v5, %v11516_v4 }
 0x3da   : > { %8237 = vmatpush3.msra.mxu0 %v12459_v49  ;;  %8264 = vmatpush3.msra.mxu1 %v11159_v18  ;;  %v4729_v18 = vsub.f32 %v11473_v63, %v4703_v12  ;;  %v4746_v42 = vmax.f32 %v4730_v40, 0.0  ;;  %v11521_v29 = vpop.permute.xlu1 %4678  ;;  %v11531_v62 = vsub.f32 %v4748_v31, %v11511_v61  ;;  %v11551_v32 = vand.u32 4294901760, %v4744_v47 }
 0x3db   : > { %8238 = vmatprep.subr.mxu0 %v12417_v2  ;;  %8265 = vmatprep.subr.mxu1 %v12417_v2  ;;  %v3036_v36 = vpop.f32.mrf.mxu0  ;;  %v4741_v12 = vmax.f32 %v4725_v45, 0.0  ;;  %v4723_v54 = vsub.f32 %v11473_v63, %v11521_v29 }
 0x3dc   : > { %8239 = vmatpush3.msra.mxu0 %v12460_v44  ;;  %8266 = vmatpush3.msra.mxu1 %v11180_v38  ;;  %v3037_v35 = vadd.f32 %v3036_v36, %v11420_v56  ;;  %v4683_v38 = vpop.permute.xlu0 %4682  ;;  %v4745_v23 = vmax.f32 %v4729_v18, 0.0  ;;  %v11533_v53 = vand.u32 4294901760, %v4746_v42  ;;  %v4845_v33 = vand.u32 4294901760, %v11531_v62 }
 0x3dd   : > { %8240 = vmatprep.subr.mxu0 %v12417_v2  ;;  %8267 = vmatprep.subr.mxu1 %v12417_v2  ;;  %v7832_v52 = vpop.f32.mrf.mxu0  ;;  %v4724_v7 = vsub.f32 %v11473_v63, %v4683_v38  ;;  %v11577_v30 = vsub.f32 %v4744_v47, %v11551_v32  ;;  %v11604_v44 = vand.u32 4294901760, %v4741_v12 }
 0x3de   : > { %8241 = vmatpush3.msra.mxu0 %v12461_v28  ;;  %8268 = vmatpush3.msra.mxu1 %v11192_v37  ;;  %v4727_v37 = vsub.f32 %v11473_v63, %v4695_v43  ;;  %v11558_v10 = vsub.f32 %v4746_v42, %v11533_v53  ;;  %v4671_v48 = vpop.permute.xlu1 %4670  ;;  %v4846_v49 = vsub.f32 %v11531_v62, %v4845_v33 }
 0x3df   : > { %8242 = vmatprep.subr.mxu0 %v12417_v2  ;;  %8269 = vmatprep.subr.mxu1 %v12417_v2  ;;  %v4740_v9 = vmax.f32 %v4724_v7, 0.0  ;;  %v4721_v5 = vsub.f32 %v11473_v63, %v4671_v48  ;;  %v4873_v18 = vand.u32 4294901760, %v11577_v30  ;;  %v11631_v29 = vsub.f32 %v4741_v12, %v11604_v44 }
 0x3e0   : > { %8243 = vmatpush3.msra.mxu0 %v12462_v0  ;;  %8270 = vmatpush3.msra.mxu1 %v11212_v20  ;;  %v3127_v20 = vrot.slane %v10283_v6, 3  ;;  %v4743_v14 = vmax.f32 %v4727_v37, 0.0  ;;  %v4675_v59 = vpop.permute.xlu0 %4674  ;;  %v4859_v36 = vand.u32 4294901760, %v11558_v10  ;;  %v4847_v38 = vand.u32 4294901760, %v4846_v49 }
 0x3e1   : > { %8244 = vmatprep.subr.mxu0 %v12417_v2  ;;  %8271 = vmatprep.subr.mxu1 %v12417_v2  ;;  %v4722_v26 = vsub.f32 %v11473_v63, %v4675_v59 }
 0x3e2   : > { %8245 = vmatpush3.msra.mxu0 %v4181_v19  ;;  %8272 = vmatpush3.msra.mxu1 %v11226_v16  ;;  %v11541_v19 = vand.u32 4294901760, %v4745_v23  ;;  %v4860_v24 = vsub.f32 %v11558_v10, %v4859_v36 }
 0x3e3   : > { %8246 = vmatprep.subr.mxu0 %v12417_v2  ;;  %8273 = vmatprep.subr.mxu1 %v12417_v2  ;;  %v4738_v28 = vmax.f32 %v4722_v26, 0.0 }
 0x3e4   : > { %8247 = vmatpush3.msra.mxu0 %v4188_v13  ;;  %8274 = vmatpush3.msra.mxu1 %v11240_v58  ;;  %v3123_v16 = vpop.f32.mrf.mxu1  ;;  %v4742_v13 = vmax.f32 %v4726_v39, 0.0  ;;  %v11565_v22 = vsub.f32 %v4745_v23, %v11541_v19  ;;  %v4667_v60 = vpop.permute.xlu0 %4666  ;;  %v4749_v39 = vrot.slane %v9207_v21, 6 }
 0x3e5   : > { %8248 = vmatprep.subr.mxu0 %v12417_v2  ;;  %8275 = vmatprep.subr.mxu1 %v12417_v2  ;;  %v3124_v27 = vadd.f32 %v3123_v16, %v3037_v35  ;;  %v4739_v35 = vmax.f32 %v4723_v54, 0.0  ;;  %v4720_v42 = vsub.f32 %v11473_v63, %v4667_v60  ;;  %v11647_v59 = vand.u32 4294901760, %v4738_v28 }
 0x3e6   : > { %8249 = vmatpush3.msra.mxu0 %v4195_v46  ;;  %8250 = vmatprep.mubr.msk.f32.mxu0 %vm8874_vm2, %v12417_v2  ;;  %v7867_v58 = vpop.f32.mrf.mxu1  ;;  %v4852_v46 = vand.u32 4294901760, %v11539_v34  ;;  %v11579_v43 = vand.u32 4294901760, %v4742_v13  ;;  %v4866_v40 = vand.u32 4294901760, %v11565_v22 }
 0x3e7   : > { %8276 = vmatpush3.msra.mxu1 %v11253_v50  ;;  %8251 = vmatmul.mubr.f32.vlgmr.msra.gmra.mxu0 %v11256_v25  ;;  %v3129_v56 = vmul.f32 %v3127_v20, %v3124_v27  ;;  %v11567_v50 = vand.u32 4294901760, %v4743_v14  ;;  %v11633_v47 = vand.u32 4294901760, %v4739_v35  ;;  %v4874_v20 = vsub.f32 %v11577_v30, %v4873_v18 }
 0x3e8   : > { %8277 = vmatprep.subr.mxu1 %v12417_v2  ;;  %8288 = vmatprep.subr.mxu0 %v12417_v2  ;;  %v4853_v31 = vsub.f32 %v11539_v34, %v4852_v46  ;;  %v11611_v52 = vsub.f32 %v4742_v13, %v11579_v43  ;;  %v4659_v37 = vpop.permute.xlu0 %4658  ;;  %v4861_v58 = vand.u32 4294901760, %v4860_v24  ;;  %v4736_v13 = vmax.f32 %v4720_v42, 0.0 }
 0x3e9   : > { %8278 = vmatpush3.msra.mxu1 %v11269_v15  ;;  %8289 = vmatpush3.msra.mxu0 %v11511_v61  ;;  %v3136_v51 = vrot.slane %v3129_v56, %v12452_v57  ;;  %v11600_v55 = vsub.f32 %v4743_v14, %v11567_v50  ;;  %v4718_v7 = vsub.f32 %v11473_v63, %v4659_v37 }
 0x3ea   : > { %8279 = vmatprep.subr.mxu1 %v12417_v2  ;;  %8290 = vmatprep.subr.mxu0 %v12417_v2  ;;  %v4854_v23 = vand.u32 4294901760, %v4853_v31  ;;  %v4887_v14 = vand.u32 4294901760, %v11611_v52  ;;  %v11658_v12 = vsub.f32 %v4739_v35, %v11633_v47  ;;  %v11673_v31 = vsub.f32 %v4738_v28, %v11647_v59 }
 0x3eb   : > { %8280 = vmatpush3.msra.mxu1 %v11284_v8  ;;  %8291 = vmatpush3.msra.mxu0 %v11516_v4  ;;  %v3137_v15 = vsel %vm3130_vm8, %v3136_v51, 0.0  ;;  %v4880_v0 = vand.u32 4294901760, %v11600_v55  ;;  %v4894_v51 = vand.u32 4294901760, %v11631_v29  ;;  %v4875_v35 = vand.u32 4294901760, %v4874_v20 }
 0x3ec   : > { %8281 = vmatprep.subr.mxu1 %v12417_v2  ;;  %8292 = vmatprep.subr.mxu0 %v12417_v2  ;;  %v11593_v8 = vadd.f32 %v3137_v15, %v11186_v17  ;;  %v4663_v17 = vpop.permute.xlu1 %4662  ;;  %v4888_v60 = vsub.f32 %v11611_v52, %v4887_v14 }
 0x3ed   : > { %8282 = vmatpush3.msra.mxu1 %v11296_v3  ;;  %8293 = vmatpush3.msra.mxu0 %v11533_v53  ;;  %v11616_v3 = vand.u32 4294901760, %v4740_v9  ;;  %v4719_v16 = vsub.f32 %v11473_v63, %v4663_v17  ;;  %v4881_v56 = vsub.f32 %v11600_v55, %v4880_v0  ;;  %v4895_v24 = vsub.f32 %v11631_v29, %v4894_v51 }
 0x3ee   : > { %8283 = vmatprep.subr.mxu1 %v12417_v2  ;;  %8294 = vmatprep.subr.mxu0 %v12417_v2  ;;  %v4889_v20 = vand.u32 4294901760, %v4888_v60 }
 0x3ef   : > { %8284 = vmatpush3.msra.mxu1 %v11309_v11  ;;  %8285 = vmatprep.mubr.msk.f32.mxu1 %vm8874_vm2, %v12417_v2  ;;  %v4867_v11 = vsub.f32 %v11565_v22, %v4866_v40  ;;  %v11645_v27 = vsub.f32 %v4740_v9, %v11616_v3  ;;  %v11663_v9 = vand.u32 4294901760, %v4749_v39  ;;  %v4735_v15 = vmax.f32 %v4719_v16, 0.0 }
 0x3f0   : > { %8295 = vmatpush3.msra.mxu0 %v11541_v19  ;;  %8286 = vmatmul.mubr.f32.vlgmr.msra.gmra.mxu1 %v11256_v25  ;;  %v4737_v25 = vmax.f32 %v4721_v5, 0.0  ;;  %v4655_v45 = vpop.permute.xlu1 %4654  ;;  %v11676_v5 = vand.u32 4294901760, %v4736_v13  ;;  %v4882_v17 = vand.u32 4294901760, %v4881_v56 }
 0x3f1   : > { %8296 = vmatprep.subr.mxu0 %v12417_v2  ;;  %8323 = vmatprep.subr.mxu1 %v12417_v2  ;;  %v4868_v48 = vand.u32 4294901760, %v4867_v11  ;;  %v4717_v26 = vsub.f32 %v11473_v63, %v4655_v45  ;;  %v12408_v49 = vand.u32 4294901760, %v11645_v27  ;;  %v4734_v63 = vmax.f32 %v4718_v7, 0.0 }
 0x3f2   : > { %8297 = vmatpush3.msra.mxu0 %v11551_v32  ;;  %8324 = vmatpush3.msra.mxu1 %v4847_v38  ;;  %v11660_v54 = vand.u32 4294901760, %v4737_v25  ;;  %v12406_v38 = vand.u32 4294901760, %v11658_v12  ;;  %v11689_v42 = vsub.f32 %v4749_v39, %v11663_v9  ;;  %v11691_v11 = vand.u32 4294901760, %v4735_v15 }
 0x3f3   : > { %8298 = vmatprep.subr.mxu0 %v12417_v2  ;;  %8325 = vmatprep.subr.mxu1 %v12417_v2  ;;  %v4902_v37 = vsub.f32 %v11645_v27, %v12408_v49  ;;  %v11701_v39 = vsub.f32 %v4736_v13, %v11676_v5  ;;  %v11703_v16 = vand.u32 4294901760, %v4734_v63  ;;  %v4896_v7 = vand.u32 4294901760, %v4895_v24 }
 0x3f4   : > { %8299 = vmatpush3.msra.mxu0 %v11567_v50  ;;  %8326 = vmatpush3.msra.mxu1 %v4854_v23  ;;  %v11685_v28 = vsub.f32 %v4737_v25, %v11660_v54  ;;  %v4733_v23 = vmax.f32 %v4717_v26, 0.0  ;;  %v12404_v25 = vand.u32 4294901760, %v11673_v31  ;;  %v4909_v45 = vsub.f32 %v11658_v12, %v12406_v38 }
 0x3f5   : > { %8300 = vmatprep.subr.mxu0 %v12417_v2  ;;  %8327 = vmatprep.subr.mxu1 %v12417_v2  ;;  %v4834_v56 = vand.u32 4294901760, %v11689_v42  ;;  %v12407_v24 = vand.u32 4294901760, %v11701_v39 }
 0x3f6   : > { %8301 = vmatpush3.msra.mxu0 %v11579_v43  ;;  %8328 = vmatpush3.msra.mxu1 %v4861_v58  ;;  %v12405_v58 = vand.u32 4294901760, %v11685_v28  ;;  %v11716_v26 = vand.u32 4294901760, %v4733_v23  ;;  %v4916_v60 = vsub.f32 %v11673_v31, %v12404_v25  ;;  %v4910_v25 = vand.u32 4294901760, %v4909_v45 }
 0x3f7   : > { %8302 = vmatprep.subr.mxu0 %v12417_v2  ;;  %8329 = vmatprep.subr.mxu1 %v12417_v2  ;;  %v4930_v45 = vsub.f32 %v11701_v39, %v12407_v24 }
 0x3f8   : > { %8303 = vmatpush3.msra.mxu0 %v11604_v44  ;;  %8330 = vmatpush3.msra.mxu1 %v4868_v48  ;;  %v11714_v48 = vsub.f32 %v4735_v15, %v11691_v11  ;;  %v11726_v15 = vsub.f32 %v4734_v63, %v11703_v16  ;;  %v11739_v63 = vsub.f32 %v4733_v23, %v11716_v26 }
 0x3f9   : > { %8304 = vmatprep.subr.mxu0 %v12417_v2  ;;  %8331 = vmatprep.subr.mxu1 %v12417_v2 }
 0x3fa   : > { %8305 = vmatpush3.msra.mxu0 %v11616_v3  ;;  %8332 = vmatpush3.msra.mxu1 %v4875_v35  ;;  %v4903_v35 = vand.u32 4294901760, %v4902_v37  ;;  %v4835_v37 = vsub.f32 %v11689_v42, %v4834_v56 }
 0x3fb   : > { %8306 = vmatprep.subr.mxu0 %v12417_v2  ;;  %8333 = vmatprep.subr.mxu1 %v12417_v2 }
 0x3fc   : > { %8307 = vmatpush3.msra.mxu0 %v11633_v47  ;;  %8334 = vmatpush3.msra.mxu1 %v4882_v17 }
 0x3fd   : > { %8308 = vmatprep.subr.mxu0 %v12417_v2  ;;  %8335 = vmatprep.subr.mxu1 %v12417_v2 }
 0x3fe   : > { %8309 = vmatpush3.msra.mxu0 %v11647_v59  ;;  %8336 = vmatpush3.msra.mxu1 %v4889_v20  ;;  %v3328_v13 = vpop.f32.mrf.mxu0  ;;  %v4923_v20 = vsub.f32 %v11685_v28, %v12405_v58  ;;  %v4836_v58 = vand.u32 4294901760, %v4835_v37  ;;  %v4931_v37 = vand.u32 4294901760, %v4930_v45 }
 0x3ff   : > { %8310 = vmatprep.subr.mxu0 %v12417_v2  ;;  %8337 = vmatprep.subr.mxu1 %v12417_v2 }
 0x400   : > { %8311 = vmatpush3.msra.mxu0 %v11660_v54  ;;  %8338 = vmatpush3.msra.mxu1 %v4896_v7  ;;  %v7902_v17 = vpop.f32.mrf.mxu0  ;;  %v4936_v7 = vand.u32 4294901760, %v11714_v48  ;;  %v4924_v23 = vand.u32 4294901760, %v4923_v20 }
 0x401   : > { %8312 = vmatprep.subr.mxu0 %v12417_v2  ;;  %8339 = vmatprep.subr.mxu1 %v12417_v2  ;;  %v4917_v17 = vand.u32 4294901760, %v4916_v60  ;;  %v4950_v60 = vand.u32 4294901760, %v11739_v63 }
 0x402   : > { %8313 = vmatpush3.msra.mxu0 %v11676_v5  ;;  %8340 = vmatpush3.msra.mxu1 %v4903_v35  ;;  %v4943_v35 = vand.u32 4294901760, %v11726_v15 }
 0x403   : > { %8314 = vmatprep.subr.mxu0 %v12417_v2  ;;  %8341 = vmatprep.subr.mxu1 %v12417_v2 }
 0x404   : > { %8315 = vmatpush3.msra.mxu0 %v11691_v11  ;;  %8342 = vmatpush3.msra.mxu1 %v4910_v25  ;;  %v4937_v25 = vsub.f32 %v11714_v48, %v4936_v7  ;;  %v4944_v20 = vsub.f32 %v11726_v15, %v4943_v35 }
 0x405   : > { %8316 = vmatprep.subr.mxu0 %v12417_v2  ;;  %8343 = vmatprep.subr.mxu1 %v12417_v2 }
 0x406   : > { %8317 = vmatpush3.msra.mxu0 %v11703_v16  ;;  %8344 = vmatpush3.msra.mxu1 %v4917_v17  ;;  %v3479_v38 = vpop.f32.mrf.mxu1 }
 0x407   : > { %8318 = vmatprep.subr.mxu0 %v12417_v2  ;;  %8345 = vmatprep.subr.mxu1 %v12417_v2  ;;  %v3480_v24 = vadd.f32 %v3479_v38, %v3328_v13  ;;  %v4951_v38 = vsub.f32 %v11739_v63, %v4950_v60  ;;  %v4945_v13 = vand.u32 4294901760, %v4944_v20 }
 0x408   : > { %8319 = vmatpush3.msra.mxu0 %v11716_v26  ;;  %8346 = vmatpush3.msra.mxu1 %v4924_v23  ;;  %v7937_v49 = vpop.f32.mrf.mxu1 }
 0x409   : > { %8320 = vmatprep.mubr.msk.f32.mxu0 %vm8874_vm2, %v12417_v2  ;;  %8347 = vmatprep.subr.mxu1 %v12417_v2  ;;  %v4938_v49 = vand.u32 4294901760, %v4937_v25 }
 0x40a   : > { %8358 = vmatprep.subr.mxu0 %v12417_v2  ;;  %8321 = vmatmul.mubr.f32.vlgmr.msra.gmra.mxu0 %v4836_v58  ;;  %v4952_v58 = vand.u32 4294901760, %v4951_v38  ;;  %v5470_v38 = vpop.permute.xlu0 %5469 }
 0x40b   : > { %8348 = vmatpush3.msra.mxu1 %v4931_v37  ;;  %8359 = vmatpush3.msra.mxu0 %v11531_v62  ;;  %v5466_v37 = vpop.permute.xlu1 %5465 }
 0x40c   : > { %8349 = vmatprep.subr.mxu1 %v12417_v2  ;;  %8360 = vmatprep.subr.mxu0 %v12417_v2 }
 0x40d   : > { %8350 = vmatpush3.msra.mxu1 %v4938_v49  ;;  %8361 = vmatpush3.msra.mxu0 %v11539_v34  ;;  %v5406_v34 = vsub.s32 7, %v8902_v1  ;;  %v3882_v49 = vrot.slane %v10283_v6, 4 }
 0x40e   : > { %8351 = vmatprep.subr.mxu1 %v12417_v2  ;;  %8362 = vmatprep.subr.mxu0 %v12417_v2 }
 0x40f   : > { %8352 = vmatpush3.msra.mxu1 %v4945_v13  ;;  %8363 = vmatpush3.msra.mxu0 %v11558_v10  ;;  %v5462_v62 = vpop.permute.xlu1 %5461  ;;  %v11870_v10 = vrot.slane %v11470_v41, %v5406_v34 }
 0x410   : > { %8353 = vmatprep.subr.mxu1 %v12417_v2  ;;  %8364 = vmatprep.subr.mxu0 %v12417_v2 }
 0x411   : > { %8354 = vmatpush3.msra.mxu1 %v4952_v58  ;;  %8355 = vmatprep.mubr.msk.f32.mxu1 %vm8874_vm2, %v12417_v2  ;;  %v5487_v41 = vsub.f32 %v11870_v10, %v5470_v38 }
 0x412   : > { %8365 = vmatpush3.msra.mxu0 %v11565_v22  ;;  %8356 = vmatmul.mubr.f32.vlgmr.msra.gmra.mxu1 %v11663_v9 }
 0x413   : > { %8366 = vmatprep.subr.mxu0 %v12417_v2  ;;  %8393 = vmatprep.subr.mxu1 %v12417_v2 }
 0x414   : > { %8367 = vmatpush3.msra.mxu0 %v11577_v30  ;;  %8394 = vmatpush3.msra.mxu1 %v11511_v61  ;;  %v5503_v30 = vmax.f32 %v5487_v41, 0.0 }
 0x415   : > { %8368 = vmatprep.subr.mxu0 %v12417_v2  ;;  %8395 = vmatprep.subr.mxu1 %v12417_v2 }
 0x416   : > { %8369 = vmatpush3.msra.mxu0 %v11600_v55  ;;  %8396 = vmatpush3.msra.mxu1 %v11516_v4  ;;  %v12465_v55 = vand.u32 4294901760, %v11673_v31 }
 0x417   : > { %8370 = vmatprep.subr.mxu0 %v12417_v2  ;;  %8397 = vmatprep.subr.mxu1 %v12417_v2 }
 0x418   : > { %8371 = vmatpush3.msra.mxu0 %v11611_v52  ;;  %8398 = vmatpush3.msra.mxu1 %v11533_v53 }
 0x419   : > { %8372 = vmatprep.subr.mxu0 %v12417_v2  ;;  %8399 = vmatprep.subr.mxu1 %v12417_v2 }
 0x41a   : > { %8373 = vmatpush3.msra.mxu0 %v11631_v29  ;;  %8400 = vmatpush3.msra.mxu1 %v11541_v19  ;;  %v12466_v29 = vand.u32 4294901760, %v11685_v28 }
 0x41b   : > { %8374 = vmatprep.subr.mxu0 %v12417_v2  ;;  %8401 = vmatprep.subr.mxu1 %v12417_v2 }
 0x41c   : > { %8375 = vmatpush3.msra.mxu0 %v11645_v27  ;;  %8402 = vmatpush3.msra.mxu1 %v11551_v32 }
 0x41d   : > { %8376 = vmatprep.subr.mxu0 %v12417_v2  ;;  %8403 = vmatprep.subr.mxu1 %v12417_v2 }
 0x41e   : > { %8377 = vmatpush3.msra.mxu0 %v11658_v12  ;;  %8404 = vmatpush3.msra.mxu1 %v11567_v50 }
 0x41f   : > { %8378 = vmatprep.subr.mxu0 %v12417_v2  ;;  %8405 = vmatprep.subr.mxu1 %v12417_v2  ;;  %v3583_v17 = vpop.f32.mrf.mxu0 }
 0x420   : > { %8379 = vmatpush3.msra.mxu0 %v11673_v31  ;;  %8406 = vmatpush3.msra.mxu1 %v11579_v43  ;;  %v3584_v45 = vadd.f32 %v3583_v17, %v3480_v24 }
 0x421   : > { %8380 = vmatprep.subr.mxu0 %v12417_v2  ;;  %8407 = vmatprep.subr.mxu1 %v12417_v2  ;;  %v7972_v23 = vpop.f32.mrf.mxu0 }
 0x422   : > { %8381 = vmatpush3.msra.mxu0 %v11685_v28  ;;  %8408 = vmatpush3.msra.mxu1 %v11604_v44 }
 0x423   : > { %8382 = vmatprep.subr.mxu0 %v12417_v2  ;;  %8409 = vmatprep.subr.mxu1 %v12417_v2 }
 0x424   : > { %8383 = vmatpush3.msra.mxu0 %v11701_v39  ;;  %8410 = vmatpush3.msra.mxu1 %v11616_v3 }
 0x425   : > { %8384 = vmatprep.subr.mxu0 %v12417_v2  ;;  %8411 = vmatprep.subr.mxu1 %v12417_v2 }
 0x426   : > { %8385 = vmatpush3.msra.mxu0 %v11714_v48  ;;  %8412 = vmatpush3.msra.mxu1 %v11633_v47 }
 0x427   : > { %8386 = vmatprep.subr.mxu0 %v12417_v2  ;;  %8413 = vmatprep.subr.mxu1 %v12417_v2 }
 0x428   : > { %8387 = vmatpush3.msra.mxu0 %v11726_v15  ;;  %8414 = vmatpush3.msra.mxu1 %v11647_v59  ;;  %v3672_v24 = vpop.f32.mrf.mxu1 }
 0x429   : > { %8388 = vmatprep.subr.mxu0 %v12417_v2  ;;  %8415 = vmatprep.subr.mxu1 %v12417_v2  ;;  %v11827_v25 = vadd.f32 %v3672_v24, %v3584_v45 }
 0x42a   : > { %8389 = vmatpush3.msra.mxu0 %v11739_v63  ;;  %8390 = vmatprep.mubr.msk.f32.mxu0 %vm8874_vm2, %v12417_v2  ;;  %v8007_v20 = vpop.f32.mrf.mxu1 }
 0x42b   : > { %8416 = vmatpush3.msra.mxu1 %v11660_v54  ;;  %8391 = vmatmul.mubr.f32.vlgmr.msra.gmra.mxu0 %v11689_v42 }
 0x42c   : > { %8417 = vmatprep.subr.mxu1 %v12417_v2  ;;  %8428 = vmatprep.subr.mxu0 %v12417_v2 }
 0x42d   : > { %8418 = vmatpush3.msra.mxu1 %v11676_v5  ;;  %8429 = vmatpush3.msra.mxu0 %v4845_v33  ;;  %v5458_v33 = vpop.permute.xlu0 %5457 }
 0x42e   : > { %8419 = vmatprep.subr.mxu1 %v12417_v2  ;;  %8430 = vmatprep.subr.mxu0 %v12417_v2  ;;  %v5484_v52 = vsub.f32 %v11870_v10, %v5458_v33 }
 0x42f   : > { %8420 = vmatpush3.msra.mxu1 %v11691_v11  ;;  %8431 = vmatpush3.msra.mxu0 %v4852_v46  ;;  %v5454_v46 = vpop.permute.xlu1 %5453 }
 0x430   : > { %8421 = vmatprep.subr.mxu1 %v12417_v2  ;;  %8432 = vmatprep.subr.mxu0 %v12417_v2  ;;  %v5500_v31 = vmax.f32 %v5484_v52, 0.0 }
 0x431   : > { %8422 = vmatpush3.msra.mxu1 %v11703_v16  ;;  %8433 = vmatpush3.msra.mxu0 %v4859_v36  ;;  %v5485_v36 = vsub.f32 %v11870_v10, %v5462_v62 }
 0x432   : > { %8423 = vmatprep.subr.mxu1 %v12417_v2  ;;  %8434 = vmatprep.subr.mxu0 %v12417_v2  ;;  %v11940_v48 = vand.u32 4294901760, %v5500_v31 }
 0x433   : > { %8424 = vmatpush3.msra.mxu1 %v11716_v26  ;;  %8425 = vmatprep.mubr.msk.f32.mxu1 %vm8874_vm2, %v12417_v2  ;;  %v11891_v22 = vpop.permute.xlu1 %5445 }
 0x434   : > { %8435 = vmatpush3.msra.mxu0 %v4866_v40  ;;  %8426 = vmatmul.mubr.f32.vlgmr.msra.gmra.mxu1 %v4834_v56  ;;  %v5481_v13 = vsub.f32 %v11870_v10, %v11891_v22 }
 0x435   : > { %8436 = vmatprep.subr.mxu0 %v12417_v2  ;;  %8463 = vmatprep.subr.mxu1 %v12417_v2 }
 0x436   : > { %8437 = vmatpush3.msra.mxu0 %v4873_v18  ;;  %8464 = vmatpush3.msra.mxu1 %v11511_v61  ;;  %v5450_v61 = vpop.permute.xlu0 %5449 }
 0x437   : > { %8438 = vmatprep.subr.mxu0 %v12417_v2  ;;  %8465 = vmatprep.subr.mxu1 %v12417_v2  ;;  %v5482_v28 = vsub.f32 %v11870_v10, %v5450_v61 }
 0x438   : > { %8439 = vmatpush3.msra.mxu0 %v4880_v0  ;;  %8466 = vmatpush3.msra.mxu1 %v11516_v4  ;;  %v12463_v4 = vand.u32 4294901760, %v11645_v27  ;;  %v5501_v27 = vmax.f32 %v5485_v36, 0.0 }
 0x439   : > { %8440 = vmatprep.subr.mxu0 %v12417_v2  ;;  %8467 = vmatprep.subr.mxu1 %v12417_v2 }
 0x43a   : > { %8441 = vmatpush3.msra.mxu0 %v4887_v14  ;;  %8468 = vmatpush3.msra.mxu1 %v11533_v53  ;;  %v5486_v53 = vsub.f32 %v11870_v10, %v5466_v37  ;;  %v5442_v40 = vpop.permute.xlu0 %5441  ;;  %v11909_v14 = vand.u32 4294901760, %v5503_v30  ;;  %v5497_v37 = vmax.f32 %v5481_v13, 0.0 }
 0x43b   : > { %8442 = vmatprep.subr.mxu0 %v12417_v2  ;;  %8469 = vmatprep.subr.mxu1 %v12417_v2  ;;  %v5480_v58 = vsub.f32 %v11870_v10, %v5442_v40 }
 0x43c   : > { %8443 = vmatpush3.msra.mxu0 %v4894_v51  ;;  %8470 = vmatpush3.msra.mxu1 %v11541_v19  ;;  %v12464_v19 = vand.u32 4294901760, %v11658_v12  ;;  %v5502_v0 = vmax.f32 %v5486_v53, 0.0  ;;  %v5438_v51 = vpop.permute.xlu1 %5437  ;;  %v12467_v12 = vand.u32 4294901760, %v11701_v39  ;;  %v11928_v39 = vsub.f32 %v5503_v30, %v11909_v14 }
 0x43d   : > { %8444 = vmatprep.subr.mxu0 %v12417_v2  ;;  %8471 = vmatprep.subr.mxu1 %v12417_v2  ;;  %v5479_v63 = vsub.f32 %v11870_v10, %v5438_v51  ;;  %v5496_v62 = vmax.f32 %v5480_v58, 0.0 }
 0x43e   : > { %8445 = vmatpush3.msra.mxu0 %v12463_v4  ;;  %8472 = vmatpush3.msra.mxu1 %v11551_v32  ;;  %v11922_v42 = vand.u32 4294901760, %v5502_v0  ;;  %v5600_v15 = vand.u32 4294901760, %v11928_v39  ;;  %v11988_v4 = vand.u32 4294901760, %v5497_v37 }
 0x43f   : > { %8446 = vmatprep.subr.mxu0 %v12417_v2  ;;  %8473 = vmatprep.subr.mxu1 %v12417_v2  ;;  %v5495_v53 = vmax.f32 %v5479_v63, 0.0 }
 0x440   : > { %8447 = vmatpush3.msra.mxu0 %v12464_v19  ;;  %8474 = vmatpush3.msra.mxu1 %v11567_v50  ;;  %v11946_v45 = vsub.f32 %v5502_v0, %v11922_v42  ;;  %v5430_v23 = vpop.permute.xlu1 %5429  ;;  %v12018_v0 = vsub.f32 %v5497_v37, %v11988_v4 }
 0x441   : > { %8448 = vmatprep.subr.mxu0 %v12417_v2  ;;  %8475 = vmatprep.subr.mxu1 %v12417_v2  ;;  %v3791_v32 = vpop.f32.mrf.mxu0  ;;  %v5477_v22 = vsub.f32 %v11870_v10, %v5430_v23 }
 0x442   : > { %8449 = vmatpush3.msra.mxu0 %v12465_v55  ;;  %8476 = vmatpush3.msra.mxu1 %v11579_v43  ;;  %v3792_v18 = vadd.f32 %v3791_v32, %v11827_v25  ;;  %v5483_v43 = vsub.f32 %v11870_v10, %v5454_v46  ;;  %v5607_v33 = vand.u32 4294901760, %v11946_v45  ;;  %v5601_v46 = vsub.f32 %v11928_v39, %v5600_v15 }
 0x443   : > { %8450 = vmatprep.subr.mxu0 %v12417_v2  ;;  %8477 = vmatprep.subr.mxu1 %v12417_v2  ;;  %v8042_v50 = vpop.f32.mrf.mxu0  ;;  %v12000_v32 = vand.u32 4294901760, %v5496_v62  ;;  %v5642_v58 = vand.u32 4294901760, %v12018_v0 }
 0x444   : > { %8451 = vmatpush3.msra.mxu0 %v12466_v29  ;;  %8478 = vmatpush3.msra.mxu1 %v11604_v44  ;;  %v11920_v44 = vpop.permute.xlu0 %5433  ;;  %v5499_v56 = vmax.f32 %v5483_v43, 0.0  ;;  %v5422_v19 = vpop.permute.xlu1 %5421  ;;  %v12020_v29 = vand.u32 4294901760, %v5495_v53 }
 0x445   : > { %8452 = vmatprep.subr.mxu0 %v12417_v2  ;;  %8479 = vmatprep.subr.mxu1 %v12417_v2  ;;  %v5478_v34 = vsub.f32 %v11870_v10, %v11920_v44  ;;  %v12029_v51 = vsub.f32 %v5496_v62, %v12000_v32 }
 0x446   : > { %8453 = vmatpush3.msra.mxu0 %v12467_v12  ;;  %8480 = vmatpush3.msra.mxu1 %v11616_v3  ;;  %v11930_v3 = vand.u32 4294901760, %v5501_v27  ;;  %v11956_v24 = vand.u32 4294901760, %v5499_v56  ;;  %v5475_v12 = vsub.f32 %v11870_v10, %v5422_v19 }
 0x447   : > { %8454 = vmatprep.subr.mxu0 %v12417_v2  ;;  %8481 = vmatprep.subr.mxu1 %v12417_v2  ;;  %v5494_v40 = vmax.f32 %v5478_v34, 0.0  ;;  %v5649_v37 = vand.u32 4294901760, %v12029_v51 }
 0x448   : > { %8455 = vmatpush3.msra.mxu0 %v4936_v7  ;;  %8482 = vmatpush3.msra.mxu1 %v11633_v47  ;;  %v5498_v7 = vmax.f32 %v5482_v28, 0.0  ;;  %v5426_v20 = vpop.permute.xlu0 %5425  ;;  %v5414_v44 = vpop.permute.xlu1 %5413 }
 0x449   : > { %8456 = vmatprep.subr.mxu0 %v12417_v2  ;;  %8483 = vmatprep.subr.mxu1 %v12417_v2  ;;  %v5476_v55 = vsub.f32 %v11870_v10, %v5426_v20 }
 0x44a   : > { %8457 = vmatpush3.msra.mxu0 %v4943_v35  ;;  %8484 = vmatpush3.msra.mxu1 %v11647_v59  ;;  %v3878_v47 = vpop.f32.mrf.mxu1  ;;  %v11954_v35 = vsub.f32 %v5501_v27, %v11930_v3  ;;  %v11967_v38 = vand.u32 4294901760, %v5498_v7  ;;  %v5493_v27 = vmax.f32 %v5477_v22, 0.0 }
 0x44b   : > { %8458 = vmatprep.subr.mxu0 %v12417_v2  ;;  %8485 = vmatprep.subr.mxu1 %v12417_v2  ;;  %v3879_v17 = vadd.f32 %v3878_v47, %v3792_v18  ;;  %v5492_v28 = vmax.f32 %v5476_v55, 0.0 }
 0x44c   : > { %8459 = vmatpush3.msra.mxu0 %v4950_v60  ;;  %8460 = vmatprep.mubr.msk.f32.mxu0 %vm8874_vm2, %v12417_v2  ;;  %v8077_v59 = vpop.f32.mrf.mxu1  ;;  %v11965_v60 = vsub.f32 %v5500_v31, %v11940_v48  ;;  %v5614_v61 = vand.u32 4294901760, %v11954_v35  ;;  %v11998_v36 = vsub.f32 %v5498_v7, %v11967_v38  ;;  %v5418_v18 = vpop.permute.xlu0 %5417  ;;  %v12034_v31 = vand.u32 4294901760, %v5494_v40 }
 0x44d   : > { %8486 = vmatpush3.msra.mxu1 %v11660_v54  ;;  %8461 = vmatmul.mubr.f32.vlgmr.msra.gmra.mxu0 %v11663_v9  ;;  %v3884_v25 = vmul.f32 %v3882_v49, %v3879_v17  ;;  %v5474_v49 = vsub.f32 %v11870_v10, %v5418_v18  ;;  %v12046_v17 = vsub.f32 %v5495_v53, %v12020_v29  ;;  %v12048_v23 = vand.u32 4294901760, %v5493_v27 }
 0x44e   : > { %8487 = vmatprep.subr.mxu1 %v12417_v2  ;;  %8498 = vmatprep.subr.mxu0 %v12417_v2  ;;  %v5615_v52 = vsub.f32 %v11954_v35, %v5614_v61  ;;  %v5635_v43 = vand.u32 4294901760, %v11998_v36  ;;  %v5491_v59 = vmax.f32 %v5475_v12, 0.0  ;;  %v12059_v63 = vsub.f32 %v5494_v40, %v12034_v31 }
 0x44f   : > { %8488 = vmatpush3.msra.mxu1 %v11676_v5  ;;  %8499 = vmatpush3.msra.mxu0 %v11909_v14  ;;  %v3891_v54 = vrot.slane %v3884_v25, %v12452_v57  ;;  %v11982_v5 = vsub.f32 %v5499_v56, %v11956_v24  ;;  %v5504_v56 = vrot.slane %v9207_v21, 7  ;;  %v5473_v25 = vsub.f32 %v11870_v10, %v5414_v44 }
 0x450   : > { %8489 = vmatprep.subr.mxu1 %v12417_v2  ;;  %8500 = vmatprep.subr.mxu0 %v12417_v2  ;;  %v5616_v13 = vand.u32 4294901760, %v5615_v52  ;;  %v5410_v47 = vpop.permute.xlu0 %5409  ;;  %v5636_v21 = vsub.f32 %v11998_v36, %v5635_v43  ;;  %v12061_v62 = vand.u32 4294901760, %v5492_v28  ;;  %v5490_v34 = vmax.f32 %v5474_v49, 0.0 }
 0x451   : > { %8490 = vmatpush3.msra.mxu1 %v11691_v11  ;;  %8501 = vmatpush3.msra.mxu0 %v11922_v42  ;;  %v3892_v41 = vsel %vm3885_vm9, %v3891_v54, 0.0  ;;  %v5621_v11 = vand.u32 4294901760, %v11965_v60  ;;  %v5628_v50 = vand.u32 4294901760, %v11982_v5  ;;  %v12064_v54 = vand.u32 4294901760, %v5504_v56 }
 0x452   : > { %8491 = vmatprep.subr.mxu1 %v12417_v2  ;;  %8502 = vmatprep.subr.mxu0 %v12417_v2  ;;  %v11994_v30 = vadd.f32 %v3892_v41, %v11593_v8  ;;  %v5608_v8 = vsub.f32 %v11946_v45, %v5607_v33  ;;  %v5643_v41 = vsub.f32 %v12018_v0, %v5642_v58  ;;  %v5656_v53 = vand.u32 4294901760, %v12046_v17 }
 0x453   : > { %8492 = vmatpush3.msra.mxu1 %v11703_v16  ;;  %8503 = vmatpush3.msra.mxu0 %v11930_v3  ;;  %v5602_v16 = vand.u32 4294901760, %v5601_v46  ;;  %v5629_v7 = vsub.f32 %v11982_v5, %v5628_v50  ;;  %v5472_v46 = vsub.f32 %v11870_v10, %v5410_v47  ;;  %v12074_v22 = vsub.f32 %v5493_v27, %v12048_v23 }
 0x454   : > { %8493 = vmatprep.subr.mxu1 %v12417_v2  ;;  %8504 = vmatprep.subr.mxu0 %v12417_v2  ;;  %v12077_v40 = vand.u32 4294901760, %v5491_v59  ;;  %v5489_v10 = vmax.f32 %v5473_v25, 0.0  ;;  %v5637_v55 = vand.u32 4294901760, %v5636_v21  ;;  %v5650_v18 = vsub.f32 %v12029_v51, %v5649_v37 }
 0x455   : > { %8494 = vmatpush3.msra.mxu1 %v11716_v26  ;;  %8495 = vmatprep.mubr.msk.f32.mxu1 %vm8874_vm2, %v12417_v2  ;;  %v5622_v26 = vsub.f32 %v11965_v60, %v5621_v11  ;;  %v5630_v19 = vand.u32 4294901760, %v5629_v7  ;;  %v12086_v52 = vsub.f32 %v5492_v28, %v12061_v62  ;;  %v12092_v27 = vand.u32 4294901760, %v5490_v34 }
 0x456   : > { %8505 = vmatpush3.msra.mxu0 %v11940_v48  ;;  %8496 = vmatmul.mubr.f32.vlgmr.msra.gmra.mxu1 %v11663_v9  ;;  %v5609_v9 = vand.u32 4294901760, %v5608_v8  ;;  %v5663_v8 = vand.u32 4294901760, %v12059_v63  ;;  %v5657_v12 = vsub.f32 %v12046_v17, %v5656_v53  ;;  %v12411_v28 = vand.u32 4294901760, %v12074_v22 }
 0x457   : > { %8506 = vmatprep.subr.mxu0 %v12417_v2  ;;  %8533 = vmatprep.subr.mxu1 %v12417_v2  ;;  %v5623_v20 = vand.u32 4294901760, %v5622_v26  ;;  %v5488_v26 = vmax.f32 %v5472_v46, 0.0  ;;  %v5644_v44 = vand.u32 4294901760, %v5643_v41  ;;  %v5651_v47 = vand.u32 4294901760, %v5650_v18 }
 0x458   : > { %8507 = vmatpush3.msra.mxu0 %v11956_v24  ;;  %8534 = vmatpush3.msra.mxu1 %v5602_v16  ;;  %v12090_v16 = vsub.f32 %v5504_v56, %v12064_v54  ;;  %v12104_v56 = vand.u32 4294901760, %v5489_v10  ;;  %v5664_v49 = vsub.f32 %v12059_v63, %v5663_v8  ;;  %v5658_v46 = vand.u32 4294901760, %v5657_v12 }
 0x459   : > { %8508 = vmatprep.subr.mxu0 %v12417_v2  ;;  %8535 = vmatprep.subr.mxu1 %v12417_v2  ;;  %v12117_v25 = vand.u32 4294901760, %v5488_v26 }
 0x45a   : > { %8509 = vmatpush3.msra.mxu0 %v11967_v38  ;;  %8536 = vmatpush3.msra.mxu1 %v5609_v9  ;;  %v12102_v9 = vsub.f32 %v5491_v59, %v12077_v40  ;;  %v5589_v7 = vand.u32 4294901760, %v12090_v16  ;;  %v12115_v59 = vsub.f32 %v5490_v34, %v12092_v27  ;;  %v12127_v34 = vsub.f32 %v5489_v10, %v12104_v56 }
 0x45b   : > { %8510 = vmatprep.subr.mxu0 %v12417_v2  ;;  %8537 = vmatprep.subr.mxu1 %v12417_v2  ;;  %v5665_v18 = vand.u32 4294901760, %v5664_v49  ;;  %v12140_v10 = vsub.f32 %v5488_v26, %v12117_v25 }
 0x45c   : > { %8511 = vmatpush3.msra.mxu0 %v11988_v4  ;;  %8538 = vmatpush3.msra.mxu1 %v5616_v13  ;;  %v12409_v13 = vand.u32 4294901760, %v12086_v52  ;;  %v5590_v12 = vsub.f32 %v12090_v16, %v5589_v7 }
 0x45d   : > { %8512 = vmatprep.subr.mxu0 %v12417_v2  ;;  %8539 = vmatprep.subr.mxu1 %v12417_v2 }
 0x45e   : > { %8513 = vmatpush3.msra.mxu0 %v12000_v32  ;;  %8540 = vmatpush3.msra.mxu1 %v5623_v20  ;;  %v5671_v20 = vsub.f32 %v12074_v22, %v12411_v28 }
 0x45f   : > { %8514 = vmatprep.subr.mxu0 %v12417_v2  ;;  %8541 = vmatprep.subr.mxu1 %v12417_v2 }
 0x460   : > { %8515 = vmatpush3.msra.mxu0 %v12020_v29  ;;  %8542 = vmatpush3.msra.mxu1 %v5630_v19  ;;  %v12410_v19 = vand.u32 4294901760, %v12102_v9 }
 0x461   : > { %8516 = vmatprep.subr.mxu0 %v12417_v2  ;;  %8543 = vmatprep.subr.mxu1 %v12417_v2 }
 0x462   : > { %8517 = vmatpush3.msra.mxu0 %v12034_v31  ;;  %8544 = vmatpush3.msra.mxu1 %v5637_v55  ;;  %v5678_v55 = vsub.f32 %v12086_v52, %v12409_v13  ;;  %v5685_v49 = vsub.f32 %v12102_v9, %v12410_v19 }
 0x463   : > { %8518 = vmatprep.subr.mxu0 %v12417_v2  ;;  %8545 = vmatprep.subr.mxu1 %v12417_v2 }
 0x464   : > { %8519 = vmatpush3.msra.mxu0 %v12048_v23  ;;  %8546 = vmatpush3.msra.mxu1 %v5644_v44  ;;  %v4083_v21 = vpop.f32.mrf.mxu0  ;;  %v5691_v44 = vand.u32 4294901760, %v12115_v59  ;;  %v5679_v26 = vand.u32 4294901760, %v5678_v55 }
 0x465   : > { %8520 = vmatprep.subr.mxu0 %v12417_v2  ;;  %8547 = vmatprep.subr.mxu1 %v12417_v2 }
 0x466   : > { %8521 = vmatpush3.msra.mxu0 %v12061_v62  ;;  %8548 = vmatpush3.msra.mxu1 %v5651_v47  ;;  %v8112_v41 = vpop.f32.mrf.mxu0  ;;  %v5672_v47 = vand.u32 4294901760, %v5671_v20  ;;  %v5692_v20 = vsub.f32 %v12115_v59, %v5691_v44 }
 0x467   : > { %8522 = vmatprep.subr.mxu0 %v12417_v2  ;;  %8549 = vmatprep.subr.mxu1 %v12417_v2  ;;  %v5591_v41 = vand.u32 4294901760, %v5590_v12  ;;  %v5686_v12 = vand.u32 4294901760, %v5685_v49 }
 0x468   : > { %8523 = vmatpush3.msra.mxu0 %v12077_v40  ;;  %8550 = vmatpush3.msra.mxu1 %v5658_v46  ;;  %v5698_v46 = vand.u32 4294901760, %v12127_v34 }
 0x469   : > { %8524 = vmatprep.subr.mxu0 %v12417_v2  ;;  %8551 = vmatprep.subr.mxu1 %v12417_v2 }
 0x46a   : > { %8525 = vmatpush3.msra.mxu0 %v12092_v27  ;;  %8552 = vmatpush3.msra.mxu1 %v5665_v18  ;;  %v5705_v18 = vand.u32 4294901760, %v12140_v10  ;;  %v5699_v55 = vsub.f32 %v12127_v34, %v5698_v46 }
 0x46b   : > { %8526 = vmatprep.subr.mxu0 %v12417_v2  ;;  %8553 = vmatprep.subr.mxu1 %v12417_v2 }
 0x46c   : > { %8527 = vmatpush3.msra.mxu0 %v12104_v56  ;;  %8554 = vmatpush3.msra.mxu1 %v5672_v47  ;;  %v4234_v13 = vpop.f32.mrf.mxu1 }
 0x46d   : > { %8528 = vmatprep.subr.mxu0 %v12417_v2  ;;  %8555 = vmatprep.subr.mxu1 %v12417_v2  ;;  %v4235_v19 = vadd.f32 %v4234_v13, %v4083_v21  ;;  %v5706_v13 = vsub.f32 %v12140_v10, %v5705_v18  ;;  %v5700_v21 = vand.u32 4294901760, %v5699_v55 }
 0x46e   : > { %8529 = vmatpush3.msra.mxu0 %v12117_v25  ;;  %8556 = vmatpush3.msra.mxu1 %v5679_v26  ;;  %v8147_v28 = vpop.f32.mrf.mxu1 }
 0x46f   : > { %8530 = vmatprep.mubr.msk.f32.mxu0 %vm8874_vm2, %v12417_v2  ;;  %8557 = vmatprep.subr.mxu1 %v12417_v2  ;;  %v5693_v28 = vand.u32 4294901760, %v5692_v20  ;;  %v5707_v47 = vand.u32 4294901760, %v5706_v13 }
 0x470   : > { %8568 = vmatprep.subr.mxu0 %v12417_v2  ;;  %8531 = vmatmul.mubr.f32.vlgmr.msra.gmra.mxu0 %v5591_v41 }
 0x471   : > { %8558 = vmatpush3.msra.mxu1 %v5686_v12  ;;  %8569 = vmatpush3.msra.mxu0 %v11928_v39  ;;  %v6147_v12 = vrot.slane %v10283_v6, 7 }
 0x472   : > { %8559 = vmatprep.subr.mxu1 %v12417_v2  ;;  %8570 = vmatprep.subr.mxu0 %v12417_v2 }
 0x473   : > { %8560 = vmatpush3.msra.mxu1 %v5693_v28  ;;  %8571 = vmatpush3.msra.mxu0 %v11946_v45  ;;  %v12470_v45 = vand.u32 4294901760, %v12102_v9 }
 0x474   : > { %8561 = vmatprep.subr.mxu1 %v12417_v2  ;;  %8572 = vmatprep.subr.mxu0 %v12417_v2 }
 0x475   : > { %8562 = vmatpush3.msra.mxu1 %v5700_v21  ;;  %8573 = vmatpush3.msra.mxu0 %v11954_v35 }
 0x476   : > { %8563 = vmatprep.subr.mxu1 %v12417_v2  ;;  %8574 = vmatprep.subr.mxu0 %v12417_v2 }
 0x477   : > { %8564 = vmatpush3.msra.mxu1 %v5707_v47  ;;  %8565 = vmatprep.mubr.msk.f32.mxu1 %vm8874_vm2, %v12417_v2 }
 0x478   : > { %8575 = vmatpush3.msra.mxu0 %v11965_v60  ;;  %8566 = vmatmul.mubr.f32.vlgmr.msra.gmra.mxu1 %v12064_v54 }
 0x479   : > { %8576 = vmatprep.subr.mxu0 %v12417_v2  ;;  %8603 = vmatprep.subr.mxu1 %v12417_v2 }
 0x47a   : > { %8577 = vmatpush3.msra.mxu0 %v11982_v5  ;;  %8604 = vmatpush3.msra.mxu1 %v11909_v14 }
 0x47b   : > { %8578 = vmatprep.subr.mxu0 %v12417_v2  ;;  %8605 = vmatprep.subr.mxu1 %v12417_v2 }
 0x47c   : > { %8579 = vmatpush3.msra.mxu0 %v11998_v36  ;;  %8606 = vmatpush3.msra.mxu1 %v11922_v42 }
 0x47d   : > { %8580 = vmatprep.subr.mxu0 %v12417_v2  ;;  %8607 = vmatprep.subr.mxu1 %v12417_v2 }
 0x47e   : > { %8581 = vmatpush3.msra.mxu0 %v12018_v0  ;;  %8608 = vmatpush3.msra.mxu1 %v11930_v3 }
 0x47f   : > { %8582 = vmatprep.subr.mxu0 %v12417_v2  ;;  %8609 = vmatprep.subr.mxu1 %v12417_v2 }
 0x480   : > { %8583 = vmatpush3.msra.mxu0 %v12029_v51  ;;  %8610 = vmatpush3.msra.mxu1 %v11940_v48 }
 0x481   : > { %8584 = vmatprep.subr.mxu0 %v12417_v2  ;;  %8611 = vmatprep.subr.mxu1 %v12417_v2 }
 0x482   : > { %8585 = vmatpush3.msra.mxu0 %v12046_v17  ;;  %8612 = vmatpush3.msra.mxu1 %v11956_v24 }
 0x483   : > { %8586 = vmatprep.subr.mxu0 %v12417_v2  ;;  %8613 = vmatprep.subr.mxu1 %v12417_v2 }
 0x484   : > { %8587 = vmatpush3.msra.mxu0 %v12059_v63  ;;  %8614 = vmatpush3.msra.mxu1 %v11967_v38 }
 0x485   : > { %8588 = vmatprep.subr.mxu0 %v12417_v2  ;;  %8615 = vmatprep.subr.mxu1 %v12417_v2  ;;  %v4338_v49 = vpop.f32.mrf.mxu0 }
 0x486   : > { %8589 = vmatpush3.msra.mxu0 %v12074_v22  ;;  %8616 = vmatpush3.msra.mxu1 %v11988_v4  ;;  %v4339_v26 = vadd.f32 %v4338_v49, %v4235_v19 }
 0x487   : > { %8590 = vmatprep.subr.mxu0 %v12417_v2  ;;  %8617 = vmatprep.subr.mxu1 %v12417_v2  ;;  %v8182_v41 = vpop.f32.mrf.mxu0 }
 0x488   : > { %8591 = vmatpush3.msra.mxu0 %v12086_v52  ;;  %8618 = vmatpush3.msra.mxu1 %v12000_v32 }
 0x489   : > { %8592 = vmatprep.subr.mxu0 %v12417_v2  ;;  %8619 = vmatprep.subr.mxu1 %v12417_v2 }
 0x48a   : > { %8593 = vmatpush3.msra.mxu0 %v12102_v9  ;;  %8620 = vmatpush3.msra.mxu1 %v12020_v29 }
 0x48b   : > { %8594 = vmatprep.subr.mxu0 %v12417_v2  ;;  %8621 = vmatprep.subr.mxu1 %v12417_v2 }
 0x48c   : > { %8595 = vmatpush3.msra.mxu0 %v12115_v59  ;;  %8622 = vmatpush3.msra.mxu1 %v12034_v31 }
 0x48d   : > { %8596 = vmatprep.subr.mxu0 %v12417_v2  ;;  %8623 = vmatprep.subr.mxu1 %v12417_v2 }
 0x48e   : > { %8597 = vmatpush3.msra.mxu0 %v12127_v34  ;;  %8624 = vmatpush3.msra.mxu1 %v12048_v23  ;;  %v4427_v19 = vpop.f32.mrf.mxu1 }
 0x48f   : > { %8598 = vmatprep.subr.mxu0 %v12417_v2  ;;  %8625 = vmatprep.subr.mxu1 %v12417_v2  ;;  %v4428_v20 = vadd.f32 %v4427_v19, %v4339_v26 }
 0x490   : > { %8599 = vmatpush3.msra.mxu0 %v12140_v10  ;;  %8600 = vmatprep.mubr.msk.f32.mxu0 %vm8874_vm2, %v12417_v2  ;;  %v8217_v55 = vpop.f32.mrf.mxu1 }
 0x491   : > { %8626 = vmatpush3.msra.mxu1 %v12061_v62  ;;  %8601 = vmatmul.mubr.f32.vlgmr.msra.gmra.mxu0 %v12090_v16 }
 0x492   : > { %8627 = vmatprep.subr.mxu1 %v12417_v2  ;;  %8638 = vmatprep.subr.mxu0 %v12417_v2 }
 0x493   : > { %8628 = vmatpush3.msra.mxu1 %v12077_v40  ;;  %8639 = vmatpush3.msra.mxu0 %v5600_v15  ;;  %v4637_v15 = vrot.slane %v10283_v6, 5 }
 0x494   : > { %8629 = vmatprep.subr.mxu1 %v12417_v2  ;;  %8640 = vmatprep.subr.mxu0 %v12417_v2 }
 0x495   : > { %8630 = vmatpush3.msra.mxu1 %v12092_v27  ;;  %8641 = vmatpush3.msra.mxu0 %v5607_v33 }
 0x496   : > { %8631 = vmatprep.subr.mxu1 %v12417_v2  ;;  %8642 = vmatprep.subr.mxu0 %v12417_v2 }
 0x497   : > { %8632 = vmatpush3.msra.mxu1 %v12104_v56  ;;  %8643 = vmatpush3.msra.mxu0 %v5614_v61 }
 0x498   : > { %8633 = vmatprep.subr.mxu1 %v12417_v2  ;;  %8644 = vmatprep.subr.mxu0 %v12417_v2 }
 0x499   : > { %8634 = vmatpush3.msra.mxu1 %v12117_v25  ;;  %8635 = vmatprep.mubr.msk.f32.mxu1 %vm8874_vm2, %v12417_v2 }
 0x49a   : > { %8645 = vmatpush3.msra.mxu0 %v5621_v11  ;;  %8636 = vmatmul.mubr.f32.vlgmr.msra.gmra.mxu1 %v5589_v7 }
 0x49b   : > { %8646 = vmatprep.subr.mxu0 %v12417_v2  ;;  %8673 = vmatprep.subr.mxu1 %v12417_v2 }
 0x49c   : > { %8647 = vmatpush3.msra.mxu0 %v5628_v50  ;;  %8674 = vmatpush3.msra.mxu1 %v11909_v14 }
 0x49d   : > { %8648 = vmatprep.subr.mxu0 %v12417_v2  ;;  %8675 = vmatprep.subr.mxu1 %v12417_v2 }
 0x49e   : > { %8649 = vmatpush3.msra.mxu0 %v5635_v43  ;;  %8676 = vmatpush3.msra.mxu1 %v11922_v42  ;;  %v12468_v42 = vand.u32 4294901760, %v12074_v22 }
 0x49f   : > { %8650 = vmatprep.subr.mxu0 %v12417_v2  ;;  %8677 = vmatprep.subr.mxu1 %v12417_v2 }
 0x4a0   : > { %8651 = vmatpush3.msra.mxu0 %v5642_v58  ;;  %8678 = vmatpush3.msra.mxu1 %v11930_v3 }
 0x4a1   : > { %8652 = vmatprep.subr.mxu0 %v12417_v2  ;;  %8679 = vmatprep.subr.mxu1 %v12417_v2 }
 0x4a2   : > { %8653 = vmatpush3.msra.mxu0 %v5649_v37  ;;  %8680 = vmatpush3.msra.mxu1 %v11940_v48  ;;  %v12469_v48 = vand.u32 4294901760, %v12086_v52 }
 0x4a3   : > { %8654 = vmatprep.subr.mxu0 %v12417_v2  ;;  %8681 = vmatprep.subr.mxu1 %v12417_v2 }
 0x4a4   : > { %8655 = vmatpush3.msra.mxu0 %v5656_v53  ;;  %8682 = vmatpush3.msra.mxu1 %v11956_v24 }
 0x4a5   : > { %8656 = vmatprep.subr.mxu0 %v12417_v2  ;;  %8683 = vmatprep.subr.mxu1 %v12417_v2 }
 0x4a6   : > { %8657 = vmatpush3.msra.mxu0 %v5663_v8  ;;  %8684 = vmatpush3.msra.mxu1 %v11967_v38 }
 0x4a7   : > { %8658 = vmatprep.subr.mxu0 %v12417_v2  ;;  %8685 = vmatprep.subr.mxu1 %v12417_v2  ;;  %v4546_v14 = vpop.f32.mrf.mxu0 }
 0x4a8   : > { %8659 = vmatpush3.msra.mxu0 %v12468_v42  ;;  %8686 = vmatpush3.msra.mxu1 %v11988_v4  ;;  %v4547_v39 = vadd.f32 %v4546_v14, %v4428_v20 }
 0x4a9   : > { %8660 = vmatprep.subr.mxu0 %v12417_v2  ;;  %8687 = vmatprep.subr.mxu1 %v12417_v2  ;;  %v8252_v3 = vpop.f32.mrf.mxu0 }
 0x4aa   : > { %8661 = vmatpush3.msra.mxu0 %v12469_v48  ;;  %8688 = vmatpush3.msra.mxu1 %v12000_v32 }
 0x4ab   : > { %8662 = vmatprep.subr.mxu0 %v12417_v2  ;;  %8689 = vmatprep.subr.mxu1 %v12417_v2 }
 0x4ac   : > { %8663 = vmatpush3.msra.mxu0 %v12470_v45  ;;  %8690 = vmatpush3.msra.mxu1 %v12020_v29 }
 0x4ad   : > { %8664 = vmatprep.subr.mxu0 %v12417_v2  ;;  %8691 = vmatprep.subr.mxu1 %v12417_v2 }
 0x4ae   : > { %8665 = vmatpush3.msra.mxu0 %v5691_v44  ;;  %8692 = vmatpush3.msra.mxu1 %v12034_v31 }
 0x4af   : > { %8666 = vmatprep.subr.mxu0 %v12417_v2  ;;  %8693 = vmatprep.subr.mxu1 %v12417_v2 }
 0x4b0   : > { %8667 = vmatpush3.msra.mxu0 %v5698_v46  ;;  %8694 = vmatpush3.msra.mxu1 %v12048_v23  ;;  %v4633_v35 = vpop.f32.mrf.mxu1 }
 0x4b1   : > { %8668 = vmatprep.subr.mxu0 %v12417_v2  ;;  %8695 = vmatprep.subr.mxu1 %v12417_v2  ;;  %v4634_v24 = vadd.f32 %v4633_v35, %v4547_v39 }
 0x4b2   : > { %8669 = vmatpush3.msra.mxu0 %v5705_v18  ;;  %8670 = vmatprep.mubr.msk.f32.mxu0 %vm8874_vm2, %v12417_v2  ;;  %v8287_v60 = vpop.f32.mrf.mxu1 }
 0x4b3   : > { %8696 = vmatpush3.msra.mxu1 %v12061_v62  ;;  %8671 = vmatmul.mubr.f32.vlgmr.msra.gmra.mxu0 %v12064_v54  ;;  %v4639_v38 = vmul.f32 %v4637_v15, %v4634_v24 }
 0x4b4   : > { %8697 = vmatprep.subr.mxu1 %v12417_v2  ;;  %8705 = vmatprep.mubr.msk.f32.mxu1 %vm8874_vm2, %v12417_v2 }
 0x4b5   : > { %8698 = vmatpush3.msra.mxu1 %v12077_v40  ;;  %v4646_v33 = vrot.slane %v4639_v38, %v12452_v57 }
 0x4b6   : > { %8699 = vmatprep.subr.mxu1 %v12417_v2 }
 0x4b7   : > { %8700 = vmatpush3.msra.mxu1 %v12092_v27  ;;  %v4647_v61 = vsel %vm4640_vm10, %v4646_v33, 0.0 }
 0x4b8   : > { %8701 = vmatprep.subr.mxu1 %v12417_v2  ;;  %v4648_v5 = vadd.f32 %v4647_v61, %v11994_v30 }
 0x4b9   : > { %8702 = vmatpush3.msra.mxu1 %v12104_v56 }
 0x4ba   : > { %8703 = vmatprep.subr.mxu1 %v12417_v2  ;;  %v5392_v2 = vrot.slane %v10283_v6, 6  ;;  %v12473_v6 = vld [vmem:[#allocation12_spill] sm:$0xff] (%p47_p10) }
 0x4bb   : > { %8704 = vmatpush3.msra.mxu1 %v12117_v25  ;;  %6173 = vst [vmem:[#allocation7 + $0x8] sm:$0xff] (%p47_p10), %v12473_v6 }
 0x4bc   : > { %8706 = vmatmul.mubr.f32.vlgmr.msra.gmra.mxu1 %v12064_v54 }
 0x4ca   : > { %v4838_v4 = vpop.f32.mrf.mxu0 }
 0x4cc   : > { %v8322_v11 = vpop.f32.mrf.mxu0 }
 0x4d2   : > { %v4989_v36 = vpop.f32.mrf.mxu1 }
 0x4d3   : > { %v4990_v32 = vadd.f32 %v4989_v36, %v4838_v4 }
 0x4d4   : > { %v8357_v50 = vpop.f32.mrf.mxu1 }
 0x4eb   : > { %v5093_v0 = vpop.f32.mrf.mxu0 }
 0x4ec   : > { %v5094_v29 = vadd.f32 %v5093_v0, %v4990_v32 }
 0x4ed   : > { %v8392_v43 = vpop.f32.mrf.mxu0 }
 0x4f4   : > { %v5182_v51 = vpop.f32.mrf.mxu1 }
 0x4f5   : > { %v5183_v31 = vadd.f32 %v5182_v51, %v5094_v29 }
 0x4f6   : > { %v8427_v58 = vpop.f32.mrf.mxu1 }
 0x50d   : > { %v5301_v30 = vpop.f32.mrf.mxu0 }
 0x50e   : > { %v5302_v17 = vadd.f32 %v5301_v30, %v5183_v31 }
 0x50f   : > { %v8462_v23 = vpop.f32.mrf.mxu0 }
 0x516   : > { %v5388_v37 = vpop.f32.mrf.mxu1 }
 0x517   : > { %v5389_v63 = vadd.f32 %v5388_v37, %v5302_v17 }
 0x518   : > { %v8497_v62 = vpop.f32.mrf.mxu1 }
 0x519   : > { %v5394_v54 = vmul.f32 %v5392_v2, %v5389_v63  ;;  %v12471_v2 = vld [vmem:[#allocation12_spill] sm:$0xff] }
 0x51b   : > { %v5401_v53 = vrot.slane %v5394_v54, %v12452_v57 }
 0x51d   : > { %v5402_v22 = vsel %vm5395_vm11, %v5401_v53, 0.0 }
 0x51e   : > { %v5403_v40 = vadd.f32 %v5402_v22, %v4648_v5 }
 0x530   : > { %v5593_v8 = vpop.f32.mrf.mxu0 }
 0x532   : > { %v8532_v52 = vpop.f32.mrf.mxu0 }
 0x538   : > { %v5744_v16 = vpop.f32.mrf.mxu1 }
 0x539   : > { %v5745_v34 = vadd.f32 %v5744_v16, %v5593_v8 }
 0x53a   : > { %v8567_v27 = vpop.f32.mrf.mxu1 }
 0x551   : > { %v5848_v9 = vpop.f32.mrf.mxu0 }
 0x552   : > { %v5849_v10 = vadd.f32 %v5848_v9, %v5745_v34 }
 0x553   : > { %v8602_v56 = vpop.f32.mrf.mxu0 }
 0x55a   : > { %v5937_v7 = vpop.f32.mrf.mxu1 }
 0x55b   : > { %v5938_v46 = vadd.f32 %v5937_v7, %v5849_v10 }
 0x55c   : > { %v8637_v59 = vpop.f32.mrf.mxu1 }
 0x573   : > { %v6056_v25 = vpop.f32.mrf.mxu0 }
 0x574   : > { %v6057_v18 = vadd.f32 %v6056_v25, %v5938_v46 }
 0x575   : > { %v8672_v44 = vpop.f32.mrf.mxu0 }
 0x57c   : > { %v6143_v13 = vpop.f32.mrf.mxu1 }
 0x57d   : > { %v6144_v28 = vadd.f32 %v6143_v13, %v6057_v18 }
 0x57e   : > { %v8707_v21 = vpop.f32.mrf.mxu1 }
 0x57f   : > { %v6149_v47 = vmul.f32 %v6147_v12, %v6144_v28 }
 0x581   : > { %v6156_v49 = vrot.slane %v6149_v47, %v12452_v57 }
 0x582   :  { %49 = sbr.rel (!%p47_p10) target bundleno = 32 (0x20), region = 45 }
 0x583   : > { %v6157_v26 = vsel %vm6150_vm12, %v6156_v49, 0.0 }
 0x584   : > { %v6158_v41 = vadd.f32 %v6157_v26, %v5403_v40  }
 0x586   : > { %v12472_v3 = vmov %v6158_v41  ;;  %6172 = vst [vmem:[#allocation7] sm:$0xff] (%p47_p10), %v6158_v41 }
 0x587   :  { %8824 = shalt.err (!%p8821_p1)
}
 0x588   :  { %6183 = dma.vmem_to_hbm [thread:$0]  %s6181_s28, 256, %s12355_s2, [#allocation4]  }
 0x589   :  { %8849 = dma.done.wait [#allocation4], 256  }
 0x58a   :  { %8850 = vsyncadd [#allocation4], 4294967040 }
 0x58b   :  { %6187 = vsyncpa [#allocation3], 1 }
 0x58c   :  { %6188 = vsyncpa [#allocation6], 1 }
 0x58d   :  { %6189 = vsyncpa [#allocation4], 1 }

</bundles_post_ra>
